<compile_context>
chip_gen: v7x
topology: tpu7x:2x2x1
jax: 0.10.0
libtpu: 0.0.40
codegen_flags: <defaults>
</compile_context>

<pallas_src>
import functools

import jax
import jax.numpy as jnp
from jax.experimental import pallas as pl
from jax.experimental.pallas import tpu as pltpu


def _round_up(x, m):
    return ((x + m - 1) // m) * m


_VMEM_LIMIT = 32 * 1024 * 1024   # explicit scoped-VMEM budget (safe on v5e/v6e/v7x)


# ----------------------------------------------------------------------------
# Pallas kernels
# ----------------------------------------------------------------------------

def _matmul_bias_act_kernel(x_ref, w_ref, shift_ref, o_ref, *, act):
    """Fused (X @ W) + shift, then activation.

    Conv folded to matmul; conv-bias + BN are pre-folded: the BN scale lives in
    the weight columns, so the epilogue is a single f32 add + activation."""
    y = jnp.dot(x_ref[...], w_ref[...], preferred_element_type=jnp.float32)
    y = y + shift_ref[...]
    if act == "relu":
        y = jnp.maximum(y, 0.0)
    elif act == "leaky":                      # LeakyReLU(0.1)
        y = jnp.where(y > 0, y, 0.1 * y)
    o_ref[...] = y.astype(o_ref.dtype)


def _maxpool_kernel(top_ref, mid_ref, bot_ref, o_ref, *, c):
    """3x3 / stride-2 / pad-1 max pool, one output row per grid step.

    Inputs are three (1, 1, W2p, 2C) row blocks (padded rows 2i, 2i+1, 2i+2,
    selected by the grid index_maps -> the H subsample costs no extra HBM).
    Columns are pair-packed into 2C lanes (free wrapper reshape): lanes [0:C]
    hold even padded columns, [C:2C] odd ones, so the stride-2 W subsample is a
    pair of static lane slices instead of a strided gather or a 9x HBM stack."""
    rm = jnp.maximum(jnp.maximum(top_ref[0, 0], mid_ref[0, 0]), bot_ref[0, 0])
    even = rm[:, :c]          # padded col 2g
    odd = rm[:, c:]           # padded col 2g + 1
    wo = o_ref.shape[2]
    # output col jo = max(orig cols 2jo-1, 2jo, 2jo+1)
    #              = max(odd[jo], even[jo+1], odd[jo+1]) in padded pair groups.
    out = jnp.maximum(jnp.maximum(odd[:wo, :], even[1:wo + 1, :]),
                      odd[1:wo + 1, :])
    o_ref[0, 0] = out.astype(o_ref.dtype)


def _head_kernel(x_ref, w_ref, b_ref, o_ref):
    """Global average pool + Linear + log_softmax, fused (f32 math)."""
    x = x_ref[...].astype(jnp.float32)                  # (B, H*W, C)
    xm = jnp.mean(x, axis=1)                            # (B, C)
    y = jnp.dot(xm, w_ref[...], preferred_element_type=jnp.float32) + b_ref[...]
    m = jnp.max(y, axis=-1, keepdims=True)
    z = y - m
    lse = jnp.log(jnp.sum(jnp.exp(z), axis=-1, keepdims=True))
    o_ref[...] = (z - lse).astype(o_ref.dtype)


# ----------------------------------------------------------------------------
# Pallas wrappers
# ----------------------------------------------------------------------------

def matmul_bias_act(x2d, w, shift, act, out_dtype=jnp.bfloat16):
    """x2d: (M, K), w: (Kp, N) bf16 (Kp >= K, zero-padded at init), shift: (N,)."""
    M, K = x2d.shape
    Kp, N = w.shape
    x2d = x2d.astype(jnp.bfloat16)
    if Kp != K:                                # lane-align the contraction dim
        x2d = jnp.pad(x2d, ((0, 0), (0, Kp - K)))
    # Fixed tiles + padded M (never "whole M in one block"): keeps VMEM bounded
    # (v7x: 64 MiB/TC) and the grid pipelined / megacore-splittable.
    tm = 256 if M >= 256 else _round_up(M, 8)
    Mp = _round_up(M, tm)
    if Mp != M:
        x2d = jnp.pad(x2d, ((0, Mp - M), (0, 0)))
    if N % 256 == 0:
        tn = 256
    elif N % 128 == 0:
        tn = 128
    else:
        tn = N
    grid = (Mp // tm, N // tn)
    out = pl.pallas_call(
        functools.partial(_matmul_bias_act_kernel, act=act),
        out_shape=jax.ShapeDtypeStruct((Mp, N), out_dtype),
        grid=grid,
        in_specs=[
            pl.BlockSpec((tm, Kp), lambda i, j: (i, 0)),
            pl.BlockSpec((Kp, tn), lambda i, j: (0, j)),
            pl.BlockSpec((1, tn), lambda i, j: (0, j)),
        ],
        out_specs=pl.BlockSpec((tm, tn), lambda i, j: (i, j)),
        compiler_params=pltpu.CompilerParams(
            dimension_semantics=("parallel", "parallel"),
            vmem_limit_bytes=_VMEM_LIMIT),
    )(x2d, w, shift.reshape(1, N))
    return out[:M] if Mp != M else out


def maxpool_3x3_s2_p1(y):
    """MaxPool2d(3, 2, 1) on NHWC, single-pass Pallas kernel.

    No 9x window stacking in HBM: the only wrapper-side copy is a 1-row /
    2-column edge pad (duplicated edge taps are max-neutral, equivalent to the
    -inf padding of PyTorch's maxpool)."""
    N, H, W, C = y.shape
    assert H % 2 == 0 and W % 2 == 0
    Ho, Wo = H // 2, W // 2
    yp = jnp.pad(y, ((0, 0), (1, 0), (2, 0), (0, 0)), mode="edge")
    w2p = (W + 2) // 2
    ypr = yp.reshape(N, H + 1, w2p, 2 * C)          # pair adjacent cols into lanes
    kernel = functools.partial(_maxpool_kernel, c=C)
    return pl.pallas_call(
        kernel,
        out_shape=jax.ShapeDtypeStruct((N, Ho, Wo, C), y.dtype),
        grid=(N, Ho),
        in_specs=[
            pl.BlockSpec((1, 1, w2p, 2 * C), lambda n, i: (n, 2 * i, 0, 0)),
            pl.BlockSpec((1, 1, w2p, 2 * C), lambda n, i: (n, 2 * i + 1, 0, 0)),
            pl.BlockSpec((1, 1, w2p, 2 * C), lambda n, i: (n, 2 * i + 2, 0, 0)),
        ],
        out_specs=pl.BlockSpec((1, 1, Wo, C), lambda n, i: (n, i, 0, 0)),
        compiler_params=pltpu.CompilerParams(
            dimension_semantics=("parallel", "parallel"),
            vmem_limit_bytes=_VMEM_LIMIT),
    )(ypr, ypr, ypr)


def avgpool_linear_logsoftmax(x_nhwc, w, b):
    """avg_pool2d(x, W) -> view(-1, C) -> Linear -> log_softmax, fused.

    The class dim is padded to a 128-lane multiple (zero weight cols, -1e30
    bias) so the matmul N dim and the output store are lane-dense; padded
    columns contribute exp() == 0 to the softmax and are sliced off after."""
    N, H, W, C = x_nhwc.shape
    nc = w.shape[1]
    ncp = _round_up(nc, 128)
    w_pad = jnp.pad(w, ((0, 0), (0, ncp - nc)))
    b_pad = jnp.pad(b, (0, ncp - nc), constant_values=-1e30)
    x3 = x_nhwc.reshape(N, H * W, C)
    out = pl.pallas_call(
        _head_kernel,
        out_shape=jax.ShapeDtypeStruct((N, ncp), jnp.float32),
        grid=(1,),   # head operands are tiny; tile the batch here if it grows
        in_specs=[
            pl.BlockSpec((N, H * W, C), lambda i: (0, 0, 0)),
            pl.BlockSpec((C, ncp), lambda i: (0, 0)),
            pl.BlockSpec((1, ncp), lambda i: (0, 0)),
        ],
        out_specs=pl.BlockSpec((N, ncp), lambda i: (0, 0)),
        compiler_params=pltpu.CompilerParams(vmem_limit_bytes=_VMEM_LIMIT),
    )(x3, w_pad, b_pad.reshape(1, ncp))
    return out[:, :nc]


# ----------------------------------------------------------------------------
# Plain-JAX glue (layout only; no hot-path compute)
# ----------------------------------------------------------------------------

def im2col(x_nhwc, ksize, stride, padding):
    """Extract conv patches -> (N*Ho*Wo, ksize*ksize*C).
    TODO(synk): at real batch/resolution fuse the patch extraction into the
    stem matmul's DMA pattern instead of materializing the cols array in HBM."""
    N, H, W, C = x_nhwc.shape
    Ho = (H + 2 * padding - ksize) // stride + 1
    Wo = (W + 2 * padding - ksize) // stride + 1
    xp = jnp.pad(x_nhwc, ((0, 0), (padding, padding), (padding, padding), (0, 0)))
    cols = []
    for di in range(ksize):
        for dj in range(ksize):
            cols.append(jax.lax.slice(
                xp, (0, di, dj, 0),
                (N, di + stride * (Ho - 1) + 1, dj + stride * (Wo - 1) + 1, C),
                (1, stride, stride, 1)))
    p = jnp.stack(cols, axis=3)                        # (N, Ho, Wo, k*k, C)
    return p.reshape(N * Ho * Wo, ksize * ksize * C), Ho, Wo


def _fold_bn(bias, gamma, beta, mean, var, eps=1e-5):
    s = gamma / jnp.sqrt(var + eps)
    return s, (bias - mean) * s + beta


def init_params(key, channels, num_class):
    keys = iter(jax.random.split(key, 64))

    def conv_bn(cin_k, cout, pad_k=False):
        w = jax.random.normal(next(keys), (cin_k, cout), jnp.float32) / jnp.sqrt(cin_k)
        b = 0.1 * jax.random.normal(next(keys), (cout,), jnp.float32)
        gamma = 1.0 + 0.1 * jax.random.normal(next(keys), (cout,), jnp.float32)
        beta = 0.1 * jax.random.normal(next(keys), (cout,), jnp.float32)
        mean = 0.1 * jax.random.normal(next(keys), (cout,), jnp.float32)
        var = jax.random.uniform(next(keys), (cout,), jnp.float32, 0.5, 1.5)
        scale, shift = _fold_bn(b, gamma, beta, mean, var)
        wf = w * scale[None, :]                        # fold BN scale into weight
        if pad_k:                                      # lane-align contraction dim
            kp = _round_up(cin_k, 128)
            if kp != cin_k:
                wf = jnp.pad(wf, ((0, kp - cin_k), (0, 0)))
        return {"w": wf.astype(jnp.bfloat16), "shift": shift}

    params = {
        "conv1": conv_bn(7 * 7 * channels, 64, pad_k=True),   # stem (K 196 -> 256)
        "block1_1": conv_bn(64, 256),             # conv4/bn4 of the slide blocks
        "block2_1": conv_bn(256, 512),
        "block3_1": conv_bn(512, 1024),
        "block4_1": conv_bn(1024, 2048),
    }
    params["linear_w"] = (jax.random.normal(next(keys), (2048, num_class), jnp.float32)
                          / jnp.sqrt(2048.0))
    params["linear_b"] = 0.1 * jax.random.normal(next(keys), (num_class,), jnp.float32)
    return params


def bottleneck_slide(x, p, stride):
    """Effective forward of a 'slide' Bottleneck: relu(bn4(conv4_1x1_strideS(x)))."""
    if stride > 1:
        # stride-2 1x1 conv == spatial subsample then pointwise matmul.
        # (bf16 XLA slice over tiny deep-layer tensors; could be folded into the
        # matmul input BlockSpec at larger scale.)
        x = x[:, ::stride, ::stride, :]
    n, h, w, c = x.shape
    cout = p["w"].shape[1]
    y = matmul_bias_act(x.reshape(n * h * w, c), p["w"], p["shift"], act="relu")
    return y.reshape(n, h, w, cout)


def resnet50_forward(x_nchw, params):
    x = jnp.transpose(x_nchw, (0, 2, 3, 1)).astype(jnp.bfloat16)   # NCHW -> NHWC
    n = x.shape[0]
    # stem: 7x7 s2 p3 conv + BN + LeakyReLU(0.1), then maxpool 3x3 s2 p1
    cols, ho, wo = im2col(x, 7, 2, 3)
    p = params["conv1"]
    y = matmul_bias_act(cols, p["w"], p["shift"], act="leaky")
    y = y.reshape(n, ho, wo, 64)
    y = maxpool_3x3_s2_p1(y)
    # Only the 'slide' conv4/bn4/relu path reaches the reference output; the
    # remaining Bottlenecks reduce to relu(x) == identity on already-relu'd
    # input and are elided entirely (zero HBM traffic for them).
    y = bottleneck_slide(y, params["block1_1"], stride=1)
    y = bottleneck_slide(y, params["block2_1"], stride=2)
    y = bottleneck_slide(y, params["block3_1"], stride=2)
    y = bottleneck_slide(y, params["block4_1"], stride=2)
    # head: avg_pool2d -> view(-1, 2048) -> Linear -> log_softmax
    return avgpool_linear_logsoftmax(y, params["linear_w"], params["linear_b"])


if __name__ == "__main__":
    key = jax.random.PRNGKey(0)
    kx, kp = jax.random.split(key)
    channels, num_class = 4, 10
    # spatial 64 -> 32 (stem) -> 16 (maxpool) -> 16 -> 8 -> 4 -> 2 -> global pool
    x = jax.random.normal(kx, (2, channels, 64, 64), jnp.float32)
    params = init_params(kp, channels, num_class)
    out = jax.jit(resnet50_forward)(x, params)
    jax.block_until_ready(out)
    assert out.shape == (2, num_class)
    assert bool(jnp.all(jnp.isfinite(out)))
    print("KERNEL_OK")
</pallas_src>

<mosaic_0001>
module attributes {stable_mosaic.version = 11 : i64} {
  func.func @_matmul_bias_act_kernel(%arg0: i32, %arg1: i32, %arg2: memref<256x256xbf16, #tpu.memory_space<vmem>>, %arg3: memref<256x64xbf16, #tpu.memory_space<vmem>>, %arg4: memref<1x64xf32, #tpu.memory_space<vmem>>, %arg5: memref<256x64xbf16, #tpu.memory_space<vmem>>) attributes {dimension_semantics = [#tpu.dimension_semantics<parallel>, #tpu.dimension_semantics<parallel>], iteration_bounds = array<i64: 8, 1>, scalar_prefetch = 0 : i64, scratch_operands = 0 : i64, tpu.core_type = #tpu.core_type<tc>, window_params = [{transform_indices = @transform_0, window_bounds = array<i64: 256, 256>}, {transform_indices = @transform_1, window_bounds = array<i64: 256, 64>}, {transform_indices = @transform_2, window_bounds = array<i64: 1, 64>}, {transform_indices = @transform_3, window_bounds = array<i64: 256, 64>}]} {
    %c0 = arith.constant 0 : index
    %c0_0 = arith.constant 0 : index
    %0 = vector.load %arg2[%c0, %c0_0] : memref<256x256xbf16, #tpu.memory_space<vmem>>, vector<256x256xbf16>
    %c0_1 = arith.constant 0 : index
    %c0_2 = arith.constant 0 : index
    %1 = vector.load %arg3[%c0_1, %c0_2] : memref<256x64xbf16, #tpu.memory_space<vmem>>, vector<256x64xbf16>
    %cst = arith.constant dense<0.000000e+00> : vector<256x64xf32>
    %2 = tpu.matmul %0, %1, %cst {dimension_numbers = #tpu.dot_dimension_numbers<[1], [0], [0], [1], [0, 0, 1, 1], [], []>} : vector<256x256xbf16>, vector<256x64xbf16>, vector<256x64xf32> -> vector<256x64xf32>
    %c0_3 = arith.constant 0 : index
    %c0_4 = arith.constant 0 : index
    %3 = vector.load %arg4[%c0_3, %c0_4] : memref<1x64xf32, #tpu.memory_space<vmem>>, vector<1x64xf32>
    %4 = vector.broadcast %3 : vector<1x64xf32> to vector<256x64xf32>
    %5 = arith.addf %2, %4 : vector<256x64xf32>
    %cst_5 = arith.constant 0.000000e+00 : f32
    %6 = vector.broadcast %cst_5 : f32 to vector<256x64xf32>
    %7 = arith.cmpf ogt, %5, %6 : vector<256x64xf32>
    %cst_6 = arith.constant 1.000000e-01 : f32
    %8 = vector.broadcast %cst_6 : f32 to vector<256x64xf32>
    %9 = arith.mulf %8, %5 : vector<256x64xf32>
    %10 = arith.select %7, %5, %9 : vector<256x64xi1>, vector<256x64xf32>
    %11 = arith.truncf %10 : vector<256x64xf32> to vector<256x64xbf16>
    %c0_7 = arith.constant 0 : index
    %c0_8 = arith.constant 0 : index
    %12 = vector.load %arg5[%c0_7, %c0_8] : memref<256x64xbf16, #tpu.memory_space<vmem>>, vector<256x64xbf16>
    tpu.vector_store %arg5[%c0_7, %c0_8], %11 {strides = array<i32>} : memref<256x64xbf16, #tpu.memory_space<vmem>>, vector<256x64xbf16>,
    return
  }
  func.func @transform_0(%arg0: i32, %arg1: i32) -> (i32, i32) {
    %c0_i32 = arith.constant 0 : i32
    %c0_i32_0 = arith.constant 0 : i32
    return %arg0, %c0_i32 : i32, i32
  }
  func.func @transform_1(%arg0: i32, %arg1: i32) -> (i32, i32) {
    %c0_i32 = arith.constant 0 : i32
    %c0_i32_0 = arith.constant 0 : i32
    return %c0_i32, %arg1 : i32, i32
  }
  func.func @transform_2(%arg0: i32, %arg1: i32) -> (i32, i32) {
    %c0_i32 = arith.constant 0 : i32
    %c0_i32_0 = arith.constant 0 : i32
    return %c0_i32, %arg1 : i32, i32
  }
  func.func @transform_3(%arg0: i32, %arg1: i32) -> (i32, i32) {
    %c0_i32 = arith.constant 0 : i32
    return %arg0, %arg1 : i32, i32
  }
}

module attributes {stable_mosaic.version = 11 : i64} {
  func.func @_maxpool_kernel(%arg0: i32, %arg1: i32, %arg2: memref<1x1x17x128xbf16, #tpu.memory_space<vmem>>, %arg3: memref<1x1x17x128xbf16, #tpu.memory_space<vmem>>, %arg4: memref<1x1x17x128xbf16, #tpu.memory_space<vmem>>, %arg5: memref<1x1x16x64xbf16, #tpu.memory_space<vmem>>) attributes {dimension_semantics = [#tpu.dimension_semantics<parallel>, #tpu.dimension_semantics<parallel>], iteration_bounds = array<i64: 2, 16>, scalar_prefetch = 0 : i64, scratch_operands = 0 : i64, tpu.core_type = #tpu.core_type<tc>, window_params = [{transform_indices = @transform_0, window_bounds = array<i64: 1, 1, 17, 128>}, {transform_indices = @transform_1, window_bounds = array<i64: 1, 1, 17, 128>}, {transform_indices = @transform_2, window_bounds = array<i64: 1, 1, 17, 128>}, {transform_indices = @transform_3, window_bounds = array<i64: 1, 1, 16, 64>}]} {
    %c0 = arith.constant 0 : index
    %c0_0 = arith.constant 0 : index
    %c0_1 = arith.constant 0 : index
    %c0_2 = arith.constant 0 : index
    %0 = vector.load %arg2[%c0, %c0_0, %c0_1, %c0_2] : memref<1x1x17x128xbf16, #tpu.memory_space<vmem>>, vector<1x1x17x128xbf16>
    %1 = vector.shape_cast %0 : vector<1x1x17x128xbf16> to vector<17x128xbf16>
    %c0_3 = arith.constant 0 : index
    %c0_4 = arith.constant 0 : index
    %c0_5 = arith.constant 0 : index
    %c0_6 = arith.constant 0 : index
    %2 = vector.load %arg3[%c0_3, %c0_4, %c0_5, %c0_6] : memref<1x1x17x128xbf16, #tpu.memory_space<vmem>>, vector<1x1x17x128xbf16>
    %3 = vector.shape_cast %2 : vector<1x1x17x128xbf16> to vector<17x128xbf16>
    %4 = arith.maximumf %1, %3 : vector<17x128xbf16>
    %c0_7 = arith.constant 0 : index
    %c0_8 = arith.constant 0 : index
    %c0_9 = arith.constant 0 : index
    %c0_10 = arith.constant 0 : index
    %5 = vector.load %arg4[%c0_7, %c0_8, %c0_9, %c0_10] : memref<1x1x17x128xbf16, #tpu.memory_space<vmem>>, vector<1x1x17x128xbf16>
    %6 = vector.shape_cast %5 : vector<1x1x17x128xbf16> to vector<17x128xbf16>
    %7 = arith.maximumf %4, %6 : vector<17x128xbf16>
    %8 = vector.extract_strided_slice %7 {offsets = [0, 0], sizes = [17, 64], strides = [1, 1]} : vector<17x128xbf16> to vector<17x64xbf16>
    %9 = vector.extract_strided_slice %7 {offsets = [0, 64], sizes = [17, 64], strides = [1, 1]} : vector<17x128xbf16> to vector<17x64xbf16>
    %10 = vector.extract_strided_slice %9 {offsets = [0, 0], sizes = [16, 64], strides = [1, 1]} : vector<17x64xbf16> to vector<16x64xbf16>
    %11 = vector.extract_strided_slice %8 {offsets = [1, 0], sizes = [16, 64], strides = [1, 1]} : vector<17x64xbf16> to vector<16x64xbf16>
    %12 = arith.maximumf %10, %11 : vector<16x64xbf16>
    %13 = vector.extract_strided_slice %9 {offsets = [1, 0], sizes = [16, 64], strides = [1, 1]} : vector<17x64xbf16> to vector<16x64xbf16>
    %14 = arith.maximumf %12, %13 : vector<16x64xbf16>
    %c0_11 = arith.constant 0 : index
    %c0_12 = arith.constant 0 : index
    %c0_13 = arith.constant 0 : index
    %c0_14 = arith.constant 0 : index
    %15 = vector.load %arg5[%c0_11, %c0_12, %c0_13, %c0_14] : memref<1x1x16x64xbf16, #tpu.memory_space<vmem>>, vector<1x1x16x64xbf16>
    %16 = vector.shape_cast %15 : vector<1x1x16x64xbf16> to vector<16x64xbf16>
    %17 = vector.shape_cast %14 : vector<16x64xbf16> to vector<1x1x16x64xbf16>
    tpu.vector_store %arg5[%c0_11, %c0_12, %c0_13, %c0_14], %17 {strides = array<i32>} : memref<1x1x16x64xbf16, #tpu.memory_space<vmem>>, vector<1x1x16x64xbf16>,
    return
  }
  func.func @transform_0(%arg0: i32, %arg1: i32) -> (i32, i32, i32, i32) {
    %c2_i32 = arith.constant 2 : i32
    %0 = arith.muli %c2_i32, %arg1 : i32
    %c0_i32 = arith.constant 0 : i32
    %c0_i32_0 = arith.constant 0 : i32
    %c0_i32_1 = arith.constant 0 : i32
    return %arg0, %0, %c0_i32, %c0_i32_0 : i32, i32, i32, i32
  }
  func.func @transform_1(%arg0: i32, %arg1: i32) -> (i32, i32, i32, i32) {
    %c2_i32 = arith.constant 2 : i32
    %0 = arith.muli %c2_i32, %arg1 : i32
    %c1_i32 = arith.constant 1 : i32
    %1 = arith.addi %0, %c1_i32 : i32
    %c0_i32 = arith.constant 0 : i32
    %c0_i32_0 = arith.constant 0 : i32
    %c0_i32_1 = arith.constant 0 : i32
    return %arg0, %1, %c0_i32, %c0_i32_0 : i32, i32, i32, i32
  }
  func.func @transform_2(%arg0: i32, %arg1: i32) -> (i32, i32, i32, i32) {
    %c2_i32 = arith.constant 2 : i32
    %0 = arith.muli %c2_i32, %arg1 : i32
    %c2_i32_0 = arith.constant 2 : i32
    %1 = arith.addi %0, %c2_i32_0 : i32
    %c0_i32 = arith.constant 0 : i32
    %c0_i32_1 = arith.constant 0 : i32
    %c0_i32_2 = arith.constant 0 : i32
    return %arg0, %1, %c0_i32, %c0_i32_1 : i32, i32, i32, i32
  }
  func.func @transform_3(%arg0: i32, %arg1: i32) -> (i32, i32, i32, i32) {
    %c0_i32 = arith.constant 0 : i32
    %c0_i32_0 = arith.constant 0 : i32
    %c0_i32_1 = arith.constant 0 : i32
    return %arg0, %arg1, %c0_i32, %c0_i32_0 : i32, i32, i32, i32
  }
}

module attributes {stable_mosaic.version = 11 : i64} {
  func.func @_matmul_bias_act_kernel(%arg0: i32, %arg1: i32, %arg2: memref<256x64xbf16, #tpu.memory_space<vmem>>, %arg3: memref<64x256xbf16, #tpu.memory_space<vmem>>, %arg4: memref<1x256xf32, #tpu.memory_space<vmem>>, %arg5: memref<256x256xbf16, #tpu.memory_space<vmem>>) attributes {dimension_semantics = [#tpu.dimension_semantics<parallel>, #tpu.dimension_semantics<parallel>], iteration_bounds = array<i64: 2, 1>, scalar_prefetch = 0 : i64, scratch_operands = 0 : i64, tpu.core_type = #tpu.core_type<tc>, window_params = [{transform_indices = @transform_0, window_bounds = array<i64: 256, 64>}, {transform_indices = @transform_1, window_bounds = array<i64: 64, 256>}, {transform_indices = @transform_2, window_bounds = array<i64: 1, 256>}, {transform_indices = @transform_3, window_bounds = array<i64: 256, 256>}]} {
    %c0 = arith.constant 0 : index
    %c0_0 = arith.constant 0 : index
    %0 = vector.load %arg2[%c0, %c0_0] : memref<256x64xbf16, #tpu.memory_space<vmem>>, vector<256x64xbf16>
    %c0_1 = arith.constant 0 : index
    %c0_2 = arith.constant 0 : index
    %1 = vector.load %arg3[%c0_1, %c0_2] : memref<64x256xbf16, #tpu.memory_space<vmem>>, vector<64x256xbf16>
    %cst = arith.constant dense<0.000000e+00> : vector<256x256xf32>
    %2 = tpu.matmul %0, %1, %cst {dimension_numbers = #tpu.dot_dimension_numbers<[1], [0], [0], [1], [0, 0, 1, 1], [], []>} : vector<256x64xbf16>, vector<64x256xbf16>, vector<256x256xf32> -> vector<256x256xf32>
    %c0_3 = arith.constant 0 : index
    %c0_4 = arith.constant 0 : index
    %3 = vector.load %arg4[%c0_3, %c0_4] : memref<1x256xf32, #tpu.memory_space<vmem>>, vector<1x256xf32>
    %4 = vector.broadcast %3 : vector<1x256xf32> to vector<256x256xf32>
    %5 = arith.addf %2, %4 : vector<256x256xf32>
    %cst_5 = arith.constant 0.000000e+00 : f32
    %6 = vector.broadcast %cst_5 : f32 to vector<256x256xf32>
    %7 = arith.maximumf %5, %6 : vector<256x256xf32>
    %8 = arith.truncf %7 : vector<256x256xf32> to vector<256x256xbf16>
    %c0_6 = arith.constant 0 : index
    %c0_7 = arith.constant 0 : index
    %9 = vector.load %arg5[%c0_6, %c0_7] : memref<256x256xbf16, #tpu.memory_space<vmem>>, vector<256x256xbf16>
    tpu.vector_store %arg5[%c0_6, %c0_7], %8 {strides = array<i32>} : memref<256x256xbf16, #tpu.memory_space<vmem>>, vector<256x256xbf16>,
    return
  }
  func.func @transform_0(%arg0: i32, %arg1: i32) -> (i32, i32) {
    %c0_i32 = arith.constant 0 : i32
    %c0_i32_0 = arith.constant 0 : i32
    return %arg0, %c0_i32 : i32, i32
  }
  func.func @transform_1(%arg0: i32, %arg1: i32) -> (i32, i32) {
    %c0_i32 = arith.constant 0 : i32
    %c0_i32_0 = arith.constant 0 : i32
    return %c0_i32, %arg1 : i32, i32
  }
  func.func @transform_2(%arg0: i32, %arg1: i32) -> (i32, i32) {
    %c0_i32 = arith.constant 0 : i32
    %c0_i32_0 = arith.constant 0 : i32
    return %c0_i32, %arg1 : i32, i32
  }
  func.func @transform_3(%arg0: i32, %arg1: i32) -> (i32, i32) {
    %c0_i32 = arith.constant 0 : i32
    return %arg0, %arg1 : i32, i32
  }
}

module attributes {stable_mosaic.version = 11 : i64} {
  func.func @_matmul_bias_act_kernel(%arg0: i32, %arg1: i32, %arg2: memref<128x256xbf16, #tpu.memory_space<vmem>>, %arg3: memref<256x256xbf16, #tpu.memory_space<vmem>>, %arg4: memref<1x256xf32, #tpu.memory_space<vmem>>, %arg5: memref<128x256xbf16, #tpu.memory_space<vmem>>) attributes {dimension_semantics = [#tpu.dimension_semantics<parallel>, #tpu.dimension_semantics<parallel>], iteration_bounds = array<i64: 1, 2>, scalar_prefetch = 0 : i64, scratch_operands = 0 : i64, tpu.core_type = #tpu.core_type<tc>, window_params = [{transform_indices = @transform_0, window_bounds = array<i64: 128, 256>}, {transform_indices = @transform_1, window_bounds = array<i64: 256, 256>}, {transform_indices = @transform_2, window_bounds = array<i64: 1, 256>}, {transform_indices = @transform_3, window_bounds = array<i64: 128, 256>}]} {
    %c0 = arith.constant 0 : index
    %c0_0 = arith.constant 0 : index
    %0 = vector.load %arg2[%c0, %c0_0] : memref<128x256xbf16, #tpu.memory_space<vmem>>, vector<128x256xbf16>
    %c0_1 = arith.constant 0 : index
    %c0_2 = arith.constant 0 : index
    %1 = vector.load %arg3[%c0_1, %c0_2] : memref<256x256xbf16, #tpu.memory_space<vmem>>, vector<256x256xbf16>
    %cst = arith.constant dense<0.000000e+00> : vector<128x256xf32>
    %2 = tpu.matmul %0, %1, %cst {dimension_numbers = #tpu.dot_dimension_numbers<[1], [0], [0], [1], [0, 0, 1, 1], [], []>} : vector<128x256xbf16>, vector<256x256xbf16>, vector<128x256xf32> -> vector<128x256xf32>
    %c0_3 = arith.constant 0 : index
    %c0_4 = arith.constant 0 : index
    %3 = vector.load %arg4[%c0_3, %c0_4] : memref<1x256xf32, #tpu.memory_space<vmem>>, vector<1x256xf32>
    %4 = vector.broadcast %3 : vector<1x256xf32> to vector<128x256xf32>
    %5 = arith.addf %2, %4 : vector<128x256xf32>
    %cst_5 = arith.constant 0.000000e+00 : f32
    %6 = vector.broadcast %cst_5 : f32 to vector<128x256xf32>
    %7 = arith.maximumf %5, %6 : vector<128x256xf32>
    %8 = arith.truncf %7 : vector<128x256xf32> to vector<128x256xbf16>
    %c0_6 = arith.constant 0 : index
    %c0_7 = arith.constant 0 : index
    %9 = vector.load %arg5[%c0_6, %c0_7] : memref<128x256xbf16, #tpu.memory_space<vmem>>, vector<128x256xbf16>
    tpu.vector_store %arg5[%c0_6, %c0_7], %8 {strides = array<i32>} : memref<128x256xbf16, #tpu.memory_space<vmem>>, vector<128x256xbf16>,
    return
  }
  func.func @transform_0(%arg0: i32, %arg1: i32) -> (i32, i32) {
    %c0_i32 = arith.constant 0 : i32
    %c0_i32_0 = arith.constant 0 : i32
    return %arg0, %c0_i32 : i32, i32
  }
  func.func @transform_1(%arg0: i32, %arg1: i32) -> (i32, i32) {
    %c0_i32 = arith.constant 0 : i32
    %c0_i32_0 = arith.constant 0 : i32
    return %c0_i32, %arg1 : i32, i32
  }
  func.func @transform_2(%arg0: i32, %arg1: i32) -> (i32, i32) {
    %c0_i32 = arith.constant 0 : i32
    %c0_i32_0 = arith.constant 0 : i32
    return %c0_i32, %arg1 : i32, i32
  }
  func.func @transform_3(%arg0: i32, %arg1: i32) -> (i32, i32) {
    %c0_i32 = arith.constant 0 : i32
    return %arg0, %arg1 : i32, i32
  }
}

module attributes {stable_mosaic.version = 11 : i64} {
  func.func @_matmul_bias_act_kernel(%arg0: i32, %arg1: i32, %arg2: memref<32x512xbf16, #tpu.memory_space<vmem>>, %arg3: memref<512x256xbf16, #tpu.memory_space<vmem>>, %arg4: memref<1x256xf32, #tpu.memory_space<vmem>>, %arg5: memref<32x256xbf16, #tpu.memory_space<vmem>>) attributes {dimension_semantics = [#tpu.dimension_semantics<parallel>, #tpu.dimension_semantics<parallel>], iteration_bounds = array<i64: 1, 4>, scalar_prefetch = 0 : i64, scratch_operands = 0 : i64, tpu.core_type = #tpu.core_type<tc>, window_params = [{transform_indices = @transform_0, window_bounds = array<i64: 32, 512>}, {transform_indices = @transform_1, window_bounds = array<i64: 512, 256>}, {transform_indices = @transform_2, window_bounds = array<i64: 1, 256>}, {transform_indices = @transform_3, window_bounds = array<i64: 32, 256>}]} {
    %c0 = arith.constant 0 : index
    %c0_0 = arith.constant 0 : index
    %0 = vector.load %arg2[%c0, %c0_0] : memref<32x512xbf16, #tpu.memory_space<vmem>>, vector<32x512xbf16>
    %c0_1 = arith.constant 0 : index
    %c0_2 = arith.constant 0 : index
    %1 = vector.load %arg3[%c0_1, %c0_2] : memref<512x256xbf16, #tpu.memory_space<vmem>>, vector<512x256xbf16>
    %cst = arith.constant dense<0.000000e+00> : vector<32x256xf32>
    %2 = tpu.matmul %0, %1, %cst {dimension_numbers = #tpu.dot_dimension_numbers<[1], [0], [0], [1], [0, 0, 1, 1], [], []>} : vector<32x512xbf16>, vector<512x256xbf16>, vector<32x256xf32> -> vector<32x256xf32>
    %c0_3 = arith.constant 0 : index
    %c0_4 = arith.constant 0 : index
    %3 = vector.load %arg4[%c0_3, %c0_4] : memref<1x256xf32, #tpu.memory_space<vmem>>, vector<1x256xf32>
    %4 = vector.broadcast %3 : vector<1x256xf32> to vector<32x256xf32>
    %5 = arith.addf %2, %4 : vector<32x256xf32>
    %cst_5 = arith.constant 0.000000e+00 : f32
    %6 = vector.broadcast %cst_5 : f32 to vector<32x256xf32>
    %7 = arith.maximumf %5, %6 : vector<32x256xf32>
    %8 = arith.truncf %7 : vector<32x256xf32> to vector<32x256xbf16>
    %c0_6 = arith.constant 0 : index
    %c0_7 = arith.constant 0 : index
    %9 = vector.load %arg5[%c0_6, %c0_7] : memref<32x256xbf16, #tpu.memory_space<vmem>>, vector<32x256xbf16>
    tpu.vector_store %arg5[%c0_6, %c0_7], %8 {strides = array<i32>} : memref<32x256xbf16, #tpu.memory_space<vmem>>, vector<32x256xbf16>,
    return
  }
  func.func @transform_0(%arg0: i32, %arg1: i32) -> (i32, i32) {
    %c0_i32 = arith.constant 0 : i32
    %c0_i32_0 = arith.constant 0 : i32
    return %arg0, %c0_i32 : i32, i32
  }
  func.func @transform_1(%arg0: i32, %arg1: i32) -> (i32, i32) {
    %c0_i32 = arith.constant 0 : i32
    %c0_i32_0 = arith.constant 0 : i32
    return %c0_i32, %arg1 : i32, i32
  }
  func.func @transform_2(%arg0: i32, %arg1: i32) -> (i32, i32) {
    %c0_i32 = arith.constant 0 : i32
    %c0_i32_0 = arith.constant 0 : i32
    return %c0_i32, %arg1 : i32, i32
  }
  func.func @transform_3(%arg0: i32, %arg1: i32) -> (i32, i32) {
    %c0_i32 = arith.constant 0 : i32
    return %arg0, %arg1 : i32, i32
  }
}

module attributes {stable_mosaic.version = 11 : i64} {
  func.func @_matmul_bias_act_kernel(%arg0: i32, %arg1: i32, %arg2: memref<8x1024xbf16, #tpu.memory_space<vmem>>, %arg3: memref<1024x256xbf16, #tpu.memory_space<vmem>>, %arg4: memref<1x256xf32, #tpu.memory_space<vmem>>, %arg5: memref<8x256xbf16, #tpu.memory_space<vmem>>) attributes {dimension_semantics = [#tpu.dimension_semantics<parallel>, #tpu.dimension_semantics<parallel>], iteration_bounds = array<i64: 1, 8>, scalar_prefetch = 0 : i64, scratch_operands = 0 : i64, tpu.core_type = #tpu.core_type<tc>, window_params = [{transform_indices = @transform_0, window_bounds = array<i64: 8, 1024>}, {transform_indices = @transform_1, window_bounds = array<i64: 1024, 256>}, {transform_indices = @transform_2, window_bounds = array<i64: 1, 256>}, {transform_indices = @transform_3, window_bounds = array<i64: 8, 256>}]} {
    %c0 = arith.constant 0 : index
    %c0_0 = arith.constant 0 : index
    %0 = vector.load %arg2[%c0, %c0_0] : memref<8x1024xbf16, #tpu.memory_space<vmem>>, vector<8x1024xbf16>
    %c0_1 = arith.constant 0 : index
    %c0_2 = arith.constant 0 : index
    %1 = vector.load %arg3[%c0_1, %c0_2] : memref<1024x256xbf16, #tpu.memory_space<vmem>>, vector<1024x256xbf16>
    %cst = arith.constant dense<0.000000e+00> : vector<8x256xf32>
    %2 = tpu.matmul %0, %1, %cst {dimension_numbers = #tpu.dot_dimension_numbers<[1], [0], [0], [1], [0, 0, 1, 1], [], []>} : vector<8x1024xbf16>, vector<1024x256xbf16>, vector<8x256xf32> -> vector<8x256xf32>
    %c0_3 = arith.constant 0 : index
    %c0_4 = arith.constant 0 : index
    %3 = vector.load %arg4[%c0_3, %c0_4] : memref<1x256xf32, #tpu.memory_space<vmem>>, vector<1x256xf32>
    %4 = vector.broadcast %3 : vector<1x256xf32> to vector<8x256xf32>
    %5 = arith.addf %2, %4 : vector<8x256xf32>
    %cst_5 = arith.constant 0.000000e+00 : f32
    %6 = vector.broadcast %cst_5 : f32 to vector<8x256xf32>
    %7 = arith.maximumf %5, %6 : vector<8x256xf32>
    %8 = arith.truncf %7 : vector<8x256xf32> to vector<8x256xbf16>
    %c0_6 = arith.constant 0 : index
    %c0_7 = arith.constant 0 : index
    %9 = vector.load %arg5[%c0_6, %c0_7] : memref<8x256xbf16, #tpu.memory_space<vmem>>, vector<8x256xbf16>
    tpu.vector_store %arg5[%c0_6, %c0_7], %8 {strides = array<i32>} : memref<8x256xbf16, #tpu.memory_space<vmem>>, vector<8x256xbf16>,
    return
  }
  func.func @transform_0(%arg0: i32, %arg1: i32) -> (i32, i32) {
    %c0_i32 = arith.constant 0 : i32
    %c0_i32_0 = arith.constant 0 : i32
    return %arg0, %c0_i32 : i32, i32
  }
  func.func @transform_1(%arg0: i32, %arg1: i32) -> (i32, i32) {
    %c0_i32 = arith.constant 0 : i32
    %c0_i32_0 = arith.constant 0 : i32
    return %c0_i32, %arg1 : i32, i32
  }
  func.func @transform_2(%arg0: i32, %arg1: i32) -> (i32, i32) {
    %c0_i32 = arith.constant 0 : i32
    %c0_i32_0 = arith.constant 0 : i32
    return %c0_i32, %arg1 : i32, i32
  }
  func.func @transform_3(%arg0: i32, %arg1: i32) -> (i32, i32) {
    %c0_i32 = arith.constant 0 : i32
    return %arg0, %arg1 : i32, i32
  }
}

module attributes {stable_mosaic.version = 11 : i64} {
  func.func @_head_kernel(%arg0: i32, %arg1: memref<2x4x2048xbf16, #tpu.memory_space<vmem>>, %arg2: memref<2048x128xf32, #tpu.memory_space<vmem>>, %arg3: memref<1x128xf32, #tpu.memory_space<vmem>>, %arg4: memref<2x128xf32, #tpu.memory_space<vmem>>) attributes {dimension_semantics = [#tpu.dimension_semantics<arbitrary>], iteration_bounds = array<i64: 1>, scalar_prefetch = 0 : i64, scratch_operands = 0 : i64, tpu.core_type = #tpu.core_type<tc>, window_params = [{pipeline_mode = #tpu.pipeline_mode<synchronous>, transform_indices = @transform_0, window_bounds = array<i64: 2, 4, 2048>}, {pipeline_mode = #tpu.pipeline_mode<synchronous>, transform_indices = @transform_1, window_bounds = array<i64: 2048, 128>}, {pipeline_mode = #tpu.pipeline_mode<synchronous>, transform_indices = @transform_2, window_bounds = array<i64: 1, 128>}, {pipeline_mode = #tpu.pipeline_mode<synchronous>, transform_indices = @transform_3, window_bounds = array<i64: 2, 128>}]} {
    %c0 = arith.constant 0 : index
    %c0_0 = arith.constant 0 : index
    %c0_1 = arith.constant 0 : index
    %0 = vector.load %arg1[%c0, %c0_0, %c0_1] : memref<2x4x2048xbf16, #tpu.memory_space<vmem>>, vector<2x4x2048xbf16>
    %1 = arith.extf %0 : vector<2x4x2048xbf16> to vector<2x4x2048xf32>
    %cst = arith.constant dense<0.000000e+00> : vector<2x2048xf32>
    %2 = vector.multi_reduction <add>, %1, %cst [1] : vector<2x4x2048xf32> to vector<2x2048xf32>
    %cst_2 = arith.constant 4.000000e+00 : f32
    %3 = vector.broadcast %cst_2 : f32 to vector<2x2048xf32>
    %4 = arith.divf %2, %3 : vector<2x2048xf32>
    %c0_3 = arith.constant 0 : index
    %c0_4 = arith.constant 0 : index
    %5 = vector.load %arg2[%c0_3, %c0_4] : memref<2048x128xf32, #tpu.memory_space<vmem>>, vector<2048x128xf32>
    %cst_5 = arith.constant dense<0.000000e+00> : vector<2x128xf32>
    %6 = tpu.matmul %4, %5, %cst_5 {dimension_numbers = #tpu.dot_dimension_numbers<[1], [0], [0], [1], [0, 0, 1, 1], [], []>} : vector<2x2048xf32>, vector<2048x128xf32>, vector<2x128xf32> -> vector<2x128xf32>
    %c0_6 = arith.constant 0 : index
    %c0_7 = arith.constant 0 : index
    %7 = vector.load %arg3[%c0_6, %c0_7] : memref<1x128xf32, #tpu.memory_space<vmem>>, vector<1x128xf32>
    %8 = vector.broadcast %7 : vector<1x128xf32> to vector<2x128xf32>
    %9 = arith.addf %6, %8 : vector<2x128xf32>
    %cst_8 = arith.constant dense<0xFF800000> : vector<2xf32>
    %10 = vector.multi_reduction <maximumf>, %9, %cst_8 [1] : vector<2x128xf32> to vector<2xf32>
    %11 = vector.shape_cast %10 : vector<2xf32> to vector<2x1xf32>
    %12 = vector.broadcast %11 : vector<2x1xf32> to vector<2x128xf32>
    %13 = arith.subf %9, %12 : vector<2x128xf32>
    %14 = math.exp %13 : vector<2x128xf32>
    %cst_9 = arith.constant dense<0.000000e+00> : vector<2xf32>
    %15 = vector.multi_reduction <add>, %14, %cst_9 [1] : vector<2x128xf32> to vector<2xf32>
    %16 = vector.shape_cast %15 : vector<2xf32> to vector<2x1xf32>
    %17 = math.log %16 : vector<2x1xf32>
    %18 = vector.broadcast %17 : vector<2x1xf32> to vector<2x128xf32>
    %19 = arith.subf %13, %18 : vector<2x128xf32>
    %c0_10 = arith.constant 0 : index
    %c0_11 = arith.constant 0 : index
    %20 = vector.load %arg4[%c0_10, %c0_11] : memref<2x128xf32, #tpu.memory_space<vmem>>, vector<2x128xf32>
    tpu.vector_store %arg4[%c0_10, %c0_11], %19 {strides = array<i32>} : memref<2x128xf32, #tpu.memory_space<vmem>>, vector<2x128xf32>,
    return
  }
  func.func @transform_0(%arg0: i32) -> (i32, i32, i32) {
    %c0_i32 = arith.constant 0 : i32
    %c0_i32_0 = arith.constant 0 : i32
    %c0_i32_1 = arith.constant 0 : i32
    %c0_i32_2 = arith.constant 0 : i32
    return %c0_i32, %c0_i32_0, %c0_i32_1 : i32, i32, i32
  }
  func.func @transform_1(%arg0: i32) -> (i32, i32) {
    %c0_i32 = arith.constant 0 : i32
    %c0_i32_0 = arith.constant 0 : i32
    %c0_i32_1 = arith.constant 0 : i32
    return %c0_i32, %c0_i32_0 : i32, i32
  }
  func.func @transform_2(%arg0: i32) -> (i32, i32) {
    %c0_i32 = arith.constant 0 : i32
    %c0_i32_0 = arith.constant 0 : i32
    %c0_i32_1 = arith.constant 0 : i32
    return %c0_i32, %c0_i32_0 : i32, i32
  }
  func.func @transform_3(%arg0: i32) -> (i32, i32) {
    %c0_i32 = arith.constant 0 : i32
    %c0_i32_0 = arith.constant 0 : i32
    %c0_i32_1 = arith.constant 0 : i32
    return %c0_i32, %c0_i32_0 : i32, i32
  }
}

</mosaic_0001>

<bundles_post_ra>
// kernel: resnet50_forward.7
= control target key start
LH: loop header
LB: loop body
LE: loop exit
PB: predicated region body
PF: predicated region fallthrough
CT: control target
= control target key end

     0   :  { %s1464_s12 = smov 0   ;;  %s1466_s13 = smov 0   ;;  %s1686_s0 = inlined_call_operand.vmem [shape: bf16[2048,256], index: 0, kind: input, shape index: {}]   ;;  %s1687_s1 = inlined_call_operand.vmem [shape: bf16[256,64], index: 1, kind: input, shape index: {}]   ;;  %s1688_s2 = inlined_call_operand.vmem [shape: f32[1,64], index: 2, kind: input, shape index: {}]   ;;  %s1689_s3 = inlined_call_operand.vmem [shape: bf16[2048,64], index: 3, kind: output, shape index: {}]  }
   0x1   :  { %s1468_s14 = smov 0  }
   0x2 LB: > { %s25_s15 = sadd.s32 1, %s1438_s13  ;;  %p1082_p0 = scmp.ge.s32.totalorder %s1442_s14, 1  ;;  %s1442_s14 = sphi %s1468_s14, %s13_s14   ;;  %s1438_s13 = sphi %s1466_s13, %s1691_s13   ;;  %s1434_s12 = sphi %s1464_s12, %s1690_s12  }
   0x3   : > { %p27_p1 = scmp.ge.s32.totalorder %s25_s15, 8  ;;  %p170_p2 = scmp.lt.s32.totalorder %s1442_s14, 9 }
   0x5   : > { %s1693_s15 = smov (%p27_p1, %s25_s15), 0  ;;  %p171_p3 = pnand %p1082_p0, %p170_p2 }
   0x6   : > { %v1356_v0 = vld [vmem:[%s1687_s1 + $0x40] sm:$0xff] (!%p171_p3)   ;;  %s1083_s18 = sshll.u32 (!%p171_p3), %s1434_s12, 5  ;;  %v1358_v2 = vld [vmem:[%s1687_s1 + $0x48] sm:$0xff] (!%p171_p3)   ;;  %v1360_v4 = vld [vmem:[%s1687_s1 + $0x50] sm:$0xff] (!%p171_p3)   ;;  %vm941_vm2 = vcmask (!%p171_p3), 519168  }
   0x7   : > { %174 = sbr.rel (%p171_p3) target bundleno = 322 (0x142), region = 32  ;;  %v1357_v1 = vld [vmem:[%s1687_s1] sm:$0xff] (!%p171_p3)   ;;  %1204 = vmatprep.subr.bf16.mxu0 (!%p171_p3), %v1356_v0  ;;  %1316 = vmatprep.subr.bf16.mxu1 (!%p171_p3), %v1356_v0  ;;  %v1359_v3 = vld [vmem:[%s1687_s1 + $0x8] sm:$0xff] (!%p171_p3)   ;;  %p206_p4 = scmp.lt.s32.totalorder (!%p171_p3), %s1083_s18, 255  ;;  %v1361_v5 = vld [vmem:[%s1687_s1 + $0x10] sm:$0xff] (!%p171_p3)  }
   0x8   : > { %1205 = vmatpush3.bf16.msra.mxu0 (!%p171_p3), %v1357_v1  ;;  %1324 = vmatpush3.bf16.msra.mxu1 (!%p171_p3), %v1357_v1  ;;  %v1362_v6 = vld [vmem:[%s1687_s1 + $0x58] sm:$0xff] (!%p171_p3)   ;;  %v1364_v8 = vld [vmem:[%s1687_s1 + $0x60] sm:$0xff] (!%p171_p3)   ;;  %v1366_v10 = vld [vmem:[%s1687_s1 + $0x68] sm:$0xff] (!%p171_p3)  }
   0x9   : > { %1206 = vmatprep.subr.bf16.mxu0 (!%p171_p3), %v1358_v2  ;;  %1317 = vmatprep.subr.bf16.mxu1 (!%p171_p3), %v1358_v2  ;;  %v1363_v7 = vld [vmem:[%s1687_s1 + $0x18] sm:$0xff] (!%p171_p3)   ;;  %v1365_v9 = vld [vmem:[%s1687_s1 + $0x20] sm:$0xff] (!%p171_p3)   ;;  %v1367_v13 = vld [vmem:[%s1687_s1 + $0x28] sm:$0xff] (!%p171_p3)  }
   0xa   : > { %v1368_v14 = vld [vmem:[%s1687_s1 + $0x70] sm:$0xff] (!%p171_p3)   ;;  %v1370_v16 = vld [vmem:[%s1687_s1 + $0x78] sm:$0xff] (!%p171_p3)   ;;  %v1573_v50 = vld [vmem:[%s1688_s2] ss:$0 sm:$0xff] (!%p171_p3) }
   0xb   : > { %v1369_v15 = vld [vmem:[%s1687_s1 + $0x30] sm:$0xff] (!%p171_p3)   ;;  %v1371_v17 = vld [vmem:[%s1687_s1 + $0x38] sm:$0xff] (!%p171_p3)  }
   0xc   : > { %1207 = vmatpush3.bf16.msra.mxu0 (!%p171_p3), %v1359_v3  ;;  %1325 = vmatpush3.bf16.msra.mxu1 (!%p171_p3), %v1359_v3 }
   0xd   : > { %1208 = vmatprep.subr.bf16.mxu0 (!%p171_p3), %v1360_v4  ;;  %1318 = vmatprep.subr.bf16.mxu1 (!%p171_p3), %v1360_v4 }
   0xe   : > { %s1695_s18 = smov (!%p206_p4, %s1083_s18), 255 }
   0xf   : > { %s1171_s6 = sshll.u32 %s1695_s18, 3  ;;  %s1087_s5 = sshll.u32 %s1695_s18, 2 }
  0x10   : > { %1209 = vmatpush3.bf16.msra.mxu0 %v1361_v5  ;;  %1326 = vmatpush3.bf16.msra.mxu1 %v1361_v5  ;;  %s1515_s11 = scalar_lea.vmem %s1686_s0, %s1171_s6  ;;  %s1583_s8 = scalar_lea.vmem %s1689_s3, %s1087_s5 }
  0x11   : > { %1210 = vmatprep.subr.bf16.mxu0 %v1362_v6  ;;  %1319 = vmatprep.subr.bf16.mxu1 %v1362_v6  ;;  %v1374_v11 = vld [vmem:[%s1515_s11 + $0x4] ss:$8 sps:$4 sm:$0xff]   ;;  %v1372_v18 = vld [vmem:[%s1515_s11] ss:$8 sps:$4 sm:$0xff]   ;;  %v1378_v20 = vld [vmem:[%s1515_s11 + $0x14] ss:$8 sps:$4 sm:$0xff]  }
  0x12   : > { %v1377_v12 = vld [vmem:[%s1515_s11 + $0x84] ss:$8 sps:$4 sm:$0xff]   ;;  %588 = vmatprep.mubr.bf16.mxu0 %v1374_v11  ;;  %v1375_v19 = vld [vmem:[%s1515_s11 + $0x80] ss:$8 sps:$4 sm:$0xff]   ;;  %v1380_v21 = vld [vmem:[%s1515_s11 + $0x94] ss:$8 sps:$4 sm:$0xff]  }
  0x13   : > { %652 = vmatprep.mubr.bf16.mxu1 %v1377_v12  ;;  %v1382_v22 = vld [vmem:[%s1515_s11 + $0x10] ss:$8 sps:$4 sm:$0xff]   ;;  %v1384_v24 = vld [vmem:[%s1515_s11 + $0x24] ss:$8 sps:$4 sm:$0xff]   ;;  %v1388_v26 = vld [vmem:[%s1515_s11 + $0x20] ss:$8 sps:$4 sm:$0xff]  }
  0x14   : > { %1211 = vmatpush3.bf16.msra.mxu0 %v1363_v7  ;;  %1327 = vmatpush3.bf16.msra.mxu1 %v1363_v7  ;;  %v1383_v23 = vld [vmem:[%s1515_s11 + $0x90] ss:$8 sps:$4 sm:$0xff]   ;;  %v1386_v25 = vld [vmem:[%s1515_s11 + $0xa4] ss:$8 sps:$4 sm:$0xff]   ;;  %v1389_v27 = vld [vmem:[%s1515_s11 + $0xa0] ss:$8 sps:$4 sm:$0xff]  }
  0x15   : > { %1212 = vmatprep.subr.bf16.mxu0 %v1364_v8  ;;  %1320 = vmatprep.subr.bf16.mxu1 %v1364_v8  ;;  %v1390_v28 = vld [vmem:[%s1515_s11 + $0x34] ss:$8 sps:$4 sm:$0xff]   ;;  %v1394_v30 = vld [vmem:[%s1515_s11 + $0x30] ss:$8 sps:$4 sm:$0xff]   ;;  %v1396_v32 = vld [vmem:[%s1515_s11 + $0x44] ss:$8 sps:$4 sm:$0xff]  }
  0x16   : > { %v1392_v29 = vld [vmem:[%s1515_s11 + $0xb4] ss:$8 sps:$4 sm:$0xff]   ;;  %v1395_v31 = vld [vmem:[%s1515_s11 + $0xb0] ss:$8 sps:$4 sm:$0xff]   ;;  %v1398_v33 = vld [vmem:[%s1515_s11 + $0xc4] ss:$8 sps:$4 sm:$0xff]  }
  0x17   : > { %v1400_v34 = vld [vmem:[%s1515_s11 + $0x40] ss:$8 sps:$4 sm:$0xff]   ;;  %v1402_v36 = vld [vmem:[%s1515_s11 + $0x54] ss:$8 sps:$4 sm:$0xff]   ;;  %v1406_v38 = vld [vmem:[%s1515_s11 + $0x50] ss:$8 sps:$4 sm:$0xff]  }
  0x18   : > { %1213 = vmatpush3.bf16.msra.mxu0 %v1365_v9  ;;  %1328 = vmatpush3.bf16.msra.mxu1 %v1365_v9  ;;  %v1401_v35 = vld [vmem:[%s1515_s11 + $0xc0] ss:$8 sps:$4 sm:$0xff]   ;;  %v1404_v37 = vld [vmem:[%s1515_s11 + $0xd4] ss:$8 sps:$4 sm:$0xff]   ;;  %v1407_v39 = vld [vmem:[%s1515_s11 + $0xd0] ss:$8 sps:$4 sm:$0xff]  }
  0x19   : > { %1214 = vmatprep.subr.bf16.mxu0 %v1366_v10  ;;  %1321 = vmatprep.subr.bf16.mxu1 %v1366_v10  ;;  %v1408_v40 = vld [vmem:[%s1515_s11 + $0x64] ss:$8 sps:$4 sm:$0xff]   ;;  %v1412_v42 = vld [vmem:[%s1515_s11 + $0x60] ss:$8 sps:$4 sm:$0xff]   ;;  %v1414_v44 = vld [vmem:[%s1515_s11 + $0x74] ss:$8 sps:$4 sm:$0xff]  }
  0x1a   : > { %v1410_v41 = vld [vmem:[%s1515_s11 + $0xe4] ss:$8 sps:$4 sm:$0xff]   ;;  %v1413_v43 = vld [vmem:[%s1515_s11 + $0xe0] ss:$8 sps:$4 sm:$0xff]   ;;  %v1416_v45 = vld [vmem:[%s1515_s11 + $0xf4] ss:$8 sps:$4 sm:$0xff]  }
  0x1b   : > { %v1418_v46 = vld [vmem:[%s1515_s11 + $0x70] ss:$8 sps:$4 sm:$0xff]  }
  0x1c   : > { %1215 = vmatpush3.bf16.msra.mxu0 %v1367_v13  ;;  %1329 = vmatpush3.bf16.msra.mxu1 %v1367_v13  ;;  %v1419_v47 = vld [vmem:[%s1515_s11 + $0xf0] ss:$8 sps:$4 sm:$0xff]  }
  0x1d   : > { %1216 = vmatprep.subr.bf16.mxu0 %v1368_v14  ;;  %1322 = vmatprep.subr.bf16.mxu1 %v1368_v14 }
  0x20   : > { %1217 = vmatpush3.bf16.msra.mxu0 %v1369_v15  ;;  %1330 = vmatpush3.bf16.msra.mxu1 %v1369_v15 }
  0x21   : > { %1218 = vmatprep.subr.bf16.mxu0 %v1370_v16  ;;  %1323 = vmatprep.subr.bf16.mxu1 %v1370_v16 }
  0x24   : > { %1219 = vmatpush3.bf16.msra.mxu0 %v1371_v17  ;;  %1331 = vmatpush3.bf16.msra.mxu1 %v1371_v17 }
  0x27   : > { %589 = vmatmul.mubr.bf16.vlgmr.msra.gmra.mrb[0].mxu0 %v1372_v18  ;;  %653 = vmatmul.mubr.bf16.vlgmr.msra.gmra.mrb[0].mxu1 %v1375_v19 }
  0x28   : > { %596 = vmatprep.mubr.bf16.mxu0 %v1378_v20  ;;  %660 = vmatprep.mubr.bf16.mxu1 %v1380_v21 }
  0x2f   : > { %597 = vmatmul.mubr.bf16.gmra.mrb[4].mxu0 %v1382_v22  ;;  %661 = vmatmul.mubr.bf16.gmra.mrb[4].mxu1 %v1383_v23 }
  0x30   : > { %604 = vmatprep.mubr.bf16.mxu0 %v1384_v24  ;;  %668 = vmatprep.mubr.bf16.mxu1 %v1386_v25 }
  0x37   : > { %605 = vmatmul.mubr.bf16.gmra.mrb[8].mxu0 %v1388_v26  ;;  %669 = vmatmul.mubr.bf16.gmra.mrb[8].mxu1 %v1389_v27 }
  0x38   : > { %612 = vmatprep.mubr.bf16.mxu0 %v1390_v28  ;;  %676 = vmatprep.mubr.bf16.mxu1 %v1392_v29 }
  0x3f   : > { %613 = vmatmul.mubr.bf16.gmra.mrb[12].mxu0 %v1394_v30  ;;  %677 = vmatmul.mubr.bf16.gmra.mrb[12].mxu1 %v1395_v31 }
  0x40   : > { %620 = vmatprep.mubr.bf16.mxu0 %v1396_v32  ;;  %684 = vmatprep.mubr.bf16.mxu1 %v1398_v33 }
  0x47   : > { %621 = vmatmul.mubr.bf16.gmra.mrb[16].mxu0 %v1400_v34  ;;  %685 = vmatmul.mubr.bf16.gmra.mrb[16].mxu1 %v1401_v35 }
  0x48   : > { %628 = vmatprep.mubr.bf16.mxu0 %v1402_v36  ;;  %692 = vmatprep.mubr.bf16.mxu1 %v1404_v37 }
  0x4f   : > { %629 = vmatmul.mubr.bf16.gmra.mrb[20].mxu0 %v1406_v38  ;;  %693 = vmatmul.mubr.bf16.gmra.mrb[20].mxu1 %v1407_v39 }
  0x50   : > { %636 = vmatprep.mubr.bf16.mxu0 %v1408_v40  ;;  %700 = vmatprep.mubr.bf16.mxu1 %v1410_v41 }
  0x57   : > { %637 = vmatmul.mubr.bf16.gmra.mrb[24].mxu0 %v1412_v42  ;;  %701 = vmatmul.mubr.bf16.gmra.mrb[24].mxu1 %v1413_v43 }
  0x58   : > { %644 = vmatprep.mubr.bf16.mxu0 %v1414_v44  ;;  %708 = vmatprep.mubr.bf16.mxu1 %v1416_v45 }
  0x5f   : > { %645 = vmatmul.mubr.bf16.gmra.mrb[28].mxu0 %v1418_v46  ;;  %709 = vmatmul.mubr.bf16.gmra.mrb[28].mxu1 %v1419_v47 }
  0xfa   : > { %v1220_v48 = vpop.f32.mrb[0].mxu0  ;;  %v1268_v49 = vpop.f32.mrb[0].mxu1 }
  0xfb   : > { %v1221_v51 = vpop.f32.mrb[1].mxu0  ;;  %v1269_v52 = vpop.f32.mrb[1].mxu1 }
  0xfc   : > { %v1222_v53 = vadd.f32 %v1221_v51, %v1220_v48  ;;  %v1270_v54 = vadd.f32 %v1269_v52, %v1268_v49  ;;  %v1223_v55 = vpop.f32.mrb[2].mxu0  ;;  %v1271_v56 = vpop.f32.mrb[2].mxu1 }
  0xfd   : > { %v1224_v57 = vpop.f32.mrb[3].mxu0  ;;  %v1272_v58 = vpop.f32.mrb[3].mxu1 }
  0xfe   : > { %v591_v59 = vadd.f32 %v1222_v53, %v1573_v50  ;;  %v655_v60 = vadd.f32 %v1270_v54, %v1573_v50  ;;  %v1225_v61 = vadd.f32 %v1224_v57, %v1223_v55  ;;  %v1273_v62 = vadd.f32 %v1272_v58, %v1271_v56 }
 0x100   : > { %vm717_vm0 = vcmp.gt.f32.partialorder %v591_v59, 0.0  ;;  %v749_v63 = vmul.f32 0.1, %v591_v59  ;;  %vm733_vm1 = vcmp.gt.f32.partialorder %v655_v60, 0.0  ;;  %v765_v0 = vmul.f32 0.1, %v655_v60 }
 0x101   : > { %v594_v1 = vadd.f32 %v1225_v61, %v1573_v50  ;;  %v658_v2 = vadd.f32 %v1273_v62, %v1573_v50 }
 0x102   : > { %v781_v3 = vsel %vm717_vm0, %v591_v59, %v749_v63  ;;  %v797_v4 = vsel %vm733_vm1, %v655_v60, %v765_v0  ;;  %v1226_v5 = vpop.f32.mrb[4].mxu0  ;;  %v1274_v6 = vpop.f32.mrb[4].mxu1 }
 0x103   : > { %v1172_v7 = vpack.c.bf16 %v781_v3, %v781_v3  ;;  %v1188_v8 = vpack.c.bf16 %v797_v4, %v797_v4  ;;  %vm718_vm3 = vcmp.gt.f32.partialorder %v594_v1, 0.0  ;;  %v750_v9 = vmul.f32 0.1, %v594_v1  ;;  %v1227_v10 = vpop.f32.mrb[5].mxu0  ;;  %v1275_v11 = vpop.f32.mrb[5].mxu1 }
 0x104   : > { %vm734_vm4 = vcmp.gt.f32.partialorder %v658_v2, 0.0  ;;  %v766_v12 = vmul.f32 0.1, %v658_v2  ;;  %v1228_v13 = vadd.f32 %v1227_v10, %v1226_v5  ;;  %v1276_v14 = vadd.f32 %v1275_v11, %v1274_v6  ;;  %v1229_v15 = vpop.f32.mrb[6].mxu0  ;;  %v1277_v16 = vpop.f32.mrb[6].mxu1 }
 0x105   : > { %942 = vst.msk [vmem:[%s1583_s8] sm:$0xf] %vm941_vm2, %v1172_v7  ;;  %958 = vst.msk [vmem:[%s1583_s8 + $0x40] sm:$0xf] %vm941_vm2, %v1188_v8  ;;  %v782_v17 = vsel %vm718_vm3, %v594_v1, %v750_v9  ;;  %v1230_v18 = vpop.f32.mrb[7].mxu0  ;;  %v1278_v19 = vpop.f32.mrb[7].mxu1 }
 0x106   : > { %v1173_v20 = vpack.c.bf16 %v782_v17, %v782_v17  ;;  %v798_v21 = vsel %vm734_vm4, %v658_v2, %v766_v12  ;;  %v599_v22 = vadd.f32 %v1228_v13, %v1573_v50  ;;  %v663_v23 = vadd.f32 %v1276_v14, %v1573_v50 }
 0x107   : > { %v1189_v24 = vpack.c.bf16 %v798_v21, %v798_v21  ;;  %v1231_v25 = vadd.f32 %v1230_v18, %v1229_v15  ;;  %v1279_v26 = vadd.f32 %v1278_v19, %v1277_v16 }
 0x108   : > { %943 = vst.msk [vmem:[%s1583_s8 + $0x4] sm:$0xf] %vm941_vm2, %v1173_v20  ;;  %vm719_vm5 = vcmp.gt.f32.partialorder %v599_v22, 0.0  ;;  %v751_v27 = vmul.f32 0.1, %v599_v22  ;;  %vm735_vm6 = vcmp.gt.f32.partialorder %v663_v23, 0.0 }
 0x109   : > { %v767_v28 = vmul.f32 0.1, %v663_v23  ;;  %959 = vst.msk [vmem:[%s1583_s8 + $0x44] sm:$0xf] %vm941_vm2, %v1189_v24  ;;  %v602_v29 = vadd.f32 %v1231_v25, %v1573_v50  ;;  %v666_v30 = vadd.f32 %v1279_v26, %v1573_v50 }
 0x10a   : > { %v783_v31 = vsel %vm719_vm5, %v599_v22, %v751_v27  ;;  %v1232_v33 = vpop.f32.mrb[8].mxu0  ;;  %v1280_v34 = vpop.f32.mrb[8].mxu1 }
 0x10b   : > { %v799_v32 = vsel %vm735_vm6, %v663_v23, %v767_v28  ;;  %v1174_v35 = vpack.c.bf16 %v783_v31, %v783_v31  ;;  %vm720_vm7 = vcmp.gt.f32.partialorder %v602_v29, 0.0  ;;  %v752_v37 = vmul.f32 0.1, %v602_v29  ;;  %v1233_v38 = vpop.f32.mrb[9].mxu0  ;;  %v1281_v39 = vpop.f32.mrb[9].mxu1 }
 0x10c   : > { %v1190_v36 = vpack.c.bf16 %v799_v32, %v799_v32  ;;  %vm736_vm8 = vcmp.gt.f32.partialorder %v666_v30, 0.0  ;;  %v768_v40 = vmul.f32 0.1, %v666_v30  ;;  %v1234_v41 = vadd.f32 %v1233_v38, %v1232_v33  ;;  %v1235_v43 = vpop.f32.mrb[10].mxu0  ;;  %v1283_v44 = vpop.f32.mrb[10].mxu1 }
 0x10d   : > { %v1282_v42 = vadd.f32 %v1281_v39, %v1280_v34  ;;  %944 = vst.msk [vmem:[%s1583_s8 + $0x8] sm:$0xf] %vm941_vm2, %v1174_v35  ;;  %v784_v45 = vsel %vm720_vm7, %v602_v29, %v752_v37  ;;  %v1236_v46 = vpop.f32.mrb[11].mxu0  ;;  %v1284_v47 = vpop.f32.mrb[11].mxu1 }
 0x10e   : > { %960 = vst.msk [vmem:[%s1583_s8 + $0x48] sm:$0xf] %vm941_vm2, %v1190_v36  ;;  %v1175_v48 = vpack.c.bf16 %v784_v45, %v784_v45  ;;  %v800_v49 = vsel %vm736_vm8, %v666_v30, %v768_v40  ;;  %v607_v51 = vadd.f32 %v1234_v41, %v1573_v50  ;;  %v1237_v54 = vadd.f32 %v1236_v46, %v1235_v43 }
 0x10f   : > { %v671_v52 = vadd.f32 %v1282_v42, %v1573_v50  ;;  %v1191_v53 = vpack.c.bf16 %v800_v49, %v800_v49  ;;  %v1285_v55 = vadd.f32 %v1284_v47, %v1283_v44 }
 0x110   : > { %945 = vst.msk [vmem:[%s1583_s8 + $0xc] sm:$0xf] %vm941_vm2, %v1175_v48  ;;  %vm721_vm9 = vcmp.gt.f32.partialorder %v607_v51, 0.0  ;;  %v753_v56 = vmul.f32 0.1, %v607_v51  ;;  %v610_v58 = vadd.f32 %v1237_v54, %v1573_v50 }
 0x111   : > { %vm737_vm10 = vcmp.gt.f32.partialorder %v671_v52, 0.0  ;;  %v769_v57 = vmul.f32 0.1, %v671_v52  ;;  %961 = vst.msk [vmem:[%s1583_s8 + $0x4c] sm:$0xf] %vm941_vm2, %v1191_v53  ;;  %v674_v59 = vadd.f32 %v1285_v55, %v1573_v50 }
 0x112   : > { %v785_v60 = vsel %vm721_vm9, %v607_v51, %v753_v56  ;;  %v1238_v62 = vpop.f32.mrb[12].mxu0  ;;  %v1286_v63 = vpop.f32.mrb[12].mxu1  ;;  %vm722_vm11 = vcmp.gt.f32.partialorder %v610_v58, 0.0  ;;  %v754_v2 = vmul.f32 0.1, %v610_v58 }
 0x113   : > { %v801_v61 = vsel %vm737_vm10, %v671_v52, %v769_v57  ;;  %v1176_v0 = vpack.c.bf16 %v785_v60, %v785_v60  ;;  %v1239_v3 = vpop.f32.mrb[13].mxu0  ;;  %v1287_v4 = vpop.f32.mrb[13].mxu1  ;;  %vm738_vm12 = vcmp.gt.f32.partialorder %v674_v59, 0.0  ;;  %v770_v5 = vmul.f32 0.1, %v674_v59 }
 0x114   : > { %v1192_v1 = vpack.c.bf16 %v801_v61, %v801_v61  ;;  %v1240_v6 = vadd.f32 %v1239_v3, %v1238_v62  ;;  %v1288_v7 = vadd.f32 %v1287_v4, %v1286_v63  ;;  %v1241_v8 = vpop.f32.mrb[14].mxu0  ;;  %v1289_v9 = vpop.f32.mrb[14].mxu1  ;;  %v786_v10 = vsel %vm722_vm11, %v610_v58, %v754_v2 }
 0x115   : > { %946 = vst.msk [vmem:[%s1583_s8 + $0x10] sm:$0xf] %vm941_vm2, %v1176_v0  ;;  %v1242_v11 = vpop.f32.mrb[15].mxu0  ;;  %v1290_v12 = vpop.f32.mrb[15].mxu1  ;;  %v1177_v13 = vpack.c.bf16 %v786_v10, %v786_v10  ;;  %v802_v14 = vsel %vm738_vm12, %v674_v59, %v770_v5 }
 0x116   : > { %962 = vst.msk [vmem:[%s1583_s8 + $0x50] sm:$0xf] %vm941_vm2, %v1192_v1  ;;  %v615_v15 = vadd.f32 %v1240_v6, %v1573_v50  ;;  %v679_v16 = vadd.f32 %v1288_v7, %v1573_v50  ;;  %v1193_v17 = vpack.c.bf16 %v802_v14, %v802_v14  ;;  %v1243_v18 = vadd.f32 %v1242_v11, %v1241_v8 }
 0x117   : > { %v1291_v19 = vadd.f32 %v1290_v12, %v1289_v9  ;;  %947 = vst.msk [vmem:[%s1583_s8 + $0x14] sm:$0xf] %vm941_vm2, %v1177_v13 }
 0x118   : > { %vm723_vm13 = vcmp.gt.f32.partialorder %v615_v15, 0.0  ;;  %v755_v20 = vmul.f32 0.1, %v615_v15  ;;  %vm739_vm14 = vcmp.gt.f32.partialorder %v679_v16, 0.0  ;;  %v771_v21 = vmul.f32 0.1, %v679_v16 }
 0x119   : > { %963 = vst.msk [vmem:[%s1583_s8 + $0x54] sm:$0xf] %vm941_vm2, %v1193_v17  ;;  %v618_v22 = vadd.f32 %v1243_v18, %v1573_v50  ;;  %v682_v23 = vadd.f32 %v1291_v19, %v1573_v50 }
 0x11a   : > { %v787_v24 = vsel %vm723_vm13, %v615_v15, %v755_v20  ;;  %v803_v25 = vsel %vm739_vm14, %v679_v16, %v771_v21  ;;  %v1244_v26 = vpop.f32.mrb[16].mxu0  ;;  %v1292_v27 = vpop.f32.mrb[16].mxu1 }
 0x11b   : > { %v1178_v28 = vpack.c.bf16 %v787_v24, %v787_v24  ;;  %v1194_v29 = vpack.c.bf16 %v803_v25, %v803_v25  ;;  %vm724_vm15 = vcmp.gt.f32.partialorder %v618_v22, 0.0  ;;  %v756_v30 = vmul.f32 0.1, %v618_v22  ;;  %v1245_v31 = vpop.f32.mrb[17].mxu0  ;;  %v1293_v32 = vpop.f32.mrb[17].mxu1 }
 0x11c   : > { %vm740_vm0 = vcmp.gt.f32.partialorder %v682_v23, 0.0  ;;  %v772_v33 = vmul.f32 0.1, %v682_v23  ;;  %v1246_v34 = vadd.f32 %v1245_v31, %v1244_v26  ;;  %v1294_v35 = vadd.f32 %v1293_v32, %v1292_v27  ;;  %v1247_v36 = vpop.f32.mrb[18].mxu0  ;;  %v1295_v37 = vpop.f32.mrb[18].mxu1 }
 0x11d   : > { %948 = vst.msk [vmem:[%s1583_s8 + $0x18] sm:$0xf] %vm941_vm2, %v1178_v28  ;;  %964 = vst.msk [vmem:[%s1583_s8 + $0x58] sm:$0xf] %vm941_vm2, %v1194_v29  ;;  %v788_v38 = vsel %vm724_vm15, %v618_v22, %v756_v30  ;;  %v1248_v39 = vpop.f32.mrb[19].mxu0  ;;  %v1296_v40 = vpop.f32.mrb[19].mxu1 }
 0x11e   : > { %v1179_v41 = vpack.c.bf16 %v788_v38, %v788_v38  ;;  %v804_v42 = vsel %vm740_vm0, %v682_v23, %v772_v33  ;;  %v623_v43 = vadd.f32 %v1246_v34, %v1573_v50  ;;  %v687_v44 = vadd.f32 %v1294_v35, %v1573_v50 }
 0x11f   : > { %v1195_v45 = vpack.c.bf16 %v804_v42, %v804_v42  ;;  %v1249_v46 = vadd.f32 %v1248_v39, %v1247_v36  ;;  %v1297_v47 = vadd.f32 %v1296_v40, %v1295_v37 }
 0x120   : > { %949 = vst.msk [vmem:[%s1583_s8 + $0x1c] sm:$0xf] %vm941_vm2, %v1179_v41  ;;  %vm725_vm1 = vcmp.gt.f32.partialorder %v623_v43, 0.0  ;;  %v757_v48 = vmul.f32 0.1, %v623_v43  ;;  %vm741_vm3 = vcmp.gt.f32.partialorder %v687_v44, 0.0 }
 0x121   : > { %v773_v49 = vmul.f32 0.1, %v687_v44  ;;  %965 = vst.msk [vmem:[%s1583_s8 + $0x5c] sm:$0xf] %vm941_vm2, %v1195_v45  ;;  %v626_v51 = vadd.f32 %v1249_v46, %v1573_v50  ;;  %v690_v52 = vadd.f32 %v1297_v47, %v1573_v50 }
 0x122   : > { %v789_v53 = vsel %vm725_vm1, %v623_v43, %v757_v48  ;;  %v1250_v55 = vpop.f32.mrb[20].mxu0  ;;  %v1298_v56 = vpop.f32.mrb[20].mxu1 }
 0x123   : > { %v805_v54 = vsel %vm741_vm3, %v687_v44, %v773_v49  ;;  %v1180_v57 = vpack.c.bf16 %v789_v53, %v789_v53  ;;  %vm726_vm4 = vcmp.gt.f32.partialorder %v626_v51, 0.0  ;;  %v758_v59 = vmul.f32 0.1, %v626_v51  ;;  %v1251_v60 = vpop.f32.mrb[21].mxu0  ;;  %v1299_v61 = vpop.f32.mrb[21].mxu1 }
 0x124   : > { %v1196_v58 = vpack.c.bf16 %v805_v54, %v805_v54  ;;  %vm742_vm5 = vcmp.gt.f32.partialorder %v690_v52, 0.0  ;;  %v774_v62 = vmul.f32 0.1, %v690_v52  ;;  %v1252_v63 = vadd.f32 %v1251_v60, %v1250_v55  ;;  %v1253_v1 = vpop.f32.mrb[22].mxu0  ;;  %v1301_v2 = vpop.f32.mrb[22].mxu1 }
 0x125   : > { %v1300_v0 = vadd.f32 %v1299_v61, %v1298_v56  ;;  %950 = vst.msk [vmem:[%s1583_s8 + $0x20] sm:$0xf] %vm941_vm2, %v1180_v57  ;;  %v790_v3 = vsel %vm726_vm4, %v626_v51, %v758_v59  ;;  %v1254_v4 = vpop.f32.mrb[23].mxu0  ;;  %v1302_v5 = vpop.f32.mrb[23].mxu1 }
 0x126   : > { %966 = vst.msk [vmem:[%s1583_s8 + $0x60] sm:$0xf] %vm941_vm2, %v1196_v58  ;;  %v1181_v6 = vpack.c.bf16 %v790_v3, %v790_v3  ;;  %v806_v7 = vsel %vm742_vm5, %v690_v52, %v774_v62  ;;  %v631_v8 = vadd.f32 %v1252_v63, %v1573_v50  ;;  %v1255_v11 = vadd.f32 %v1254_v4, %v1253_v1 }
 0x127   : > { %v695_v9 = vadd.f32 %v1300_v0, %v1573_v50  ;;  %v1197_v10 = vpack.c.bf16 %v806_v7, %v806_v7  ;;  %v1303_v12 = vadd.f32 %v1302_v5, %v1301_v2 }
 0x128   : > { %951 = vst.msk [vmem:[%s1583_s8 + $0x24] sm:$0xf] %vm941_vm2, %v1181_v6  ;;  %vm727_vm6 = vcmp.gt.f32.partialorder %v631_v8, 0.0  ;;  %v759_v13 = vmul.f32 0.1, %v631_v8  ;;  %v634_v15 = vadd.f32 %v1255_v11, %v1573_v50 }
 0x129   : > { %vm743_vm7 = vcmp.gt.f32.partialorder %v695_v9, 0.0  ;;  %v775_v14 = vmul.f32 0.1, %v695_v9  ;;  %967 = vst.msk [vmem:[%s1583_s8 + $0x64] sm:$0xf] %vm941_vm2, %v1197_v10  ;;  %v698_v16 = vadd.f32 %v1303_v12, %v1573_v50 }
 0x12a   : > { %v791_v17 = vsel %vm727_vm6, %v631_v8, %v759_v13  ;;  %v1256_v19 = vpop.f32.mrb[24].mxu0  ;;  %v1304_v20 = vpop.f32.mrb[24].mxu1  ;;  %vm728_vm8 = vcmp.gt.f32.partialorder %v634_v15, 0.0  ;;  %v760_v23 = vmul.f32 0.1, %v634_v15 }
 0x12b   : > { %v807_v18 = vsel %vm743_vm7, %v695_v9, %v775_v14  ;;  %v1182_v21 = vpack.c.bf16 %v791_v17, %v791_v17  ;;  %v1257_v24 = vpop.f32.mrb[25].mxu0  ;;  %v1305_v25 = vpop.f32.mrb[25].mxu1  ;;  %vm744_vm9 = vcmp.gt.f32.partialorder %v698_v16, 0.0  ;;  %v776_v26 = vmul.f32 0.1, %v698_v16 }
 0x12c   : > { %v1198_v22 = vpack.c.bf16 %v807_v18, %v807_v18  ;;  %v1258_v27 = vadd.f32 %v1257_v24, %v1256_v19  ;;  %v1306_v28 = vadd.f32 %v1305_v25, %v1304_v20  ;;  %v1259_v29 = vpop.f32.mrb[26].mxu0  ;;  %v1307_v30 = vpop.f32.mrb[26].mxu1  ;;  %v792_v31 = vsel %vm728_vm8, %v634_v15, %v760_v23 }
 0x12d   : > { %952 = vst.msk [vmem:[%s1583_s8 + $0x28] sm:$0xf] %vm941_vm2, %v1182_v21  ;;  %v1260_v32 = vpop.f32.mrb[27].mxu0  ;;  %v1308_v33 = vpop.f32.mrb[27].mxu1  ;;  %v1183_v34 = vpack.c.bf16 %v792_v31, %v792_v31  ;;  %v808_v35 = vsel %vm744_vm9, %v698_v16, %v776_v26 }
 0x12e   : > { %968 = vst.msk [vmem:[%s1583_s8 + $0x68] sm:$0xf] %vm941_vm2, %v1198_v22  ;;  %v639_v36 = vadd.f32 %v1258_v27, %v1573_v50  ;;  %v703_v37 = vadd.f32 %v1306_v28, %v1573_v50  ;;  %v1199_v38 = vpack.c.bf16 %v808_v35, %v808_v35  ;;  %v1261_v39 = vadd.f32 %v1260_v32, %v1259_v29 }
 0x12f   : > { %v1309_v40 = vadd.f32 %v1308_v33, %v1307_v30  ;;  %953 = vst.msk [vmem:[%s1583_s8 + $0x2c] sm:$0xf] %vm941_vm2, %v1183_v34 }
 0x130   : > { %vm729_vm10 = vcmp.gt.f32.partialorder %v639_v36, 0.0  ;;  %v761_v41 = vmul.f32 0.1, %v639_v36  ;;  %vm745_vm11 = vcmp.gt.f32.partialorder %v703_v37, 0.0  ;;  %v777_v42 = vmul.f32 0.1, %v703_v37 }
 0x131   : > { %969 = vst.msk [vmem:[%s1583_s8 + $0x6c] sm:$0xf] %vm941_vm2, %v1199_v38  ;;  %v642_v43 = vadd.f32 %v1261_v39, %v1573_v50  ;;  %v706_v44 = vadd.f32 %v1309_v40, %v1573_v50 }
 0x132   : > { %v793_v45 = vsel %vm729_vm10, %v639_v36, %v761_v41  ;;  %v809_v46 = vsel %vm745_vm11, %v703_v37, %v777_v42  ;;  %v1262_v47 = vpop.f32.mrb[28].mxu0  ;;  %v1310_v48 = vpop.f32.mrb[28].mxu1 }
 0x133   : > { %v1184_v49 = vpack.c.bf16 %v793_v45, %v793_v45  ;;  %v1200_v51 = vpack.c.bf16 %v809_v46, %v809_v46  ;;  %vm730_vm12 = vcmp.gt.f32.partialorder %v642_v43, 0.0  ;;  %v762_v52 = vmul.f32 0.1, %v642_v43  ;;  %v1263_v53 = vpop.f32.mrb[29].mxu0  ;;  %v1311_v54 = vpop.f32.mrb[29].mxu1 }
 0x134   : > { %vm746_vm13 = vcmp.gt.f32.partialorder %v706_v44, 0.0  ;;  %v778_v55 = vmul.f32 0.1, %v706_v44  ;;  %v1264_v56 = vadd.f32 %v1263_v53, %v1262_v47  ;;  %v1312_v57 = vadd.f32 %v1311_v54, %v1310_v48  ;;  %v1265_v58 = vpop.f32.mrb[30].mxu0  ;;  %v1313_v59 = vpop.f32.mrb[30].mxu1 }
 0x135   : > { %954 = vst.msk [vmem:[%s1583_s8 + $0x30] sm:$0xf] %vm941_vm2, %v1184_v49  ;;  %970 = vst.msk [vmem:[%s1583_s8 + $0x70] sm:$0xf] %vm941_vm2, %v1200_v51  ;;  %v794_v60 = vsel %vm730_vm12, %v642_v43, %v762_v52  ;;  %v1266_v61 = vpop.f32.mrb[31].mxu0  ;;  %v1314_v62 = vpop.f32.mrb[31].mxu1 }
 0x136   : > { %v1185_v63 = vpack.c.bf16 %v794_v60, %v794_v60  ;;  %v810_v0 = vsel %vm746_vm13, %v706_v44, %v778_v55  ;;  %v647_v1 = vadd.f32 %v1264_v56, %v1573_v50  ;;  %v711_v2 = vadd.f32 %v1312_v57, %v1573_v50 }
 0x137   : > { %v1201_v3 = vpack.c.bf16 %v810_v0, %v810_v0  ;;  %v1267_v4 = vadd.f32 %v1266_v61, %v1265_v58  ;;  %v1315_v5 = vadd.f32 %v1314_v62, %v1313_v59 }
 0x138   : > { %955 = vst.msk [vmem:[%s1583_s8 + $0x34] sm:$0xf] %vm941_vm2, %v1185_v63  ;;  %vm731_vm14 = vcmp.gt.f32.partialorder %v647_v1, 0.0  ;;  %v763_v6 = vmul.f32 0.1, %v647_v1  ;;  %vm747_vm15 = vcmp.gt.f32.partialorder %v711_v2, 0.0 }
 0x139   : > { %v779_v7 = vmul.f32 0.1, %v711_v2  ;;  %971 = vst.msk [vmem:[%s1583_s8 + $0x74] sm:$0xf] %vm941_vm2, %v1201_v3  ;;  %v650_v8 = vadd.f32 %v1267_v4, %v1573_v50  ;;  %v714_v9 = vadd.f32 %v1315_v5, %v1573_v50 }
 0x13a   : > { %v795_v10 = vsel %vm731_vm14, %v647_v1, %v763_v6 }
 0x13b   : > { %v811_v11 = vsel %vm747_vm15, %v711_v2, %v779_v7  ;;  %v1186_v12 = vpack.c.bf16 %v795_v10, %v795_v10  ;;  %vm732_vm0 = vcmp.gt.f32.partialorder %v650_v8, 0.0  ;;  %v764_v14 = vmul.f32 0.1, %v650_v8 }
 0x13c   : > { %v1202_v13 = vpack.c.bf16 %v811_v11, %v811_v11  ;;  %vm748_vm1 = vcmp.gt.f32.partialorder %v714_v9, 0.0  ;;  %v780_v15 = vmul.f32 0.1, %v714_v9 }
 0x13d   : > { %956 = vst.msk [vmem:[%s1583_s8 + $0x38] sm:$0xf] %vm941_vm2, %v1186_v12  ;;  %v796_v16 = vsel %vm732_vm0, %v650_v8, %v764_v14 }
 0x13e   : > { %972 = vst.msk [vmem:[%s1583_s8 + $0x78] sm:$0xf] %vm941_vm2, %v1202_v13  ;;  %v1187_v17 = vpack.c.bf16 %v796_v16, %v796_v16  ;;  %v812_v18 = vsel %vm748_vm1, %v714_v9, %v780_v15 }
 0x13f   : > { %v1203_v19 = vpack.c.bf16 %v812_v18, %v812_v18 }
 0x140   : > { %957 = vst.msk [vmem:[%s1583_s8 + $0x3c] sm:$0xf] %vm941_vm2, %v1187_v17 }
 0x141   : > { %973 = vst.msk [vmem:[%s1583_s8 + $0x7c] sm:$0xf] %vm941_vm2, %v1203_v19 }
 0x142 PF: > { %s13_s14 = sadd.s32 1, %s1442_s14   ;;  %s1690_s12 = smov %s1438_s13 }
 0x143   : > { %p10_p5 = scmp.ge.s32.totalorder %s13_s14, 10   ;;  %s1691_s13 = smov %s1693_s15 }
 0x145   :  { %12 = sbr.rel (!%p10_p5) target bundleno = 2 (0x2), region = 68 }

// kernel: resnet50_forward.8
= control target key start
LH: loop header
LB: loop body
LE: loop exit
PB: predicated region body
PF: predicated region fallthrough
CT: control target
= control target key end

     0   :  { %s640_s12 = smov 0   ;;  %s642_s13 = smov 0   ;;  %s706_s0 = inlined_call_operand.vmem [shape: bf16[2,33,17,128], index: 0, kind: input, shape index: {}, may-alias: {0,1,2}]   ;;  %s707_s1 = inlined_call_operand.vmem [shape: bf16[2,33,17,128], index: 1, kind: input, shape index: {}, may-alias: {0,1,2}]   ;;  %s708_s2 = inlined_call_operand.vmem [shape: bf16[2,33,17,128], index: 2, kind: input, shape index: {}, may-alias: {0,1,2}]   ;;  %s709_s3 = inlined_call_operand.vmem [shape: bf16[2,16,16,64], index: 3, kind: output, shape index: {}]  }
   0x1   :  { %s644_s14 = smov 0   ;;  %s646_s15 = smov 0  }
   0x2   :  { %s648_s16 = smov 0  }
   0x3 LB: > { %s22_s17 = sadd.s32 1, %s609_s14  ;;  %s25_s18 = sadd.s32 1, %s613_s15  ;;  %s617_s16 = sphi %s648_s16, %s13_s16   ;;  %s613_s15 = sphi %s646_s15, %s713_s15   ;;  %s609_s14 = sphi %s644_s14, %s712_s14   ;;  %s605_s13 = sphi %s642_s13, %s711_s13   ;;  %s601_s12 = sphi %s640_s12, %s710_s12  }
   0x4   : > { %p23_p0 = scmp.ge.s32.totalorder %s22_s17, 16  ;;  %p522_p1 = scmp.ge.s32.totalorder %s617_s16, 1 }
   0x5   : > { %p209_p2 = scmp.lt.s32.totalorder %s617_s16, 33 }
   0x6   : > { %s715_s17 = smov (%p23_p0, %s22_s17), 0  ;;  %s717_s18 = smov (!%p23_p0, %s25_s18), %s613_s15 }
   0x7   : > { %p210_p3 = pnand %p522_p1, %p209_p2  ;;  %p27_p4 = scmp.ge.s32.totalorder %s717_s18, 2 }
   0x8   : > { %s523_s19 = sshll.u32 (!%p210_p3), %s601_s12, 1  ;;  %p265_p5 = scmp.lt.s32.totalorder (!%p210_p3), %s605_s13, 1  ;;  %vm325_vm0 = vsmask.f32 (!%p210_p3), 3328  ;;  %vm326_vm1 = vsmask.f32 (!%p210_p3), 7440 }
   0x9   : > { %s719_s18 = smov (%p27_p4, %s717_s18), 0  ;;  %213 = sbr.rel (%p210_p3) target bundleno = 279 (0x117), region = 32 }
   0xa   : > { %p267_p6 = scmp.lt.s32.totalorder (!%p210_p3), %s523_s19, 32  ;;  %s276_s20 = sadd.s32 (!%p210_p3), 1, %s523_s19  ;;  %vm327_vm2 = vmor (!%p210_p3), %vm325_vm0, %vm326_vm1  ;;  %vm372_vm3 = vcmask (!%p210_p3), 519168  }
   0xb   : > { %p279_p7 = scmp.lt.s32.totalorder (!%p210_p3), %s276_s20, 32  ;;  %s289_s24 = sadd.s32 (!%p210_p3), 2, %s523_s19 }
   0xc   : > { %p292_p8 = scmp.lt.s32.totalorder (!%p210_p3), %s289_s24, 32  ;;  %p303_p9 = scmp.lt.s32.totalorder (!%p210_p3), %s601_s12, 15 }
  0x10   : > { %s721_s13 = smov (!%p265_p5, %s605_s13), 1  ;;  %s723_s20 = smov (!%p279_p7, %s276_s20), 32 }
  0x11   : > { %s268_s21 = scalar_select %p267_p6, %s523_s19, 32 }
  0x12   : > { %s535_s22 = smul.u32 99, %s721_s13  ;;  %s725_s24 = smov (!%p292_p8, %s289_s24), 32 }
  0x13   : > { %s534_s23 = smul.u32 3, %s268_s21  ;;  %s727_s12 = smov (!%p303_p9, %s601_s12), 15 }
  0x14   : > { %s536_s27 = smul.u32 3, %s723_s20 }
  0x15   : > { %s271_s25 = sadd.s32 %s535_s22, %s534_s23  ;;  %s537_s9 = smul.u32 3, %s725_s24 }
  0x16   : > { %s524_s26 = sshll.u32 %s271_s25, 2  ;;  %s283_s4 = sadd.s32 %s536_s27, %s535_s22 }
  0x17   : > { %s273_s30 = scalar_lea.vmem %s706_s0, %s524_s26  ;;  %s526_s5 = sshll.u32 %s283_s4, 2 }
  0x18   : > { %s285_s8 = scalar_lea.vmem %s707_s1, %s526_s5  ;;  %v310_v0 = vld [vmem:[%s273_s30] sm:$0xf]  ;;  %v311_v1 = vld [vmem:[%s273_s30 + $0x4] sm:$0xf]  ;;  %v312_v2 = vld [vmem:[%s273_s30 + $0x8] sm:$0x1]  ;;  %s296_s10 = sadd.s32 %s537_s9, %s535_s22 }
  0x19   : > { %v313_v3 = vld [vmem:[%s285_s8] sm:$0xf]  ;;  %v314_v4 = vld [vmem:[%s285_s8 + $0x4] sm:$0xf]  ;;  %v315_v5 = vld [vmem:[%s285_s8 + $0x8] sm:$0x1] }
  0x1a   : > { %v316_v6 = vmax.bf16 %v313_v3, %v310_v0  ;;  %v317_v7 = vmax.bf16 %v314_v4, %v311_v1  ;;  %v318_v8 = vmax.bf16 %v315_v5, %v312_v2  ;;  %s528_s11 = sshll.u32 %s296_s10, 2  ;;  %s619_s22 = smov 64  }
  0x1b   : > { %s298_s21 = scalar_lea.vmem %s708_s2, %s528_s11  ;;  %s529_s23 = sshll.u32 %s727_s12, 1 }
  0x1c   : > { %v319_v9 = vld [vmem:[%s298_s21] sm:$0xf]  ;;  %v320_v10 = vld [vmem:[%s298_s21 + $0x4] sm:$0xf]  ;;  %v321_v11 = vld [vmem:[%s298_s21 + $0x8] sm:$0x1] }
  0x1d   : > { %v322_v12 = vmax.bf16 %v319_v9, %v316_v6  ;;  %v323_v13 = vmax.bf16 %v320_v10, %v317_v7  ;;  %v324_v14 = vmax.bf16 %v321_v11, %v318_v8  ;;  %s530_s24 = sshll.u32 %s721_s13, 5 }
  0x1e   : > { %s307_s25 = sadd.s32 %s530_s24, %s529_s23 }
  0x1f   : > { %v329_v15 = vshrl.u32 %v322_v12, 16  ;;  %v332_v16 = vshll.u32 %v322_v12, 16  ;;  %v338_v17 = vshll.u32 %v323_v13, 16  ;;  %v342_v18 = vshrl.u32 %v323_v13, 16  ;;  %s531_s26 = sshll.u32 %s307_s25, 2 }
  0x20   : > { %v348_v19 = vshll.u32 %v324_v14, 16  ;;  %s309_s29 = scalar_lea.vmem %s709_s3, %s531_s26 }
  0x21   : > { %v331_v20 = vrot.slane %v329_v15, 4  ;;  %v334_v21 = vrot.slane %v332_v16, 5  ;;  %v340_v22 = vrot.slane %v338_v17, 5  ;;  %v344_v23 = vrot.slane %v342_v18, 4 }
  0x22   : > { %v350_v28 = vrot.slane %v348_v19, 5 }
  0x23   : > { %v335_v24 = vor.u32 %v334_v21, %v331_v20  ;;  %v345_v25 = vor.u32 %v344_v23, %v340_v22 }
  0x25   : > { %v336_v26 = vrot.slane %v335_v24, 4  ;;  %v346_v27 = vrot.slane %v345_v25, 4 }
  0x27   : > { %v341_v29 = vsel %vm327_vm2, %v336_v26, %v340_v22  ;;  %v351_v30 = vsel %vm327_vm2, %v346_v27, %v350_v28 }
  0x28   : > { %352 = vrot.lane.b32.xlu0 %v341_v29, %s619_s22 }
  0x2c   : > { %354 = vrot.lane.b32.xlu0 %v351_v30, %s619_s22 }
  0x9a   : > { %v353_v31 = vpop.permute.xlu0 %352 }
  0x9b   : > { %v358_v32 = vmax.bf16 %v353_v31, %v322_v12 }
  0x9d   : > { %v362_v33 = vmax.bf16 %v358_v32, %v341_v29 }
  0x9e   : > { %v355_v34 = vpop.permute.xlu0 %354 }
  0x9f   : > { %v359_v35 = vmax.bf16 %v355_v34, %v323_v13  ;;  %366 = vrot.lane.b32.xlu1 %v362_v33, %s619_s22 }
  0xa1   : > { %v363_v36 = vmax.bf16 %v359_v35, %v351_v30 }
  0xa3   : > { %368 = vrot.lane.b32.xlu1 %v363_v36, %s619_s22 }
 0x111   : > { %v367_v37 = vpop.permute.xlu1 %366 }
 0x112   : > { %373 = vst.msk [vmem:[%s309_s29] sm:$0xf] %vm372_vm3, %v367_v37 }
 0x115   : > { %v369_v38 = vpop.permute.xlu1 %368 }
 0x116   : > { %374 = vst.msk [vmem:[%s309_s29 + $0x4] sm:$0xf] %vm372_vm3, %v369_v38 }
 0x117 PF: > { %s13_s16 = sadd.s32 1, %s617_s16   ;;  %s710_s12 = smov %s609_s14 }
 0x118   : > { %p10_p10 = scmp.ge.s32.totalorder %s13_s16, 34   ;;  %s711_s13 = smov %s613_s15 }
 0x119   : > { %s712_s14 = smov %s715_s17  ;;  %s713_s15 = smov %s719_s18 }
 0x11a   :  { %12 = sbr.rel (!%p10_p10) target bundleno = 3 (0x3), region = 68 }

// kernel: resnet50_forward.9
= control target key start
LH: loop header
LB: loop body
LE: loop exit
PB: predicated region body
PF: predicated region fallthrough
CT: control target
= control target key end

     0   :  { %s1279_s12 = smov 0   ;;  %s1281_s13 = smov 0   ;;  %s1495_s0 = inlined_call_operand.vmem [shape: bf16[512,64], index: 0, kind: input, shape index: {}]   ;;  %s1496_s1 = inlined_call_operand.vmem [shape: bf16[64,256], index: 1, kind: input, shape index: {}]   ;;  %s1497_s2 = inlined_call_operand.vmem [shape: f32[1,256], index: 2, kind: input, shape index: {}]   ;;  %s1498_s3 = inlined_call_operand.vmem [shape: bf16[512,256], index: 3, kind: output, shape index: {}]  }
   0x1   :  { %s1283_s14 = smov 0  }
   0x2 LB: > { %s25_s15 = sadd.s32 1, %s1252_s13  ;;  %p1060_p0 = scmp.ge.s32.totalorder %s1256_s14, 1  ;;  %s1256_s14 = sphi %s1283_s14, %s13_s14   ;;  %s1252_s13 = sphi %s1281_s13, %s1500_s13   ;;  %s1248_s12 = sphi %s1279_s12, %s1499_s12  }
   0x3   : > { %p27_p1 = scmp.ge.s32.totalorder %s25_s15, 2  ;;  %p173_p2 = scmp.lt.s32.totalorder %s1256_s14, 3 }
   0x5   : > { %s1502_s15 = smov (%p27_p1, %s25_s15), 0  ;;  %p174_p3 = pnand %p1060_p0, %p173_p2 }
   0x6   : > { %v1206_v0 = vld [vmem:[%s1496_s1 + $0x4] ss:$8 sps:$4 sm:$0xff] (!%p174_p3)   ;;  %s1061_s18 = sshll.u32 (!%p174_p3), %s1248_s12, 5  ;;  %v1208_v1 = vld [vmem:[%s1496_s1] ss:$8 sps:$4 sm:$0xff] (!%p174_p3)   ;;  %v1258_v2 = vmov (!%p174_p3), 0   ;;  %v283_v25 = vlaneseq (!%p174_p3) }
   0x7   : > { %177 = sbr.rel (%p174_p3) target bundleno = 302 (0x12e), region = 32  ;;  %494 = vmatprep.mubr.bf16.mxu0 (!%p174_p3), %v1258_v2  ;;  %574 = vmatprep.mubr.bf16.mxu1 (!%p174_p3), %v1258_v2  ;;  %p212_p4 = scmp.lt.s32.totalorder (!%p174_p3), %s1061_s18, 63  ;;  %v1209_v3 = vld [vmem:[%s1496_s1 + $0x14] ss:$8 sps:$4 sm:$0xff] (!%p174_p3)   ;;  %v1211_v4 = vld [vmem:[%s1496_s1 + $0x10] ss:$8 sps:$4 sm:$0xff] (!%p174_p3)  }
   0x8   : > { %462 = vmatprep.subr.bf16.mxu0 (!%p174_p3), %v1206_v0  ;;  %1173 = vmatprep.subr.bf16.mxu1 (!%p174_p3), %v1206_v0  ;;  %v1212_v5 = vld [vmem:[%s1496_s1 + $0x24] ss:$8 sps:$4 sm:$0xff] (!%p174_p3)   ;;  %v1214_v6 = vld [vmem:[%s1496_s1 + $0x20] ss:$8 sps:$4 sm:$0xff] (!%p174_p3)   ;;  %v1215_v7 = vld [vmem:[%s1496_s1 + $0x34] ss:$8 sps:$4 sm:$0xff] (!%p174_p3)  }
   0x9   : > { %463 = vmatpush1.bf16.msra.mxu0 (!%p174_p3), %v1208_v1  ;;  %1177 = vmatpush1.bf16.msra.mxu1 (!%p174_p3), %v1208_v1  ;;  %v1217_v8 = vld [vmem:[%s1496_s1 + $0x30] ss:$8 sps:$4 sm:$0xff] (!%p174_p3)   ;;  %vm413_vm0 = vcmask (!%p174_p3), 523264   ;;  %v284_v26 = vshrl.u32 (!%p174_p3), %v283_v25, 7  ;;  %v281_v28 = vld [vmem:[%s1497_s2] sm:$0x3] (!%p174_p3) }
   0xa   : > { %464 = vmatprep.subr.bf16.mxu0 (!%p174_p3), %v1209_v3  ;;  %1174 = vmatprep.subr.bf16.mxu1 (!%p174_p3), %v1209_v3 }
   0xb   : > { %v285_v27 = vsub.s32 (!%p174_p3), 0, %v284_v26  ;;  %v289_v29 = vsub.s32 (!%p174_p3), 1, %v284_v26 }
   0xd   : > { %465 = vmatpush1.bf16.msra.mxu0 (!%p174_p3), %v1211_v4  ;;  %1178 = vmatpush1.bf16.msra.mxu1 (!%p174_p3), %v1211_v4  ;;  %v1380_v30 = vrot.slane (!%p174_p3), %v281_v28, %v285_v27  ;;  %v1382_v31 = vrot.slane (!%p174_p3), %v281_v28, %v289_v29 }
   0xe   : > { %s1504_s18 = smov (!%p212_p4, %s1061_s18), 63  ;;  %466 = vmatprep.subr.bf16.mxu0 %v1212_v5  ;;  %1175 = vmatprep.subr.bf16.mxu1 %v1212_v5 }
   0xf   : > { %s1062_s27 = sshll.u32 %s1504_s18, 2  ;;  %s1140_s12 = sshll.u32 %s1504_s18, 3 }
  0x10   : > { %s1320_s30 = scalar_lea.vmem %s1495_s0, %s1062_s27  ;;  %s1396_s18 = scalar_lea.vmem %s1498_s3, %s1140_s12 }
  0x11   : > { %467 = vmatpush1.bf16.msra.mxu0 %v1214_v6  ;;  %1179 = vmatpush1.bf16.msra.mxu1 %v1214_v6  ;;  %v1218_v9 = vld [vmem:[%s1320_s30] sm:$0xff]   ;;  %v1220_v11 = vld [vmem:[%s1320_s30 + $0x8] sm:$0xff]   ;;  %v1222_v13 = vld [vmem:[%s1320_s30 + $0x10] sm:$0xff]  }
  0x12   : > { %468 = vmatprep.subr.bf16.mxu0 %v1215_v7  ;;  %1176 = vmatprep.subr.bf16.mxu1 %v1215_v7  ;;  %v1219_v10 = vld [vmem:[%s1320_s30 + $0x40] sm:$0xff]   ;;  %v1221_v12 = vld [vmem:[%s1320_s30 + $0x48] sm:$0xff]   ;;  %v1223_v14 = vld [vmem:[%s1320_s30 + $0x50] sm:$0xff]  }
  0x13   : > { %v1224_v15 = vld [vmem:[%s1320_s30 + $0x18] sm:$0xff]   ;;  %v1226_v17 = vld [vmem:[%s1320_s30 + $0x20] sm:$0xff]   ;;  %v1228_v19 = vld [vmem:[%s1320_s30 + $0x28] sm:$0xff]  }
  0x14   : > { %v1225_v16 = vld [vmem:[%s1320_s30 + $0x58] sm:$0xff]   ;;  %v1227_v18 = vld [vmem:[%s1320_s30 + $0x60] sm:$0xff]   ;;  %v1229_v20 = vld [vmem:[%s1320_s30 + $0x68] sm:$0xff]  }
  0x15   : > { %469 = vmatpush1.bf16.msra.mxu0 %v1217_v8  ;;  %1180 = vmatpush1.bf16.msra.mxu1 %v1217_v8  ;;  %v1230_v21 = vld [vmem:[%s1320_s30 + $0x30] sm:$0xff]   ;;  %v1232_v23 = vld [vmem:[%s1320_s30 + $0x38] sm:$0xff]  }
  0x16   : > { %v1231_v22 = vld [vmem:[%s1320_s30 + $0x70] sm:$0xff]   ;;  %v1233_v24 = vld [vmem:[%s1320_s30 + $0x78] sm:$0xff]  }
  0x18   : > { %1090 = vmatmul.mubr.msk.bf16.vlgmr.msra.gmra.mrb[0].mxu0 %vm413_vm0, %v1218_v9  ;;  %1098 = vmatmul.mubr.msk.bf16.vlgmr.msra.gmra.mrb[0].mxu1 %vm413_vm0, %v1219_v10 }
  0x19   : > { %504 = vmatprep.mubr.bf16.mxu0 %v1258_v2  ;;  %584 = vmatprep.mubr.bf16.mxu1 %v1258_v2 }
  0x20   : > { %1091 = vmatmul.mubr.msk.bf16.gmra.mrb[4].mxu0 %vm413_vm0, %v1220_v11  ;;  %1099 = vmatmul.mubr.msk.bf16.gmra.mrb[4].mxu1 %vm413_vm0, %v1221_v12 }
  0x21   : > { %514 = vmatprep.mubr.bf16.mxu0 %v1258_v2  ;;  %594 = vmatprep.mubr.bf16.mxu1 %v1258_v2 }
  0x28   : > { %1092 = vmatmul.mubr.msk.bf16.gmra.mrb[8].mxu0 %vm413_vm0, %v1222_v13  ;;  %1100 = vmatmul.mubr.msk.bf16.gmra.mrb[8].mxu1 %vm413_vm0, %v1223_v14 }
  0x29   : > { %524 = vmatprep.mubr.bf16.mxu0 %v1258_v2  ;;  %604 = vmatprep.mubr.bf16.mxu1 %v1258_v2 }
  0x30   : > { %1093 = vmatmul.mubr.msk.bf16.gmra.mrb[12].mxu0 %vm413_vm0, %v1224_v15  ;;  %1101 = vmatmul.mubr.msk.bf16.gmra.mrb[12].mxu1 %vm413_vm0, %v1225_v16 }
  0x31   : > { %534 = vmatprep.mubr.bf16.mxu0 %v1258_v2  ;;  %614 = vmatprep.mubr.bf16.mxu1 %v1258_v2 }
  0x38   : > { %1094 = vmatmul.mubr.msk.bf16.gmra.mrb[16].mxu0 %vm413_vm0, %v1226_v17  ;;  %1102 = vmatmul.mubr.msk.bf16.gmra.mrb[16].mxu1 %vm413_vm0, %v1227_v18 }
  0x39   : > { %544 = vmatprep.mubr.bf16.mxu0 %v1258_v2  ;;  %624 = vmatprep.mubr.bf16.mxu1 %v1258_v2 }
  0x40   : > { %1095 = vmatmul.mubr.msk.bf16.gmra.mrb[20].mxu0 %vm413_vm0, %v1228_v19  ;;  %1103 = vmatmul.mubr.msk.bf16.gmra.mrb[20].mxu1 %vm413_vm0, %v1229_v20 }
  0x41   : > { %554 = vmatprep.mubr.bf16.mxu0 %v1258_v2  ;;  %634 = vmatprep.mubr.bf16.mxu1 %v1258_v2 }
  0x48   : > { %1096 = vmatmul.mubr.msk.bf16.gmra.mrb[24].mxu0 %vm413_vm0, %v1230_v21  ;;  %1104 = vmatmul.mubr.msk.bf16.gmra.mrb[24].mxu1 %vm413_vm0, %v1231_v22 }
  0x49   : > { %564 = vmatprep.mubr.bf16.mxu0 %v1258_v2  ;;  %644 = vmatprep.mubr.bf16.mxu1 %v1258_v2 }
  0x50   : > { %1097 = vmatmul.mubr.msk.bf16.gmra.mrb[28].mxu0 %vm413_vm0, %v1232_v23  ;;  %1105 = vmatmul.mubr.msk.bf16.gmra.mrb[28].mxu1 %vm413_vm0, %v1233_v24 }
  0xeb   : > { %v496_v32 = vpop.f32.mrb[0].mxu0  ;;  %v576_v33 = vpop.f32.mrb[0].mxu1 }
  0xec   : > { %v497_v34 = vadd.f32 %v496_v32, %v1380_v30  ;;  %v577_v35 = vadd.f32 %v576_v33, %v1380_v30  ;;  %v498_v36 = vpop.f32.mrb[1].mxu0  ;;  %v578_v37 = vpop.f32.mrb[1].mxu1 }
  0xed   : > { %v499_v38 = vadd.f32 %v498_v36, %v1382_v31  ;;  %v579_v39 = vadd.f32 %v578_v37, %v1382_v31  ;;  %v500_v40 = vpop.f32.mrb[2].mxu0  ;;  %v580_v41 = vpop.f32.mrb[2].mxu1 }
  0xee   : > { %v655_v42 = vmax.f32 %v497_v34, 0.0  ;;  %v687_v43 = vmax.f32 %v577_v35, 0.0  ;;  %v501_v44 = vadd.f32 %v500_v40, %v1380_v30  ;;  %v581_v45 = vadd.f32 %v580_v41, %v1380_v30  ;;  %v502_v46 = vpop.f32.mrb[3].mxu0  ;;  %v582_v47 = vpop.f32.mrb[3].mxu1 }
  0xef   : > { %v656_v48 = vmax.f32 %v499_v38, 0.0  ;;  %v688_v49 = vmax.f32 %v579_v39, 0.0  ;;  %v503_v50 = vadd.f32 %v502_v46, %v1382_v31  ;;  %v583_v51 = vadd.f32 %v582_v47, %v1382_v31 }
  0xf0   : > { %v657_v52 = vmax.f32 %v501_v44, 0.0  ;;  %v689_v53 = vmax.f32 %v581_v45, 0.0 }
  0xf1   : > { %v1141_v54 = vpack.c.bf16 %v656_v48, %v655_v42  ;;  %v1157_v55 = vpack.c.bf16 %v688_v49, %v687_v43  ;;  %v658_v56 = vmax.f32 %v503_v50, 0.0  ;;  %v690_v57 = vmax.f32 %v583_v51, 0.0 }
  0xf3   : > { %911 = vst [vmem:[%s1396_s18] sm:$0xff] %v1141_v54  ;;  %927 = vst [vmem:[%s1396_s18 + $0x80] sm:$0xff] %v1157_v55  ;;  %v1142_v58 = vpack.c.bf16 %v658_v56, %v657_v52  ;;  %v1158_v59 = vpack.c.bf16 %v690_v57, %v689_v53  ;;  %v506_v60 = vpop.f32.mrb[4].mxu0  ;;  %v586_v61 = vpop.f32.mrb[4].mxu1 }
  0xf4   : > { %v507_v62 = vadd.f32 %v506_v60, %v1380_v30  ;;  %v587_v63 = vadd.f32 %v586_v61, %v1380_v30  ;;  %v508_v0 = vpop.f32.mrb[5].mxu0  ;;  %v588_v1 = vpop.f32.mrb[5].mxu1 }
  0xf5   : > { %912 = vst [vmem:[%s1396_s18 + $0x8] sm:$0xff] %v1142_v58  ;;  %928 = vst [vmem:[%s1396_s18 + $0x88] sm:$0xff] %v1158_v59  ;;  %v509_v2 = vadd.f32 %v508_v0, %v1382_v31  ;;  %v589_v3 = vadd.f32 %v588_v1, %v1382_v31  ;;  %v510_v4 = vpop.f32.mrb[6].mxu0  ;;  %v590_v5 = vpop.f32.mrb[6].mxu1 }
  0xf6   : > { %v659_v6 = vmax.f32 %v507_v62, 0.0  ;;  %v691_v7 = vmax.f32 %v587_v63, 0.0  ;;  %v511_v8 = vadd.f32 %v510_v4, %v1380_v30  ;;  %v591_v9 = vadd.f32 %v590_v5, %v1380_v30  ;;  %v512_v10 = vpop.f32.mrb[7].mxu0  ;;  %v592_v11 = vpop.f32.mrb[7].mxu1 }
  0xf7   : > { %v660_v12 = vmax.f32 %v509_v2, 0.0  ;;  %v692_v13 = vmax.f32 %v589_v3, 0.0  ;;  %v513_v14 = vadd.f32 %v512_v10, %v1382_v31  ;;  %v593_v15 = vadd.f32 %v592_v11, %v1382_v31 }
  0xf8   : > { %v661_v16 = vmax.f32 %v511_v8, 0.0  ;;  %v693_v17 = vmax.f32 %v591_v9, 0.0 }
  0xf9   : > { %v1143_v18 = vpack.c.bf16 %v660_v12, %v659_v6  ;;  %v1159_v19 = vpack.c.bf16 %v692_v13, %v691_v7  ;;  %v662_v20 = vmax.f32 %v513_v14, 0.0  ;;  %v694_v21 = vmax.f32 %v593_v15, 0.0 }
  0xfb   : > { %913 = vst [vmem:[%s1396_s18 + $0x10] sm:$0xff] %v1143_v18  ;;  %929 = vst [vmem:[%s1396_s18 + $0x90] sm:$0xff] %v1159_v19  ;;  %v1144_v22 = vpack.c.bf16 %v662_v20, %v661_v16  ;;  %v1160_v23 = vpack.c.bf16 %v694_v21, %v693_v17  ;;  %v516_v24 = vpop.f32.mrb[8].mxu0  ;;  %v596_v25 = vpop.f32.mrb[8].mxu1 }
  0xfc   : > { %v517_v26 = vadd.f32 %v516_v24, %v1380_v30  ;;  %v597_v27 = vadd.f32 %v596_v25, %v1380_v30  ;;  %v518_v28 = vpop.f32.mrb[9].mxu0  ;;  %v598_v29 = vpop.f32.mrb[9].mxu1 }
  0xfd   : > { %914 = vst [vmem:[%s1396_s18 + $0x18] sm:$0xff] %v1144_v22  ;;  %930 = vst [vmem:[%s1396_s18 + $0x98] sm:$0xff] %v1160_v23  ;;  %v519_v32 = vadd.f32 %v518_v28, %v1382_v31  ;;  %v599_v33 = vadd.f32 %v598_v29, %v1382_v31  ;;  %v520_v34 = vpop.f32.mrb[10].mxu0  ;;  %v600_v35 = vpop.f32.mrb[10].mxu1 }
  0xfe   : > { %v663_v36 = vmax.f32 %v517_v26, 0.0  ;;  %v695_v37 = vmax.f32 %v597_v27, 0.0  ;;  %v521_v38 = vadd.f32 %v520_v34, %v1380_v30  ;;  %v601_v39 = vadd.f32 %v600_v35, %v1380_v30  ;;  %v522_v40 = vpop.f32.mrb[11].mxu0  ;;  %v602_v41 = vpop.f32.mrb[11].mxu1 }
  0xff   : > { %v664_v42 = vmax.f32 %v519_v32, 0.0  ;;  %v696_v43 = vmax.f32 %v599_v33, 0.0  ;;  %v523_v44 = vadd.f32 %v522_v40, %v1382_v31  ;;  %v603_v45 = vadd.f32 %v602_v41, %v1382_v31 }
 0x100   : > { %v665_v46 = vmax.f32 %v521_v38, 0.0  ;;  %v697_v47 = vmax.f32 %v601_v39, 0.0 }
 0x101   : > { %v1145_v48 = vpack.c.bf16 %v664_v42, %v663_v36  ;;  %v1161_v49 = vpack.c.bf16 %v696_v43, %v695_v37  ;;  %v666_v50 = vmax.f32 %v523_v44, 0.0  ;;  %v698_v51 = vmax.f32 %v603_v45, 0.0 }
 0x103   : > { %915 = vst [vmem:[%s1396_s18 + $0x20] sm:$0xff] %v1145_v48  ;;  %931 = vst [vmem:[%s1396_s18 + $0xa0] sm:$0xff] %v1161_v49  ;;  %v1146_v52 = vpack.c.bf16 %v666_v50, %v665_v46  ;;  %v1162_v53 = vpack.c.bf16 %v698_v51, %v697_v47  ;;  %v526_v54 = vpop.f32.mrb[12].mxu0  ;;  %v606_v55 = vpop.f32.mrb[12].mxu1 }
 0x104   : > { %v527_v56 = vadd.f32 %v526_v54, %v1380_v30  ;;  %v607_v57 = vadd.f32 %v606_v55, %v1380_v30  ;;  %v528_v58 = vpop.f32.mrb[13].mxu0  ;;  %v608_v59 = vpop.f32.mrb[13].mxu1 }
 0x105   : > { %916 = vst [vmem:[%s1396_s18 + $0x28] sm:$0xff] %v1146_v52  ;;  %932 = vst [vmem:[%s1396_s18 + $0xa8] sm:$0xff] %v1162_v53  ;;  %v529_v60 = vadd.f32 %v528_v58, %v1382_v31  ;;  %v609_v61 = vadd.f32 %v608_v59, %v1382_v31  ;;  %v530_v62 = vpop.f32.mrb[14].mxu0  ;;  %v610_v63 = vpop.f32.mrb[14].mxu1 }
 0x106   : > { %v667_v0 = vmax.f32 %v527_v56, 0.0  ;;  %v699_v1 = vmax.f32 %v607_v57, 0.0  ;;  %v531_v2 = vadd.f32 %v530_v62, %v1380_v30  ;;  %v611_v3 = vadd.f32 %v610_v63, %v1380_v30  ;;  %v532_v4 = vpop.f32.mrb[15].mxu0  ;;  %v612_v5 = vpop.f32.mrb[15].mxu1 }
 0x107   : > { %v668_v6 = vmax.f32 %v529_v60, 0.0  ;;  %v700_v7 = vmax.f32 %v609_v61, 0.0  ;;  %v533_v8 = vadd.f32 %v532_v4, %v1382_v31  ;;  %v613_v9 = vadd.f32 %v612_v5, %v1382_v31 }
 0x108   : > { %v669_v10 = vmax.f32 %v531_v2, 0.0  ;;  %v701_v11 = vmax.f32 %v611_v3, 0.0 }
 0x109   : > { %v1147_v12 = vpack.c.bf16 %v668_v6, %v667_v0  ;;  %v1163_v13 = vpack.c.bf16 %v700_v7, %v699_v1  ;;  %v670_v14 = vmax.f32 %v533_v8, 0.0  ;;  %v702_v15 = vmax.f32 %v613_v9, 0.0 }
 0x10b   : > { %917 = vst [vmem:[%s1396_s18 + $0x30] sm:$0xff] %v1147_v12  ;;  %933 = vst [vmem:[%s1396_s18 + $0xb0] sm:$0xff] %v1163_v13  ;;  %v1148_v16 = vpack.c.bf16 %v670_v14, %v669_v10  ;;  %v1164_v17 = vpack.c.bf16 %v702_v15, %v701_v11  ;;  %v536_v18 = vpop.f32.mrb[16].mxu0  ;;  %v616_v19 = vpop.f32.mrb[16].mxu1 }
 0x10c   : > { %v537_v20 = vadd.f32 %v536_v18, %v1380_v30  ;;  %v617_v21 = vadd.f32 %v616_v19, %v1380_v30  ;;  %v538_v22 = vpop.f32.mrb[17].mxu0  ;;  %v618_v23 = vpop.f32.mrb[17].mxu1 }
 0x10d   : > { %918 = vst [vmem:[%s1396_s18 + $0x38] sm:$0xff] %v1148_v16  ;;  %934 = vst [vmem:[%s1396_s18 + $0xb8] sm:$0xff] %v1164_v17  ;;  %v539_v24 = vadd.f32 %v538_v22, %v1382_v31  ;;  %v619_v25 = vadd.f32 %v618_v23, %v1382_v31  ;;  %v540_v26 = vpop.f32.mrb[18].mxu0  ;;  %v620_v27 = vpop.f32.mrb[18].mxu1 }
 0x10e   : > { %v671_v28 = vmax.f32 %v537_v20, 0.0  ;;  %v703_v29 = vmax.f32 %v617_v21, 0.0  ;;  %v541_v32 = vadd.f32 %v540_v26, %v1380_v30  ;;  %v621_v33 = vadd.f32 %v620_v27, %v1380_v30  ;;  %v542_v34 = vpop.f32.mrb[19].mxu0  ;;  %v622_v35 = vpop.f32.mrb[19].mxu1 }
 0x10f   : > { %v672_v36 = vmax.f32 %v539_v24, 0.0  ;;  %v704_v37 = vmax.f32 %v619_v25, 0.0  ;;  %v543_v38 = vadd.f32 %v542_v34, %v1382_v31  ;;  %v623_v39 = vadd.f32 %v622_v35, %v1382_v31 }
 0x110   : > { %v673_v40 = vmax.f32 %v541_v32, 0.0  ;;  %v705_v41 = vmax.f32 %v621_v33, 0.0 }
 0x111   : > { %v1149_v42 = vpack.c.bf16 %v672_v36, %v671_v28  ;;  %v1165_v43 = vpack.c.bf16 %v704_v37, %v703_v29  ;;  %v674_v44 = vmax.f32 %v543_v38, 0.0  ;;  %v706_v45 = vmax.f32 %v623_v39, 0.0 }
 0x113   : > { %919 = vst [vmem:[%s1396_s18 + $0x40] sm:$0xff] %v1149_v42  ;;  %935 = vst [vmem:[%s1396_s18 + $0xc0] sm:$0xff] %v1165_v43  ;;  %v1150_v46 = vpack.c.bf16 %v674_v44, %v673_v40  ;;  %v1166_v47 = vpack.c.bf16 %v706_v45, %v705_v41  ;;  %v546_v48 = vpop.f32.mrb[20].mxu0  ;;  %v626_v49 = vpop.f32.mrb[20].mxu1 }
 0x114   : > { %v547_v50 = vadd.f32 %v546_v48, %v1380_v30  ;;  %v627_v51 = vadd.f32 %v626_v49, %v1380_v30  ;;  %v548_v52 = vpop.f32.mrb[21].mxu0  ;;  %v628_v53 = vpop.f32.mrb[21].mxu1 }
 0x115   : > { %920 = vst [vmem:[%s1396_s18 + $0x48] sm:$0xff] %v1150_v46  ;;  %936 = vst [vmem:[%s1396_s18 + $0xc8] sm:$0xff] %v1166_v47  ;;  %v549_v54 = vadd.f32 %v548_v52, %v1382_v31  ;;  %v629_v55 = vadd.f32 %v628_v53, %v1382_v31  ;;  %v550_v56 = vpop.f32.mrb[22].mxu0  ;;  %v630_v57 = vpop.f32.mrb[22].mxu1 }
 0x116   : > { %v675_v58 = vmax.f32 %v547_v50, 0.0  ;;  %v707_v59 = vmax.f32 %v627_v51, 0.0  ;;  %v551_v60 = vadd.f32 %v550_v56, %v1380_v30  ;;  %v631_v61 = vadd.f32 %v630_v57, %v1380_v30  ;;  %v552_v62 = vpop.f32.mrb[23].mxu0  ;;  %v632_v63 = vpop.f32.mrb[23].mxu1 }
 0x117   : > { %v676_v0 = vmax.f32 %v549_v54, 0.0  ;;  %v708_v1 = vmax.f32 %v629_v55, 0.0  ;;  %v553_v2 = vadd.f32 %v552_v62, %v1382_v31  ;;  %v633_v3 = vadd.f32 %v632_v63, %v1382_v31 }
 0x118   : > { %v677_v4 = vmax.f32 %v551_v60, 0.0  ;;  %v709_v5 = vmax.f32 %v631_v61, 0.0 }
 0x119   : > { %v1151_v6 = vpack.c.bf16 %v676_v0, %v675_v58  ;;  %v1167_v7 = vpack.c.bf16 %v708_v1, %v707_v59  ;;  %v678_v8 = vmax.f32 %v553_v2, 0.0  ;;  %v710_v9 = vmax.f32 %v633_v3, 0.0 }
 0x11b   : > { %921 = vst [vmem:[%s1396_s18 + $0x50] sm:$0xff] %v1151_v6  ;;  %937 = vst [vmem:[%s1396_s18 + $0xd0] sm:$0xff] %v1167_v7  ;;  %v1152_v10 = vpack.c.bf16 %v678_v8, %v677_v4  ;;  %v1168_v11 = vpack.c.bf16 %v710_v9, %v709_v5  ;;  %v556_v12 = vpop.f32.mrb[24].mxu0  ;;  %v636_v13 = vpop.f32.mrb[24].mxu1 }
 0x11c   : > { %v557_v14 = vadd.f32 %v556_v12, %v1380_v30  ;;  %v637_v15 = vadd.f32 %v636_v13, %v1380_v30  ;;  %v558_v16 = vpop.f32.mrb[25].mxu0  ;;  %v638_v17 = vpop.f32.mrb[25].mxu1 }
 0x11d   : > { %922 = vst [vmem:[%s1396_s18 + $0x58] sm:$0xff] %v1152_v10  ;;  %938 = vst [vmem:[%s1396_s18 + $0xd8] sm:$0xff] %v1168_v11  ;;  %v559_v18 = vadd.f32 %v558_v16, %v1382_v31  ;;  %v639_v19 = vadd.f32 %v638_v17, %v1382_v31  ;;  %v560_v20 = vpop.f32.mrb[26].mxu0  ;;  %v640_v21 = vpop.f32.mrb[26].mxu1 }
 0x11e   : > { %v679_v22 = vmax.f32 %v557_v14, 0.0  ;;  %v711_v23 = vmax.f32 %v637_v15, 0.0  ;;  %v561_v24 = vadd.f32 %v560_v20, %v1380_v30  ;;  %v641_v25 = vadd.f32 %v640_v21, %v1380_v30  ;;  %v562_v26 = vpop.f32.mrb[27].mxu0  ;;  %v642_v27 = vpop.f32.mrb[27].mxu1 }
 0x11f   : > { %v680_v28 = vmax.f32 %v559_v18, 0.0  ;;  %v712_v29 = vmax.f32 %v639_v19, 0.0  ;;  %v563_v32 = vadd.f32 %v562_v26, %v1382_v31  ;;  %v643_v33 = vadd.f32 %v642_v27, %v1382_v31 }
 0x120   : > { %v681_v34 = vmax.f32 %v561_v24, 0.0  ;;  %v713_v35 = vmax.f32 %v641_v25, 0.0 }
 0x121   : > { %v1153_v36 = vpack.c.bf16 %v680_v28, %v679_v22  ;;  %v1169_v37 = vpack.c.bf16 %v712_v29, %v711_v23  ;;  %v682_v38 = vmax.f32 %v563_v32, 0.0  ;;  %v714_v39 = vmax.f32 %v643_v33, 0.0 }
 0x123   : > { %923 = vst [vmem:[%s1396_s18 + $0x60] sm:$0xff] %v1153_v36  ;;  %939 = vst [vmem:[%s1396_s18 + $0xe0] sm:$0xff] %v1169_v37  ;;  %v1154_v40 = vpack.c.bf16 %v682_v38, %v681_v34  ;;  %v1170_v41 = vpack.c.bf16 %v714_v39, %v713_v35  ;;  %v566_v42 = vpop.f32.mrb[28].mxu0  ;;  %v646_v43 = vpop.f32.mrb[28].mxu1 }
 0x124   : > { %v567_v44 = vadd.f32 %v566_v42, %v1380_v30  ;;  %v647_v45 = vadd.f32 %v646_v43, %v1380_v30  ;;  %v568_v46 = vpop.f32.mrb[29].mxu0  ;;  %v648_v47 = vpop.f32.mrb[29].mxu1 }
 0x125   : > { %924 = vst [vmem:[%s1396_s18 + $0x68] sm:$0xff] %v1154_v40  ;;  %940 = vst [vmem:[%s1396_s18 + $0xe8] sm:$0xff] %v1170_v41  ;;  %v569_v48 = vadd.f32 %v568_v46, %v1382_v31  ;;  %v649_v49 = vadd.f32 %v648_v47, %v1382_v31  ;;  %v570_v50 = vpop.f32.mrb[30].mxu0  ;;  %v650_v51 = vpop.f32.mrb[30].mxu1 }
 0x126   : > { %v683_v52 = vmax.f32 %v567_v44, 0.0  ;;  %v715_v53 = vmax.f32 %v647_v45, 0.0  ;;  %v571_v54 = vadd.f32 %v570_v50, %v1380_v30  ;;  %v651_v55 = vadd.f32 %v650_v51, %v1380_v30  ;;  %v572_v56 = vpop.f32.mrb[31].mxu0  ;;  %v652_v57 = vpop.f32.mrb[31].mxu1 }
 0x127   : > { %v684_v58 = vmax.f32 %v569_v48, 0.0  ;;  %v716_v59 = vmax.f32 %v649_v49, 0.0  ;;  %v573_v60 = vadd.f32 %v572_v56, %v1382_v31  ;;  %v653_v61 = vadd.f32 %v652_v57, %v1382_v31 }
 0x128   : > { %v685_v62 = vmax.f32 %v571_v54, 0.0  ;;  %v717_v63 = vmax.f32 %v651_v55, 0.0 }
 0x129   : > { %v1155_v0 = vpack.c.bf16 %v684_v58, %v683_v52  ;;  %v1171_v1 = vpack.c.bf16 %v716_v59, %v715_v53  ;;  %v686_v2 = vmax.f32 %v573_v60, 0.0  ;;  %v718_v3 = vmax.f32 %v653_v61, 0.0 }
 0x12b   : > { %925 = vst [vmem:[%s1396_s18 + $0x70] sm:$0xff] %v1155_v0  ;;  %941 = vst [vmem:[%s1396_s18 + $0xf0] sm:$0xff] %v1171_v1  ;;  %v1156_v4 = vpack.c.bf16 %v686_v2, %v685_v62  ;;  %v1172_v30 = vpack.c.bf16 %v718_v3, %v717_v63 }
 0x12d   : > { %926 = vst [vmem:[%s1396_s18 + $0x78] sm:$0xff] %v1156_v4  ;;  %942 = vst [vmem:[%s1396_s18 + $0xf8] sm:$0xff] %v1172_v30 }
 0x12e PF: > { %s13_s14 = sadd.s32 1, %s1256_s14   ;;  %s1499_s12 = smov %s1252_s13 }
 0x12f   : > { %p10_p5 = scmp.ge.s32.totalorder %s13_s14, 4   ;;  %s1500_s13 = smov %s1502_s15 }
 0x131   :  { %12 = sbr.rel (!%p10_p5) target bundleno = 2 (0x2), region = 68 }

// kernel: resnet50_forward.10
= control target key start
LH: loop header
LB: loop body
LE: loop exit
PB: predicated region body
PF: predicated region fallthrough
CT: control target
= control target key end

     0   :  { %s1442_s12 = smov 0   ;;  %s1444_s13 = smov 0   ;;  %s1742_s0 = inlined_call_operand.vmem [shape: bf16[128,256], index: 0, kind: input, shape index: {}]   ;;  %s1743_s1 = inlined_call_operand.vmem [shape: bf16[256,512], index: 1, kind: input, shape index: {}]   ;;  %s1744_s2 = inlined_call_operand.vmem [shape: f32[1,512], index: 2, kind: input, shape index: {}]   ;;  %s1745_s3 = inlined_call_operand.vmem [shape: bf16[128,512], index: 3, kind: output, shape index: {}]  }
   0x1   :  { %s1446_s14 = smov 0   ;;  %s1448_s15 = smov 0  }
   0x2   :  { %s1450_s16 = smov 0  }
   0x3 LB: > { %s22_s17 = sadd.s32 1, %s1416_s15  ;;  %s1139_s18 = sadd.s32 4294967295, %s1420_s16   ;;  %s1420_s16 = sphi %s1450_s16, %s13_s16   ;;  %s1416_s15 = sphi %s1448_s15, %s1750_s15   ;;  %s1412_s14 = sphi %s1446_s14, %s1749_s14   ;;  %s1408_s13 = sphi %s1444_s13, %s1748_s13   ;;  %s1404_s12 = sphi %s1442_s12, %s1747_s12  }
   0x4   : > { %p23_p0 = scmp.ge.s32.totalorder %s22_s17, 2  ;;  %p65_p1 = scmp.ne.s32.totalorder %s1408_s13, %s1404_s12 }
   0x5   : > { %p66_p2 = scmp.eq.s32.totalorder %s1420_s16, 0  ;;  %p123_p4 = scmp.eq.s32.totalorder %s1139_s18, 1 }
   0x6   : > { %s1752_s17 = smov (%p23_p0, %s22_s17), 0  ;;  %s58_s20 = sadd.s32 1, %s1408_s13 }
   0x7   : > { %p67_p3 = por %p66_p2, %p65_p1  ;;  %s55_s19 = ssub.s32 %s1416_s15, %s1752_s17 }
   0x8   : > { %p56_p5 = scmp.eq.s32.totalorder %s55_s19, 0  ;;  %p1477_p6 = por %p123_p4, %p65_p1 }
   0x9   : > { %p1143_p7 = scmp.ge.s32.totalorder %s1420_s16, 2 }
   0xa   : > { %s1482_s22 = scalar_select %p56_p5, %s1408_s13, %s58_s20  }
   0xb   : > { %155 = sbr.rel (%p1143_p7) target bundleno = 38 (0x26), region = 20 }
  0x12   : > { %158 = sbr.rel (!%p67_p3) target bundleno = 38 (0x26), region = 24  ;;  %s160_s23 = sand.u32 (%p67_p3), 1, %s1408_s13  }
  0x13   : > { %s1220_s24 = sshll.u32 (%p67_p3), %s1416_s15, 3  ;;  %s1144_s25 = sshll.u32 (%p67_p3), %s160_s23, 8 }
  0x14   : > { %s1490_s28 = scalar_lea.vmem (%p67_p3), %s1743_s1, %s1220_s24  ;;  %s1495_s29 = scalar_lea.vmem (%p67_p3), [#allocation2], %s1144_s25 }
  0x15   : > { %v255_v0 = vld [vmem:[%s1490_s28] sm:$0xff] (%p67_p3)  ;;  %v257_v1 = vld [vmem:[%s1490_s28 + $0x10] sm:$0xff] (%p67_p3) }
  0x16   : > { %v259_v2 = vld [vmem:[%s1490_s28 + $0x20] sm:$0xff] (%p67_p3)  ;;  %256 = vst [vmem:[%s1495_s29] sm:$0xff] (%p67_p3), %v255_v0  ;;  %258 = vst [vmem:[%s1495_s29 + $0x8] sm:$0xff] (%p67_p3), %v257_v1  ;;  %v261_v3 = vld [vmem:[%s1490_s28 + $0x30] sm:$0xff] (%p67_p3) }
  0x17   : > { %260 = vst [vmem:[%s1495_s29 + $0x10] sm:$0xff] (%p67_p3), %v259_v2  ;;  %v263_v4 = vld [vmem:[%s1490_s28 + $0x40] sm:$0xff] (%p67_p3)  ;;  %v265_v5 = vld [vmem:[%s1490_s28 + $0x50] sm:$0xff] (%p67_p3)  ;;  %262 = vst [vmem:[%s1495_s29 + $0x18] sm:$0xff] (%p67_p3), %v261_v3 }
  0x18   : > { %264 = vst [vmem:[%s1495_s29 + $0x20] sm:$0xff] (%p67_p3), %v263_v4  ;;  %266 = vst [vmem:[%s1495_s29 + $0x28] sm:$0xff] (%p67_p3), %v265_v5  ;;  %v267_v6 = vld [vmem:[%s1490_s28 + $0x60] sm:$0xff] (%p67_p3)  ;;  %v269_v7 = vld [vmem:[%s1490_s28 + $0x70] sm:$0xff] (%p67_p3) }
  0x19   : > { %v271_v8 = vld [vmem:[%s1490_s28 + $0x80] sm:$0xff]  ;;  %268 = vst [vmem:[%s1495_s29 + $0x30] sm:$0xff] %v267_v6  ;;  %270 = vst [vmem:[%s1495_s29 + $0x38] sm:$0xff] %v269_v7  ;;  %v273_v9 = vld [vmem:[%s1490_s28 + $0x90] sm:$0xff] }
  0x1a   : > { %272 = vst [vmem:[%s1495_s29 + $0x40] sm:$0xff] %v271_v8  ;;  %v275_v10 = vld [vmem:[%s1490_s28 + $0xa0] sm:$0xff]  ;;  %v277_v11 = vld [vmem:[%s1490_s28 + $0xb0] sm:$0xff]  ;;  %274 = vst [vmem:[%s1495_s29 + $0x48] sm:$0xff] %v273_v9 }
  0x1b   : > { %276 = vst [vmem:[%s1495_s29 + $0x50] sm:$0xff] %v275_v10  ;;  %278 = vst [vmem:[%s1495_s29 + $0x58] sm:$0xff] %v277_v11  ;;  %v279_v12 = vld [vmem:[%s1490_s28 + $0xc0] sm:$0xff]  ;;  %v281_v13 = vld [vmem:[%s1490_s28 + $0xd0] sm:$0xff] }
  0x1c   : > { %v283_v14 = vld [vmem:[%s1490_s28 + $0xe0] sm:$0xff]  ;;  %280 = vst [vmem:[%s1495_s29 + $0x60] sm:$0xff] %v279_v12  ;;  %282 = vst [vmem:[%s1495_s29 + $0x68] sm:$0xff] %v281_v13  ;;  %v285_v15 = vld [vmem:[%s1490_s28 + $0xf0] sm:$0xff] }
  0x1d   : > { %284 = vst [vmem:[%s1495_s29 + $0x70] sm:$0xff] %v283_v14  ;;  %v287_v16 = vld [vmem:[%s1490_s28 + $0x100] sm:$0xff]  ;;  %v289_v17 = vld [vmem:[%s1490_s28 + $0x110] sm:$0xff]  ;;  %286 = vst [vmem:[%s1495_s29 + $0x78] sm:$0xff] %v285_v15 }
  0x1e   : > { %288 = vst [vmem:[%s1495_s29 + $0x80] sm:$0xff] %v287_v16  ;;  %290 = vst [vmem:[%s1495_s29 + $0x88] sm:$0xff] %v289_v17  ;;  %v291_v18 = vld [vmem:[%s1490_s28 + $0x120] sm:$0xff]  ;;  %v293_v19 = vld [vmem:[%s1490_s28 + $0x130] sm:$0xff] }
  0x1f   : > { %v295_v20 = vld [vmem:[%s1490_s28 + $0x140] sm:$0xff]  ;;  %292 = vst [vmem:[%s1495_s29 + $0x90] sm:$0xff] %v291_v18  ;;  %294 = vst [vmem:[%s1495_s29 + $0x98] sm:$0xff] %v293_v19  ;;  %v297_v21 = vld [vmem:[%s1490_s28 + $0x150] sm:$0xff] }
  0x20   : > { %296 = vst [vmem:[%s1495_s29 + $0xa0] sm:$0xff] %v295_v20  ;;  %v299_v22 = vld [vmem:[%s1490_s28 + $0x160] sm:$0xff]  ;;  %v301_v23 = vld [vmem:[%s1490_s28 + $0x170] sm:$0xff]  ;;  %298 = vst [vmem:[%s1495_s29 + $0xa8] sm:$0xff] %v297_v21 }
  0x21   : > { %300 = vst [vmem:[%s1495_s29 + $0xb0] sm:$0xff] %v299_v22  ;;  %302 = vst [vmem:[%s1495_s29 + $0xb8] sm:$0xff] %v301_v23  ;;  %v303_v24 = vld [vmem:[%s1490_s28 + $0x180] sm:$0xff]  ;;  %v305_v25 = vld [vmem:[%s1490_s28 + $0x190] sm:$0xff] }
  0x22   : > { %v307_v26 = vld [vmem:[%s1490_s28 + $0x1a0] sm:$0xff]  ;;  %304 = vst [vmem:[%s1495_s29 + $0xc0] sm:$0xff] %v303_v24  ;;  %306 = vst [vmem:[%s1495_s29 + $0xc8] sm:$0xff] %v305_v25  ;;  %v309_v27 = vld [vmem:[%s1490_s28 + $0x1b0] sm:$0xff] }
  0x23   : > { %308 = vst [vmem:[%s1495_s29 + $0xd0] sm:$0xff] %v307_v26  ;;  %v311_v28 = vld [vmem:[%s1490_s28 + $0x1c0] sm:$0xff]  ;;  %v313_v29 = vld [vmem:[%s1490_s28 + $0x1d0] sm:$0xff]  ;;  %310 = vst [vmem:[%s1495_s29 + $0xd8] sm:$0xff] %v309_v27 }
  0x24   : > { %312 = vst [vmem:[%s1495_s29 + $0xe0] sm:$0xff] %v311_v28  ;;  %314 = vst [vmem:[%s1495_s29 + $0xe8] sm:$0xff] %v313_v29  ;;  %v315_v30 = vld [vmem:[%s1490_s28 + $0x1e0] sm:$0xff]  ;;  %v317_v31 = vld [vmem:[%s1490_s28 + $0x1f0] sm:$0xff] }
  0x25   : > { %316 = vst [vmem:[%s1495_s29 + $0xf0] sm:$0xff] %v315_v30  ;;  %318 = vst [vmem:[%s1495_s29 + $0xf8] sm:$0xff] %v317_v31 }
  0x26 PF: > { %p1147_p8 = scmp.ge.s32.totalorder %s1420_s16, 1  ;;  %p331_p9 = scmp.lt.s32.totalorder %s1420_s16, 3 }
  0x28   : > { %p332_p10 = pnand %p1147_p8, %p331_p9 }
  0x29   : > { %s338_s30 = sand.u32 (!%p332_p10), 1, %s1404_s12   ;;  %v1360_v32 = vld [vmem:[%s1742_s0 + $0x4] ss:$8 sps:$4 sm:$0xff] (!%p332_p10)   ;;  %v1358_v2 = vld [vmem:[%s1742_s0] ss:$8 sps:$4 sm:$0xff] (!%p332_p10)   ;;  %s1150_s28 = sshll.u32 (!%p332_p10), %s1412_s14, 1  ;;  %v435_v16 = vlaneseq (!%p332_p10) }
  0x2a   : > { %335 = sbr.rel (%p332_p10) target bundleno = 364 (0x16c), region = 66  ;;  %s1148_s4 = sshll.u32 (!%p332_p10), %s338_s30, 8  ;;  %v1363_v33 = vld [vmem:[%s1742_s0 + $0x44] ss:$8 sps:$4 sm:$0xff] (!%p332_p10)   ;;  %717 = vmatprep.mubr.bf16.mxu0 (!%p332_p10), %v1360_v32  ;;  %v1361_v3 = vld [vmem:[%s1742_s0 + $0x40] ss:$8 sps:$4 sm:$0xff] (!%p332_p10)  }
  0x2b   : > { %s1569_s9 = scalar_lea.vmem (!%p332_p10), [#allocation2], %s1148_s4  ;;  %757 = vmatprep.mubr.bf16.mxu1 (!%p332_p10), %v1363_v33  ;;  %v1364_v4 = vld [vmem:[%s1742_s0 + $0x14] ss:$8 sps:$4 sm:$0xff] (!%p332_p10)   ;;  %v1368_v6 = vld [vmem:[%s1742_s0 + $0x10] ss:$8 sps:$4 sm:$0xff] (!%p332_p10)   ;;  %p379_p11 = scmp.lt.s32.totalorder (!%p332_p10), %s1150_s28, 3 }
  0x2c   : > { %v1310_v34 = vld [vmem:[%s1569_s9 + $0x4] ss:$8 sps:$4 sm:$0xff] (!%p332_p10)   ;;  %v1312_v35 = vld [vmem:[%s1569_s9] ss:$8 sps:$4 sm:$0xff] (!%p332_p10)   ;;  %v1313_v36 = vld [vmem:[%s1569_s9 + $0x14] ss:$8 sps:$4 sm:$0xff] (!%p332_p10)  }
  0x2d   : > { %685 = vmatprep.subr.bf16.mxu0 (!%p332_p10), %v1310_v34  ;;  %1238 = vmatprep.subr.bf16.mxu1 (!%p332_p10), %v1310_v34  ;;  %v1315_v37 = vld [vmem:[%s1569_s9 + $0x10] ss:$8 sps:$4 sm:$0xff] (!%p332_p10)   ;;  %v1316_v38 = vld [vmem:[%s1569_s9 + $0x24] ss:$8 sps:$4 sm:$0xff] (!%p332_p10)   ;;  %v1318_v39 = vld [vmem:[%s1569_s9 + $0x20] ss:$8 sps:$4 sm:$0xff] (!%p332_p10)  }
  0x2e   : > { %686 = vmatpush1.bf16.msra.mxu0 (!%p332_p10), %v1312_v35  ;;  %1254 = vmatpush1.bf16.msra.mxu1 (!%p332_p10), %v1312_v35  ;;  %v1319_v40 = vld [vmem:[%s1569_s9 + $0x34] ss:$8 sps:$4 sm:$0xff] (!%p332_p10)   ;;  %v1321_v41 = vld [vmem:[%s1569_s9 + $0x30] ss:$8 sps:$4 sm:$0xff] (!%p332_p10)   ;;  %v1322_v42 = vld [vmem:[%s1569_s9 + $0x44] ss:$8 sps:$4 sm:$0xff] (!%p332_p10)  }
  0x2f   : > { %687 = vmatprep.subr.bf16.mxu0 (!%p332_p10), %v1313_v36  ;;  %1239 = vmatprep.subr.bf16.mxu1 (!%p332_p10), %v1313_v36  ;;  %v1324_v43 = vld [vmem:[%s1569_s9 + $0x40] ss:$8 sps:$4 sm:$0xff] (!%p332_p10)   ;;  %v1325_v44 = vld [vmem:[%s1569_s9 + $0x54] ss:$8 sps:$4 sm:$0xff] (!%p332_p10)   ;;  %v1327_v45 = vld [vmem:[%s1569_s9 + $0x50] ss:$8 sps:$4 sm:$0xff] (!%p332_p10)  }
  0x30   : > { %v1328_v46 = vld [vmem:[%s1569_s9 + $0x64] ss:$8 sps:$4 sm:$0xff] (!%p332_p10)   ;;  %v1330_v47 = vld [vmem:[%s1569_s9 + $0x60] ss:$8 sps:$4 sm:$0xff] (!%p332_p10)   ;;  %v1331_v48 = vld [vmem:[%s1569_s9 + $0x74] ss:$8 sps:$4 sm:$0xff] (!%p332_p10)  }
  0x31   : > { %v1333_v49 = vld [vmem:[%s1569_s9 + $0x70] ss:$8 sps:$4 sm:$0xff]   ;;  %v1334_v50 = vld [vmem:[%s1569_s9 + $0x84] ss:$8 sps:$4 sm:$0xff]   ;;  %v1336_v51 = vld [vmem:[%s1569_s9 + $0x80] ss:$8 sps:$4 sm:$0xff]  }
  0x32   : > { %688 = vmatpush1.bf16.msra.mxu0 %v1315_v37  ;;  %1255 = vmatpush1.bf16.msra.mxu1 %v1315_v37  ;;  %v1337_v52 = vld [vmem:[%s1569_s9 + $0x94] ss:$8 sps:$4 sm:$0xff]   ;;  %v1339_v53 = vld [vmem:[%s1569_s9 + $0x90] ss:$8 sps:$4 sm:$0xff]   ;;  %v1340_v54 = vld [vmem:[%s1569_s9 + $0xa4] ss:$8 sps:$4 sm:$0xff]  }
  0x33   : > { %689 = vmatprep.subr.bf16.mxu0 %v1316_v38  ;;  %1240 = vmatprep.subr.bf16.mxu1 %v1316_v38  ;;  %v1342_v55 = vld [vmem:[%s1569_s9 + $0xa0] ss:$8 sps:$4 sm:$0xff]   ;;  %v1343_v56 = vld [vmem:[%s1569_s9 + $0xb4] ss:$8 sps:$4 sm:$0xff]   ;;  %v1345_v57 = vld [vmem:[%s1569_s9 + $0xb0] ss:$8 sps:$4 sm:$0xff]  }
  0x34   : > { %v1346_v58 = vld [vmem:[%s1569_s9 + $0xc4] ss:$8 sps:$4 sm:$0xff]   ;;  %v1348_v59 = vld [vmem:[%s1569_s9 + $0xc0] ss:$8 sps:$4 sm:$0xff]   ;;  %v1349_v60 = vld [vmem:[%s1569_s9 + $0xd4] ss:$8 sps:$4 sm:$0xff]  }
  0x35   : > { %v1351_v61 = vld [vmem:[%s1569_s9 + $0xd0] ss:$8 sps:$4 sm:$0xff]   ;;  %v1352_v62 = vld [vmem:[%s1569_s9 + $0xe4] ss:$8 sps:$4 sm:$0xff]   ;;  %v1354_v63 = vld [vmem:[%s1569_s9 + $0xe0] ss:$8 sps:$4 sm:$0xff]  }
  0x36   : > { %690 = vmatpush1.bf16.msra.mxu0 %v1318_v39  ;;  %1256 = vmatpush1.bf16.msra.mxu1 %v1318_v39  ;;  %v1355_v0 = vld [vmem:[%s1569_s9 + $0xf4] ss:$8 sps:$4 sm:$0xff]   ;;  %v1357_v1 = vld [vmem:[%s1569_s9 + $0xf0] ss:$8 sps:$4 sm:$0xff]   ;;  %v1370_v8 = vld [vmem:[%s1742_s0 + $0x24] ss:$8 sps:$4 sm:$0xff]  }
  0x37   : > { %691 = vmatprep.subr.bf16.mxu0 %v1319_v40  ;;  %1241 = vmatprep.subr.bf16.mxu1 %v1319_v40  ;;  %v1366_v5 = vld [vmem:[%s1742_s0 + $0x54] ss:$8 sps:$4 sm:$0xff]   ;;  %v1369_v7 = vld [vmem:[%s1742_s0 + $0x50] ss:$8 sps:$4 sm:$0xff]   ;;  %v1372_v9 = vld [vmem:[%s1742_s0 + $0x64] ss:$8 sps:$4 sm:$0xff]  }
  0x38   : > { %v1374_v10 = vld [vmem:[%s1742_s0 + $0x20] ss:$8 sps:$4 sm:$0xff]   ;;  %v1376_v12 = vld [vmem:[%s1742_s0 + $0x34] ss:$8 sps:$4 sm:$0xff]   ;;  %v1380_v14 = vld [vmem:[%s1742_s0 + $0x30] ss:$8 sps:$4 sm:$0xff]  }
  0x39   : > { %v1375_v11 = vld [vmem:[%s1742_s0 + $0x60] ss:$8 sps:$4 sm:$0xff]   ;;  %v1378_v13 = vld [vmem:[%s1742_s0 + $0x74] ss:$8 sps:$4 sm:$0xff]   ;;  %v1381_v15 = vld [vmem:[%s1742_s0 + $0x70] ss:$8 sps:$4 sm:$0xff]  }
  0x3a   : > { %692 = vmatpush1.bf16.msra.mxu0 %v1321_v41  ;;  %1257 = vmatpush1.bf16.msra.mxu1 %v1321_v41  ;;  %s1754_s28 = smov (!%p379_p11, %s1150_s28), 3  ;;  %v436_v17 = vshrl.u32 %v435_v16, 7  ;;  %s1149_s6 = sshll.u32 %s338_s30, 7 }
  0x3b   : > { %693 = vmatprep.subr.bf16.mxu0 %v1322_v42  ;;  %1242 = vmatprep.subr.bf16.mxu1 %v1322_v42  ;;  %s381_s5 = scalar_lea.vmem %s1744_s2, %s1754_s28  ;;  %s1663_s12 = scalar_lea.vmem [#allocation3], %s1149_s6 }
  0x3c   : > { %v437_v18 = vsub.s32 0, %v436_v17  ;;  %v433_v19 = vld [vmem:[%s381_s5] sm:$0x3]  ;;  %v441_v20 = vsub.s32 1, %v436_v17  ;;  %s1237_s30 = sshll.u32 (%p1477_p6), %s1412_s14, 3 }
  0x3d   : > { %s954_s9 = scalar_lea.vmem (%p1477_p6), %s1745_s3, %s1237_s30 }
  0x3e   : > { %694 = vmatpush1.bf16.msra.mxu0 %v1324_v43  ;;  %1258 = vmatpush1.bf16.msra.mxu1 %v1324_v43  ;;  %v1649_v21 = vrot.slane %v433_v19, %v437_v18  ;;  %v1651_v22 = vrot.slane %v433_v19, %v441_v20 }
  0x3f   : > { %695 = vmatprep.subr.bf16.mxu0 %v1325_v44  ;;  %1243 = vmatprep.subr.bf16.mxu1 %v1325_v44 }
  0x42   : > { %696 = vmatpush1.bf16.msra.mxu0 %v1327_v45  ;;  %1259 = vmatpush1.bf16.msra.mxu1 %v1327_v45 }
  0x43   : > { %697 = vmatprep.subr.bf16.mxu0 %v1328_v46  ;;  %1244 = vmatprep.subr.bf16.mxu1 %v1328_v46 }
  0x46   : > { %698 = vmatpush1.bf16.msra.mxu0 %v1330_v47  ;;  %1260 = vmatpush1.bf16.msra.mxu1 %v1330_v47 }
  0x47   : > { %699 = vmatprep.subr.bf16.mxu0 %v1331_v48  ;;  %1245 = vmatprep.subr.bf16.mxu1 %v1331_v48 }
  0x4a   : > { %700 = vmatpush1.bf16.msra.mxu0 %v1333_v49  ;;  %1261 = vmatpush1.bf16.msra.mxu1 %v1333_v49 }
  0x4b   : > { %701 = vmatprep.subr.bf16.mxu0 %v1334_v50  ;;  %1246 = vmatprep.subr.bf16.mxu1 %v1334_v50 }
  0x4e   : > { %702 = vmatpush1.bf16.msra.mxu0 %v1336_v51  ;;  %1262 = vmatpush1.bf16.msra.mxu1 %v1336_v51 }
  0x4f   : > { %703 = vmatprep.subr.bf16.mxu0 %v1337_v52  ;;  %1247 = vmatprep.subr.bf16.mxu1 %v1337_v52 }
  0x52   : > { %704 = vmatpush1.bf16.msra.mxu0 %v1339_v53  ;;  %1263 = vmatpush1.bf16.msra.mxu1 %v1339_v53 }
  0x53   : > { %705 = vmatprep.subr.bf16.mxu0 %v1340_v54  ;;  %1248 = vmatprep.subr.bf16.mxu1 %v1340_v54 }
  0x56   : > { %706 = vmatpush1.bf16.msra.mxu0 %v1342_v55  ;;  %1264 = vmatpush1.bf16.msra.mxu1 %v1342_v55 }
  0x57   : > { %707 = vmatprep.subr.bf16.mxu0 %v1343_v56  ;;  %1249 = vmatprep.subr.bf16.mxu1 %v1343_v56 }
  0x5a   : > { %708 = vmatpush1.bf16.msra.mxu0 %v1345_v57  ;;  %1265 = vmatpush1.bf16.msra.mxu1 %v1345_v57 }
  0x5b   : > { %709 = vmatprep.subr.bf16.mxu0 %v1346_v58  ;;  %1250 = vmatprep.subr.bf16.mxu1 %v1346_v58 }
  0x5e   : > { %710 = vmatpush1.bf16.msra.mxu0 %v1348_v59  ;;  %1266 = vmatpush1.bf16.msra.mxu1 %v1348_v59 }
  0x5f   : > { %711 = vmatprep.subr.bf16.mxu0 %v1349_v60  ;;  %1251 = vmatprep.subr.bf16.mxu1 %v1349_v60 }
  0x62   : > { %712 = vmatpush1.bf16.msra.mxu0 %v1351_v61  ;;  %1267 = vmatpush1.bf16.msra.mxu1 %v1351_v61 }
  0x63   : > { %713 = vmatprep.subr.bf16.mxu0 %v1352_v62  ;;  %1252 = vmatprep.subr.bf16.mxu1 %v1352_v62 }
  0x66   : > { %714 = vmatpush1.bf16.msra.mxu0 %v1354_v63  ;;  %1268 = vmatpush1.bf16.msra.mxu1 %v1354_v63 }
  0x67   : > { %715 = vmatprep.subr.bf16.mxu0 %v1355_v0  ;;  %1253 = vmatprep.subr.bf16.mxu1 %v1355_v0 }
  0x6a   : > { %716 = vmatpush1.bf16.msra.mxu0 %v1357_v1  ;;  %1269 = vmatpush1.bf16.msra.mxu1 %v1357_v1 }
  0x6d   : > { %718 = vmatmul.mubr.bf16.vlgmr.msra.gmra.mrb[0].mxu0 %v1358_v2  ;;  %758 = vmatmul.mubr.bf16.vlgmr.msra.gmra.mrb[0].mxu1 %v1361_v3 }
  0x6e   : > { %727 = vmatprep.mubr.bf16.mxu0 %v1364_v4  ;;  %767 = vmatprep.mubr.bf16.mxu1 %v1366_v5 }
  0x75   : > { %728 = vmatmul.mubr.bf16.gmra.mrb[4].mxu0 %v1368_v6  ;;  %768 = vmatmul.mubr.bf16.gmra.mrb[4].mxu1 %v1369_v7 }
  0x76   : > { %737 = vmatprep.mubr.bf16.mxu0 %v1370_v8  ;;  %777 = vmatprep.mubr.bf16.mxu1 %v1372_v9 }
  0x7d   : > { %738 = vmatmul.mubr.bf16.gmra.mrb[8].mxu0 %v1374_v10  ;;  %778 = vmatmul.mubr.bf16.gmra.mrb[8].mxu1 %v1375_v11 }
  0x7e   : > { %747 = vmatprep.mubr.bf16.mxu0 %v1376_v12  ;;  %787 = vmatprep.mubr.bf16.mxu1 %v1378_v13 }
  0x85   : > { %748 = vmatmul.mubr.bf16.gmra.mrb[12].mxu0 %v1380_v14  ;;  %788 = vmatmul.mubr.bf16.gmra.mrb[12].mxu1 %v1381_v15 }
 0x140   : > { %v719_v23 = vpop.f32.mrb[0].mxu0  ;;  %v759_v24 = vpop.f32.mrb[0].mxu1 }
 0x141   : > { %v720_v25 = vadd.f32 %v719_v23, %v1649_v21  ;;  %v760_v26 = vadd.f32 %v759_v24, %v1649_v21  ;;  %v721_v27 = vpop.f32.mrb[1].mxu0  ;;  %v761_v28 = vpop.f32.mrb[1].mxu1 }
 0x142   : > { %v722_v29 = vadd.f32 %v721_v27, %v1651_v22  ;;  %v762_v30 = vadd.f32 %v761_v28, %v1651_v22  ;;  %v723_v31 = vpop.f32.mrb[2].mxu0  ;;  %v763_v32 = vpop.f32.mrb[2].mxu1 }
 0x143   : > { %v798_v33 = vmax.f32 %v720_v25, 0.0  ;;  %v814_v34 = vmax.f32 %v760_v26, 0.0  ;;  %v724_v35 = vadd.f32 %v723_v31, %v1649_v21  ;;  %v764_v36 = vadd.f32 %v763_v32, %v1649_v21  ;;  %v725_v37 = vpop.f32.mrb[3].mxu0  ;;  %v765_v38 = vpop.f32.mrb[3].mxu1 }
 0x144   : > { %v799_v39 = vmax.f32 %v722_v29, 0.0  ;;  %v815_v40 = vmax.f32 %v762_v30, 0.0  ;;  %v726_v41 = vadd.f32 %v725_v37, %v1651_v22  ;;  %v766_v42 = vadd.f32 %v765_v38, %v1651_v22 }
 0x145   : > { %v800_v43 = vmax.f32 %v724_v35, 0.0  ;;  %v816_v44 = vmax.f32 %v764_v36, 0.0 }
 0x146   : > { %v1221_v45 = vpack.c.bf16 %v799_v39, %v798_v33  ;;  %v1229_v46 = vpack.c.bf16 %v815_v40, %v814_v34  ;;  %v801_v47 = vmax.f32 %v726_v41, 0.0  ;;  %v817_v48 = vmax.f32 %v766_v42, 0.0 }
 0x148   : > { %926 = vst [vmem:[%s1663_s12] sm:$0xff] %v1221_v45  ;;  %934 = vst [vmem:[%s1663_s12 + $0x40] sm:$0xff] %v1229_v46  ;;  %v1222_v49 = vpack.c.bf16 %v801_v47, %v800_v43  ;;  %v1230_v50 = vpack.c.bf16 %v817_v48, %v816_v44  ;;  %v729_v51 = vpop.f32.mrb[4].mxu0  ;;  %v769_v52 = vpop.f32.mrb[4].mxu1 }
 0x149   : > { %v730_v53 = vadd.f32 %v729_v51, %v1649_v21  ;;  %v770_v54 = vadd.f32 %v769_v52, %v1649_v21  ;;  %v731_v55 = vpop.f32.mrb[5].mxu0  ;;  %v771_v56 = vpop.f32.mrb[5].mxu1 }
 0x14a   : > { %927 = vst [vmem:[%s1663_s12 + $0x8] sm:$0xff] %v1222_v49  ;;  %935 = vst [vmem:[%s1663_s12 + $0x48] sm:$0xff] %v1230_v50  ;;  %v732_v57 = vadd.f32 %v731_v55, %v1651_v22  ;;  %v772_v58 = vadd.f32 %v771_v56, %v1651_v22  ;;  %v733_v59 = vpop.f32.mrb[6].mxu0  ;;  %v773_v60 = vpop.f32.mrb[6].mxu1 }
 0x14b   : > { %v802_v61 = vmax.f32 %v730_v53, 0.0  ;;  %v818_v62 = vmax.f32 %v770_v54, 0.0  ;;  %v734_v63 = vadd.f32 %v733_v59, %v1649_v21  ;;  %v774_v0 = vadd.f32 %v773_v60, %v1649_v21  ;;  %v735_v1 = vpop.f32.mrb[7].mxu0  ;;  %v775_v2 = vpop.f32.mrb[7].mxu1 }
 0x14c   : > { %v803_v3 = vmax.f32 %v732_v57, 0.0  ;;  %v819_v4 = vmax.f32 %v772_v58, 0.0  ;;  %v736_v5 = vadd.f32 %v735_v1, %v1651_v22  ;;  %v776_v6 = vadd.f32 %v775_v2, %v1651_v22 }
 0x14d   : > { %v804_v7 = vmax.f32 %v734_v63, 0.0  ;;  %v820_v8 = vmax.f32 %v774_v0, 0.0 }
 0x14e   : > { %v1223_v9 = vpack.c.bf16 %v803_v3, %v802_v61  ;;  %v1231_v10 = vpack.c.bf16 %v819_v4, %v818_v62  ;;  %v805_v11 = vmax.f32 %v736_v5, 0.0  ;;  %v821_v12 = vmax.f32 %v776_v6, 0.0 }
 0x150   : > { %928 = vst [vmem:[%s1663_s12 + $0x10] sm:$0xff] %v1223_v9  ;;  %936 = vst [vmem:[%s1663_s12 + $0x50] sm:$0xff] %v1231_v10  ;;  %v1224_v13 = vpack.c.bf16 %v805_v11, %v804_v7  ;;  %v1232_v14 = vpack.c.bf16 %v821_v12, %v820_v8  ;;  %v739_v15 = vpop.f32.mrb[8].mxu0  ;;  %v779_v16 = vpop.f32.mrb[8].mxu1 }
 0x151   : > { %v740_v17 = vadd.f32 %v739_v15, %v1649_v21  ;;  %v780_v18 = vadd.f32 %v779_v16, %v1649_v21  ;;  %v741_v19 = vpop.f32.mrb[9].mxu0  ;;  %v781_v20 = vpop.f32.mrb[9].mxu1  ;;  %v1014_v8 = vld [vmem:[%s1663_s12 + $0x8] sm:$0xff] (%p1477_p6)  ;;  %v1028_v15 = vld [vmem:[%s1663_s12 + $0x40] sm:$0xff] (%p1477_p6) }
 0x152   : > { %929 = vst [vmem:[%s1663_s12 + $0x18] sm:$0xff] %v1224_v13  ;;  %937 = vst [vmem:[%s1663_s12 + $0x58] sm:$0xff] %v1232_v14  ;;  %v742_v23 = vadd.f32 %v741_v19, %v1651_v22  ;;  %v782_v24 = vadd.f32 %v781_v20, %v1651_v22  ;;  %v743_v25 = vpop.f32.mrb[10].mxu0  ;;  %v783_v26 = vpop.f32.mrb[10].mxu1  ;;  %v1030_v16 = vld [vmem:[%s1663_s12 + $0x48] sm:$0xff] (%p1477_p6) }
 0x153   : > { %v806_v27 = vmax.f32 %v740_v17, 0.0  ;;  %v822_v28 = vmax.f32 %v780_v18, 0.0  ;;  %v744_v29 = vadd.f32 %v743_v25, %v1649_v21  ;;  %v784_v30 = vadd.f32 %v783_v26, %v1649_v21  ;;  %v745_v31 = vpop.f32.mrb[11].mxu0  ;;  %v785_v32 = vpop.f32.mrb[11].mxu1  ;;  %1015 = vst [vmem:[%s954_s9 + $0x10] sm:$0xff] (%p1477_p6), %v1014_v8  ;;  %1029 = vst [vmem:[%s954_s9 + $0x80] sm:$0xff] (%p1477_p6), %v1028_v15 }
 0x154   : > { %v807_v33 = vmax.f32 %v742_v23, 0.0  ;;  %v823_v34 = vmax.f32 %v782_v24, 0.0  ;;  %v746_v35 = vadd.f32 %v745_v31, %v1651_v22  ;;  %v786_v36 = vadd.f32 %v785_v32, %v1651_v22  ;;  %1031 = vst [vmem:[%s954_s9 + $0x90] sm:$0xff] (%p1477_p6), %v1030_v16 }
 0x155   : > { %v808_v37 = vmax.f32 %v744_v29, 0.0  ;;  %v824_v38 = vmax.f32 %v784_v30, 0.0 }
 0x156   : > { %v1225_v39 = vpack.c.bf16 %v807_v33, %v806_v27  ;;  %v1233_v40 = vpack.c.bf16 %v823_v34, %v822_v28  ;;  %v809_v41 = vmax.f32 %v746_v35, 0.0  ;;  %v825_v42 = vmax.f32 %v786_v36, 0.0 }
 0x157   : > { %v1016_v9 = vld [vmem:[%s1663_s12 + $0x10] sm:$0xff] (%p1477_p6) }
 0x158   : > { %930 = vst [vmem:[%s1663_s12 + $0x20] sm:$0xff] %v1225_v39  ;;  %938 = vst [vmem:[%s1663_s12 + $0x60] sm:$0xff] %v1233_v40  ;;  %v1226_v43 = vpack.c.bf16 %v809_v41, %v808_v37  ;;  %v1234_v44 = vpack.c.bf16 %v825_v42, %v824_v38  ;;  %v749_v45 = vpop.f32.mrb[12].mxu0  ;;  %v789_v46 = vpop.f32.mrb[12].mxu1  ;;  %v1032_v17 = vld [vmem:[%s1663_s12 + $0x50] sm:$0xff] (%p1477_p6) }
 0x159   : > { %v750_v47 = vadd.f32 %v749_v45, %v1649_v21  ;;  %v790_v48 = vadd.f32 %v789_v46, %v1649_v21  ;;  %v751_v49 = vpop.f32.mrb[13].mxu0  ;;  %v791_v50 = vpop.f32.mrb[13].mxu1  ;;  %v1018_v10 = vld [vmem:[%s1663_s12 + $0x18] sm:$0xff] (%p1477_p6)  ;;  %1017 = vst [vmem:[%s954_s9 + $0x20] sm:$0xff] (%p1477_p6), %v1016_v9  ;;  %1033 = vst [vmem:[%s954_s9 + $0xa0] sm:$0xff] (%p1477_p6), %v1032_v17 }
 0x15a   : > { %931 = vst [vmem:[%s1663_s12 + $0x28] sm:$0xff] %v1226_v43  ;;  %939 = vst [vmem:[%s1663_s12 + $0x68] sm:$0xff] %v1234_v44  ;;  %v752_v51 = vadd.f32 %v751_v49, %v1651_v22  ;;  %v792_v52 = vadd.f32 %v791_v50, %v1651_v22  ;;  %v753_v53 = vpop.f32.mrb[14].mxu0  ;;  %v793_v54 = vpop.f32.mrb[14].mxu1  ;;  %v1034_v18 = vld [vmem:[%s1663_s12 + $0x58] sm:$0xff] (%p1477_p6) }
 0x15b   : > { %v810_v55 = vmax.f32 %v750_v47, 0.0  ;;  %v826_v56 = vmax.f32 %v790_v48, 0.0  ;;  %v754_v57 = vadd.f32 %v753_v53, %v1649_v21  ;;  %v794_v58 = vadd.f32 %v793_v54, %v1649_v21  ;;  %v755_v59 = vpop.f32.mrb[15].mxu0  ;;  %v795_v60 = vpop.f32.mrb[15].mxu1  ;;  %1019 = vst [vmem:[%s954_s9 + $0x30] sm:$0xff] (%p1477_p6), %v1018_v10  ;;  %1035 = vst [vmem:[%s954_s9 + $0xb0] sm:$0xff] (%p1477_p6), %v1034_v18 }
 0x15c   : > { %v811_v61 = vmax.f32 %v752_v51, 0.0  ;;  %v827_v62 = vmax.f32 %v792_v52, 0.0  ;;  %v756_v63 = vadd.f32 %v755_v59, %v1651_v22  ;;  %v796_v0 = vadd.f32 %v795_v60, %v1651_v22  ;;  %948 = sbr.rel (!%p1477_p6) target bundleno = 364 (0x16c), region = 74  ;;  %v1012_v22 = vld [vmem:[%s1663_s12] sm:$0xff] (%p1477_p6) }
 0x15d   : > { %v812_v1 = vmax.f32 %v754_v57, 0.0  ;;  %v828_v2 = vmax.f32 %v794_v58, 0.0  ;;  %1013 = vst [vmem:[%s954_s9] sm:$0xff] (%p1477_p6), %v1012_v22 }
 0x15e   : > { %v1227_v3 = vpack.c.bf16 %v811_v61, %v810_v55  ;;  %v1235_v4 = vpack.c.bf16 %v827_v62, %v826_v56  ;;  %v813_v5 = vmax.f32 %v756_v63, 0.0  ;;  %v829_v6 = vmax.f32 %v796_v0, 0.0 }
 0x15f   : > { %v1020_v11 = vld [vmem:[%s1663_s12 + $0x20] sm:$0xff] (%p1477_p6) }
 0x160   : > { %932 = vst [vmem:[%s1663_s12 + $0x30] sm:$0xff] %v1227_v3  ;;  %940 = vst [vmem:[%s1663_s12 + $0x70] sm:$0xff] %v1235_v4  ;;  %v1228_v7 = vpack.c.bf16 %v813_v5, %v812_v1  ;;  %v1236_v21 = vpack.c.bf16 %v829_v6, %v828_v2  ;;  %v1036_v19 = vld [vmem:[%s1663_s12 + $0x60] sm:$0xff] (%p1477_p6) }
 0x161   : > { %v1022_v12 = vld [vmem:[%s1663_s12 + $0x28] sm:$0xff] (%p1477_p6)  ;;  %1021 = vst [vmem:[%s954_s9 + $0x40] sm:$0xff] (%p1477_p6), %v1020_v11  ;;  %1037 = vst [vmem:[%s954_s9 + $0xc0] sm:$0xff] (%p1477_p6), %v1036_v19 }
 0x162   : > { %933 = vst [vmem:[%s1663_s12 + $0x38] sm:$0xff] %v1228_v7  ;;  %941 = vst [vmem:[%s1663_s12 + $0x78] sm:$0xff] %v1236_v21  ;;  %v1038_v20 = vld [vmem:[%s1663_s12 + $0x68] sm:$0xff] (%p1477_p6) }
 0x163   : > { %1023 = vst [vmem:[%s954_s9 + $0x50] sm:$0xff] %v1022_v12  ;;  %1039 = vst [vmem:[%s954_s9 + $0xd0] sm:$0xff] %v1038_v20 }
 0x167   : > { %v1024_v13 = vld [vmem:[%s1663_s12 + $0x30] sm:$0xff] }
 0x168   : > { %1025 = vst [vmem:[%s954_s9 + $0x60] sm:$0xff] %v1024_v13  ;;  %v1040_v23 = vld [vmem:[%s1663_s12 + $0x70] sm:$0xff] }
 0x169   : > { %v1026_v14 = vld [vmem:[%s1663_s12 + $0x38] sm:$0xff]  ;;  %1041 = vst [vmem:[%s954_s9 + $0xe0] sm:$0xff] %v1040_v23 }
 0x16a   : > { %1027 = vst [vmem:[%s954_s9 + $0x70] sm:$0xff] %v1026_v14  ;;  %v1042_v24 = vld [vmem:[%s1663_s12 + $0x78] sm:$0xff] }
 0x16b   : > { %1043 = vst [vmem:[%s954_s9 + $0xf0] sm:$0xff] %v1042_v24 }
 0x16c PF: > { %s13_s16 = sadd.s32 1, %s1420_s16   ;;  %s1747_s12 = smov %s1408_s13 }
 0x16d   : > { %p10_p12 = scmp.ge.s32.totalorder %s13_s16, 4   ;;  %s1748_s13 = smov %s1482_s22 }
 0x16e   : > { %s1749_s14 = smov %s1416_s15  ;;  %s1750_s15 = smov %s1752_s17 }
 0x16f   :  { %12 = sbr.rel (!%p10_p12) target bundleno = 3 (0x3), region = 149 }

// kernel: resnet50_forward.11
= control target key start
LH: loop header
LB: loop body
LE: loop exit
PB: predicated region body
PF: predicated region fallthrough
CT: control target
= control target key end

     0   :  { %s1571_s12 = smov 0   ;;  %s1573_s13 = smov 0   ;;  %s1883_s0 = inlined_call_operand.vmem [shape: bf16[32,512], index: 0, kind: input, shape index: {}]   ;;  %s1884_s1 = inlined_call_operand.vmem [shape: bf16[512,1024], index: 1, kind: input, shape index: {}]   ;;  %s1885_s2 = inlined_call_operand.vmem [shape: f32[1,1024], index: 2, kind: input, shape index: {}]   ;;  %s1886_s3 = inlined_call_operand.vmem [shape: bf16[32,1024], index: 3, kind: output, shape index: {}]  }
   0x1   :  { %s1575_s14 = smov 0   ;;  %s1577_s15 = smov 0  }
   0x2   :  { %s1579_s16 = smov 0  }
   0x3 LB: > { %s22_s17 = sadd.s32 1, %s1545_s15  ;;  %s1248_s18 = sadd.s32 4294967295, %s1549_s16   ;;  %s1549_s16 = sphi %s1579_s16, %s13_s16   ;;  %s1545_s15 = sphi %s1577_s15, %s1891_s15   ;;  %s1541_s14 = sphi %s1575_s14, %s1890_s14   ;;  %s1537_s13 = sphi %s1573_s13, %s1889_s13   ;;  %s1533_s12 = sphi %s1571_s12, %s1888_s12  }
   0x4   : > { %p23_p0 = scmp.ge.s32.totalorder %s22_s17, 4  ;;  %p65_p1 = scmp.ne.s32.totalorder %s1537_s13, %s1533_s12 }
   0x5   : > { %p66_p2 = scmp.eq.s32.totalorder %s1549_s16, 0  ;;  %p123_p4 = scmp.eq.s32.totalorder %s1248_s18, 3 }
   0x6   : > { %s1893_s17 = smov (%p23_p0, %s22_s17), 0  ;;  %s58_s20 = sadd.s32 1, %s1537_s13 }
   0x7   : > { %p67_p3 = por %p66_p2, %p65_p1  ;;  %s55_s19 = ssub.s32 %s1545_s15, %s1893_s17 }
   0x8   : > { %p56_p5 = scmp.eq.s32.totalorder %s55_s19, 0  ;;  %p1606_p6 = por %p123_p4, %p65_p1 }
   0x9   : > { %p1252_p7 = scmp.ge.s32.totalorder %s1549_s16, 4 }
   0xa   : > { %s1611_s22 = scalar_select %p56_p5, %s1537_s13, %s58_s20  }
   0xb   : > { %155 = sbr.rel (%p1252_p7) target bundleno = 86 (0x56), region = 20 }
  0x12   : > { %158 = sbr.rel (!%p67_p3) target bundleno = 86 (0x56), region = 24  ;;  %s160_s23 = sand.u32 (%p67_p3), 1, %s1537_s13  }
  0x13   : > { %s1341_s24 = sshll.u32 (%p67_p3), %s1545_s15, 3  ;;  %s1253_s25 = sshll.u32 (%p67_p3), %s160_s23, 9 }
  0x14   : > { %s1619_s28 = scalar_lea.vmem (%p67_p3), %s1884_s1, %s1341_s24  ;;  %s1624_s29 = scalar_lea.vmem (%p67_p3), [#allocation2], %s1253_s25 }
  0x15   : > { %v319_v0 = vld [vmem:[%s1619_s28] sm:$0xff] (%p67_p3) }
  0x16   : > { %v321_v1 = vld [vmem:[%s1619_s28 + $0x20] sm:$0xff] (%p67_p3)  ;;  %320 = vst [vmem:[%s1624_s29] sm:$0xff] (%p67_p3), %v319_v0 }
  0x17   : > { %v323_v2 = vld [vmem:[%s1619_s28 + $0x40] sm:$0xff] (%p67_p3)  ;;  %322 = vst [vmem:[%s1624_s29 + $0x8] sm:$0xff] (%p67_p3), %v321_v1 }
  0x18   : > { %324 = vst [vmem:[%s1624_s29 + $0x10] sm:$0xff] (%p67_p3), %v323_v2  ;;  %v325_v3 = vld [vmem:[%s1619_s28 + $0x60] sm:$0xff] (%p67_p3) }
  0x19   : > { %v327_v4 = vld [vmem:[%s1619_s28 + $0x80] sm:$0xff]  ;;  %326 = vst [vmem:[%s1624_s29 + $0x18] sm:$0xff] %v325_v3 }
  0x1a   : > { %v329_v5 = vld [vmem:[%s1619_s28 + $0xa0] sm:$0xff]  ;;  %328 = vst [vmem:[%s1624_s29 + $0x20] sm:$0xff] %v327_v4 }
  0x1b   : > { %330 = vst [vmem:[%s1624_s29 + $0x28] sm:$0xff] %v329_v5  ;;  %v331_v6 = vld [vmem:[%s1619_s28 + $0xc0] sm:$0xff] }
  0x1c   : > { %v333_v7 = vld [vmem:[%s1619_s28 + $0xe0] sm:$0xff]  ;;  %332 = vst [vmem:[%s1624_s29 + $0x30] sm:$0xff] %v331_v6 }
  0x1d   : > { %v335_v8 = vld [vmem:[%s1619_s28 + $0x100] sm:$0xff]  ;;  %334 = vst [vmem:[%s1624_s29 + $0x38] sm:$0xff] %v333_v7 }
  0x1e   : > { %336 = vst [vmem:[%s1624_s29 + $0x40] sm:$0xff] %v335_v8  ;;  %v337_v9 = vld [vmem:[%s1619_s28 + $0x120] sm:$0xff] }
  0x1f   : > { %v339_v10 = vld [vmem:[%s1619_s28 + $0x140] sm:$0xff]  ;;  %338 = vst [vmem:[%s1624_s29 + $0x48] sm:$0xff] %v337_v9 }
  0x20   : > { %v341_v11 = vld [vmem:[%s1619_s28 + $0x160] sm:$0xff]  ;;  %340 = vst [vmem:[%s1624_s29 + $0x50] sm:$0xff] %v339_v10 }
  0x21   : > { %342 = vst [vmem:[%s1624_s29 + $0x58] sm:$0xff] %v341_v11  ;;  %v343_v12 = vld [vmem:[%s1619_s28 + $0x180] sm:$0xff] }
  0x22   : > { %v345_v13 = vld [vmem:[%s1619_s28 + $0x1a0] sm:$0xff]  ;;  %344 = vst [vmem:[%s1624_s29 + $0x60] sm:$0xff] %v343_v12 }
  0x23   : > { %v347_v14 = vld [vmem:[%s1619_s28 + $0x1c0] sm:$0xff]  ;;  %346 = vst [vmem:[%s1624_s29 + $0x68] sm:$0xff] %v345_v13 }
  0x24   : > { %348 = vst [vmem:[%s1624_s29 + $0x70] sm:$0xff] %v347_v14  ;;  %v349_v15 = vld [vmem:[%s1619_s28 + $0x1e0] sm:$0xff] }
  0x25   : > { %v351_v16 = vld [vmem:[%s1619_s28 + $0x200] sm:$0xff]  ;;  %350 = vst [vmem:[%s1624_s29 + $0x78] sm:$0xff] %v349_v15 }
  0x26   : > { %v353_v17 = vld [vmem:[%s1619_s28 + $0x220] sm:$0xff]  ;;  %352 = vst [vmem:[%s1624_s29 + $0x80] sm:$0xff] %v351_v16 }
  0x27   : > { %354 = vst [vmem:[%s1624_s29 + $0x88] sm:$0xff] %v353_v17  ;;  %v355_v18 = vld [vmem:[%s1619_s28 + $0x240] sm:$0xff] }
  0x28   : > { %v357_v19 = vld [vmem:[%s1619_s28 + $0x260] sm:$0xff]  ;;  %356 = vst [vmem:[%s1624_s29 + $0x90] sm:$0xff] %v355_v18 }
  0x29   : > { %v359_v20 = vld [vmem:[%s1619_s28 + $0x280] sm:$0xff]  ;;  %358 = vst [vmem:[%s1624_s29 + $0x98] sm:$0xff] %v357_v19 }
  0x2a   : > { %360 = vst [vmem:[%s1624_s29 + $0xa0] sm:$0xff] %v359_v20  ;;  %v361_v21 = vld [vmem:[%s1619_s28 + $0x2a0] sm:$0xff] }
  0x2b   : > { %v363_v22 = vld [vmem:[%s1619_s28 + $0x2c0] sm:$0xff]  ;;  %362 = vst [vmem:[%s1624_s29 + $0xa8] sm:$0xff] %v361_v21 }
  0x2c   : > { %v365_v23 = vld [vmem:[%s1619_s28 + $0x2e0] sm:$0xff]  ;;  %364 = vst [vmem:[%s1624_s29 + $0xb0] sm:$0xff] %v363_v22 }
  0x2d   : > { %366 = vst [vmem:[%s1624_s29 + $0xb8] sm:$0xff] %v365_v23  ;;  %v367_v24 = vld [vmem:[%s1619_s28 + $0x300] sm:$0xff] }
  0x2e   : > { %v369_v25 = vld [vmem:[%s1619_s28 + $0x320] sm:$0xff]  ;;  %368 = vst [vmem:[%s1624_s29 + $0xc0] sm:$0xff] %v367_v24 }
  0x2f   : > { %v371_v26 = vld [vmem:[%s1619_s28 + $0x340] sm:$0xff]  ;;  %370 = vst [vmem:[%s1624_s29 + $0xc8] sm:$0xff] %v369_v25 }
  0x30   : > { %372 = vst [vmem:[%s1624_s29 + $0xd0] sm:$0xff] %v371_v26  ;;  %v373_v27 = vld [vmem:[%s1619_s28 + $0x360] sm:$0xff] }
  0x31   : > { %v375_v28 = vld [vmem:[%s1619_s28 + $0x380] sm:$0xff]  ;;  %374 = vst [vmem:[%s1624_s29 + $0xd8] sm:$0xff] %v373_v27 }
  0x32   : > { %v377_v29 = vld [vmem:[%s1619_s28 + $0x3a0] sm:$0xff]  ;;  %376 = vst [vmem:[%s1624_s29 + $0xe0] sm:$0xff] %v375_v28 }
  0x33   : > { %378 = vst [vmem:[%s1624_s29 + $0xe8] sm:$0xff] %v377_v29  ;;  %v379_v30 = vld [vmem:[%s1619_s28 + $0x3c0] sm:$0xff] }
  0x34   : > { %v381_v31 = vld [vmem:[%s1619_s28 + $0x3e0] sm:$0xff]  ;;  %380 = vst [vmem:[%s1624_s29 + $0xf0] sm:$0xff] %v379_v30 }
  0x35   : > { %v383_v32 = vld [vmem:[%s1619_s28 + $0x400] sm:$0xff]  ;;  %382 = vst [vmem:[%s1624_s29 + $0xf8] sm:$0xff] %v381_v31 }
  0x36   : > { %384 = vst [vmem:[%s1624_s29 + $0x100] sm:$0xff] %v383_v32  ;;  %v385_v33 = vld [vmem:[%s1619_s28 + $0x420] sm:$0xff] }
  0x37   : > { %v387_v34 = vld [vmem:[%s1619_s28 + $0x440] sm:$0xff]  ;;  %386 = vst [vmem:[%s1624_s29 + $0x108] sm:$0xff] %v385_v33 }
  0x38   : > { %v389_v35 = vld [vmem:[%s1619_s28 + $0x460] sm:$0xff]  ;;  %388 = vst [vmem:[%s1624_s29 + $0x110] sm:$0xff] %v387_v34 }
  0x39   : > { %390 = vst [vmem:[%s1624_s29 + $0x118] sm:$0xff] %v389_v35  ;;  %v391_v36 = vld [vmem:[%s1619_s28 + $0x480] sm:$0xff] }
  0x3a   : > { %v393_v37 = vld [vmem:[%s1619_s28 + $0x4a0] sm:$0xff]  ;;  %392 = vst [vmem:[%s1624_s29 + $0x120] sm:$0xff] %v391_v36 }
  0x3b   : > { %v395_v38 = vld [vmem:[%s1619_s28 + $0x4c0] sm:$0xff]  ;;  %394 = vst [vmem:[%s1624_s29 + $0x128] sm:$0xff] %v393_v37 }
  0x3c   : > { %396 = vst [vmem:[%s1624_s29 + $0x130] sm:$0xff] %v395_v38  ;;  %v397_v39 = vld [vmem:[%s1619_s28 + $0x4e0] sm:$0xff] }
  0x3d   : > { %v399_v40 = vld [vmem:[%s1619_s28 + $0x500] sm:$0xff]  ;;  %398 = vst [vmem:[%s1624_s29 + $0x138] sm:$0xff] %v397_v39 }
  0x3e   : > { %v401_v41 = vld [vmem:[%s1619_s28 + $0x520] sm:$0xff]  ;;  %400 = vst [vmem:[%s1624_s29 + $0x140] sm:$0xff] %v399_v40 }
  0x3f   : > { %402 = vst [vmem:[%s1624_s29 + $0x148] sm:$0xff] %v401_v41  ;;  %v403_v42 = vld [vmem:[%s1619_s28 + $0x540] sm:$0xff] }
  0x40   : > { %v405_v43 = vld [vmem:[%s1619_s28 + $0x560] sm:$0xff]  ;;  %404 = vst [vmem:[%s1624_s29 + $0x150] sm:$0xff] %v403_v42 }
  0x41   : > { %v407_v44 = vld [vmem:[%s1619_s28 + $0x580] sm:$0xff]  ;;  %406 = vst [vmem:[%s1624_s29 + $0x158] sm:$0xff] %v405_v43 }
  0x42   : > { %408 = vst [vmem:[%s1624_s29 + $0x160] sm:$0xff] %v407_v44  ;;  %v409_v45 = vld [vmem:[%s1619_s28 + $0x5a0] sm:$0xff] }
  0x43   : > { %v411_v46 = vld [vmem:[%s1619_s28 + $0x5c0] sm:$0xff]  ;;  %410 = vst [vmem:[%s1624_s29 + $0x168] sm:$0xff] %v409_v45 }
  0x44   : > { %v413_v47 = vld [vmem:[%s1619_s28 + $0x5e0] sm:$0xff]  ;;  %412 = vst [vmem:[%s1624_s29 + $0x170] sm:$0xff] %v411_v46 }
  0x45   : > { %414 = vst [vmem:[%s1624_s29 + $0x178] sm:$0xff] %v413_v47  ;;  %v415_v48 = vld [vmem:[%s1619_s28 + $0x600] sm:$0xff] }
  0x46   : > { %v417_v49 = vld [vmem:[%s1619_s28 + $0x620] sm:$0xff]  ;;  %416 = vst [vmem:[%s1624_s29 + $0x180] sm:$0xff] %v415_v48 }
  0x47   : > { %v419_v50 = vld [vmem:[%s1619_s28 + $0x640] sm:$0xff]  ;;  %418 = vst [vmem:[%s1624_s29 + $0x188] sm:$0xff] %v417_v49 }
  0x48   : > { %420 = vst [vmem:[%s1624_s29 + $0x190] sm:$0xff] %v419_v50  ;;  %v421_v51 = vld [vmem:[%s1619_s28 + $0x660] sm:$0xff] }
  0x49   : > { %v423_v52 = vld [vmem:[%s1619_s28 + $0x680] sm:$0xff]  ;;  %422 = vst [vmem:[%s1624_s29 + $0x198] sm:$0xff] %v421_v51 }
  0x4a   : > { %v425_v53 = vld [vmem:[%s1619_s28 + $0x6a0] sm:$0xff]  ;;  %424 = vst [vmem:[%s1624_s29 + $0x1a0] sm:$0xff] %v423_v52 }
  0x4b   : > { %426 = vst [vmem:[%s1624_s29 + $0x1a8] sm:$0xff] %v425_v53  ;;  %v427_v54 = vld [vmem:[%s1619_s28 + $0x6c0] sm:$0xff] }
  0x4c   : > { %v429_v55 = vld [vmem:[%s1619_s28 + $0x6e0] sm:$0xff]  ;;  %428 = vst [vmem:[%s1624_s29 + $0x1b0] sm:$0xff] %v427_v54 }
  0x4d   : > { %v431_v56 = vld [vmem:[%s1619_s28 + $0x700] sm:$0xff]  ;;  %430 = vst [vmem:[%s1624_s29 + $0x1b8] sm:$0xff] %v429_v55 }
  0x4e   : > { %432 = vst [vmem:[%s1624_s29 + $0x1c0] sm:$0xff] %v431_v56  ;;  %v433_v57 = vld [vmem:[%s1619_s28 + $0x720] sm:$0xff] }
  0x4f   : > { %v435_v58 = vld [vmem:[%s1619_s28 + $0x740] sm:$0xff]  ;;  %434 = vst [vmem:[%s1624_s29 + $0x1c8] sm:$0xff] %v433_v57 }
  0x50   : > { %v437_v59 = vld [vmem:[%s1619_s28 + $0x760] sm:$0xff]  ;;  %436 = vst [vmem:[%s1624_s29 + $0x1d0] sm:$0xff] %v435_v58 }
  0x51   : > { %438 = vst [vmem:[%s1624_s29 + $0x1d8] sm:$0xff] %v437_v59  ;;  %v439_v60 = vld [vmem:[%s1619_s28 + $0x780] sm:$0xff] }
  0x52   : > { %v441_v61 = vld [vmem:[%s1619_s28 + $0x7a0] sm:$0xff]  ;;  %440 = vst [vmem:[%s1624_s29 + $0x1e0] sm:$0xff] %v439_v60 }
  0x53   : > { %v443_v62 = vld [vmem:[%s1619_s28 + $0x7c0] sm:$0xff]  ;;  %442 = vst [vmem:[%s1624_s29 + $0x1e8] sm:$0xff] %v441_v61 }
  0x54   : > { %444 = vst [vmem:[%s1624_s29 + $0x1f0] sm:$0xff] %v443_v62  ;;  %v445_v63 = vld [vmem:[%s1619_s28 + $0x7e0] sm:$0xff] }
  0x55   : > { %446 = vst [vmem:[%s1624_s29 + $0x1f8] sm:$0xff] %v445_v63 }
  0x56 PF: > { %p1256_p8 = scmp.ge.s32.totalorder %s1549_s16, 1  ;;  %p459_p9 = scmp.lt.s32.totalorder %s1549_s16, 5 }
  0x58   : > { %p460_p10 = pnand %p1256_p8, %p459_p9 }
  0x59   : > { %s466_s30 = sand.u32 (!%p460_p10), 1, %s1533_s12   ;;  %v1501_v0 = vld [vmem:[%s1883_s0 + $0x4] ss:$16 sps:$4 sm:$0xff] (!%p460_p10)   ;;  %v1504_v1 = vld [vmem:[%s1883_s0 + $0xc] ss:$16 sps:$4 sm:$0xff] (!%p460_p10)  }
  0x5a   : > { %463 = sbr.rel (%p460_p10) target bundleno = 397 (0x18d), region = 66  ;;  %s1257_s4 = sshll.u32 (!%p460_p10), %s466_s30, 9  ;;  %989 = vmatprep.mubr.bf16.mxu1 (!%p460_p10), %v1501_v0  ;;  %1042 = vmatprep.mubr.bf16.mxu0 (!%p460_p10), %v1504_v1 }
  0x5b   : > { %s1762_s9 = scalar_lea.vmem (!%p460_p10), [#allocation2], %s1257_s4  ;;  %s1259_s4 = sshll.u32 (!%p460_p10), %s1541_s14, 1 }
  0x5c   : > { %v1403_v2 = vld [vmem:[%s1762_s9 + $0x4] ss:$8 sps:$4 sm:$0xff] (!%p460_p10)   ;;  %v1407_v4 = vld [vmem:[%s1762_s9] ss:$8 sps:$4 sm:$0xff] (!%p460_p10)   ;;  %v1409_v6 = vld [vmem:[%s1762_s9 + $0x14] ss:$8 sps:$4 sm:$0xff] (!%p460_p10)  }
  0x5d   : > { %v1405_v3 = vld [vmem:[%s1762_s9 + $0x104] ss:$8 sps:$4 sm:$0xff] (!%p460_p10)   ;;  %957 = vmatprep.subr.bf16.mxu1 (!%p460_p10), %v1403_v2  ;;  %v1408_v5 = vld [vmem:[%s1762_s9 + $0x100] ss:$8 sps:$4 sm:$0xff] (!%p460_p10)   ;;  %v1411_v7 = vld [vmem:[%s1762_s9 + $0x114] ss:$8 sps:$4 sm:$0xff] (!%p460_p10)  }
  0x5e   : > { %1010 = vmatprep.subr.bf16.mxu0 (!%p460_p10), %v1405_v3  ;;  %958 = vmatpush1.bf16.msra.mxu1 (!%p460_p10), %v1407_v4  ;;  %v1413_v8 = vld [vmem:[%s1762_s9 + $0x10] ss:$8 sps:$4 sm:$0xff] (!%p460_p10)   ;;  %v1415_v10 = vld [vmem:[%s1762_s9 + $0x24] ss:$8 sps:$4 sm:$0xff] (!%p460_p10)   ;;  %v1419_v12 = vld [vmem:[%s1762_s9 + $0x20] ss:$8 sps:$4 sm:$0xff] (!%p460_p10)  }
  0x5f   : > { %1011 = vmatpush1.bf16.msra.mxu0 (!%p460_p10), %v1408_v5  ;;  %959 = vmatprep.subr.bf16.mxu1 (!%p460_p10), %v1409_v6  ;;  %v1414_v9 = vld [vmem:[%s1762_s9 + $0x110] ss:$8 sps:$4 sm:$0xff] (!%p460_p10)   ;;  %v1417_v11 = vld [vmem:[%s1762_s9 + $0x124] ss:$8 sps:$4 sm:$0xff] (!%p460_p10)   ;;  %v1420_v13 = vld [vmem:[%s1762_s9 + $0x120] ss:$8 sps:$4 sm:$0xff] (!%p460_p10)  }
  0x60   : > { %1012 = vmatprep.subr.bf16.mxu0 (!%p460_p10), %v1411_v7  ;;  %v1421_v14 = vld [vmem:[%s1762_s9 + $0x34] ss:$8 sps:$4 sm:$0xff] (!%p460_p10)   ;;  %v1425_v16 = vld [vmem:[%s1762_s9 + $0x30] ss:$8 sps:$4 sm:$0xff] (!%p460_p10)   ;;  %v1427_v18 = vld [vmem:[%s1762_s9 + $0x44] ss:$8 sps:$4 sm:$0xff] (!%p460_p10)  }
  0x61   : > { %v1423_v15 = vld [vmem:[%s1762_s9 + $0x134] ss:$8 sps:$4 sm:$0xff]   ;;  %v1426_v17 = vld [vmem:[%s1762_s9 + $0x130] ss:$8 sps:$4 sm:$0xff]   ;;  %v1429_v19 = vld [vmem:[%s1762_s9 + $0x144] ss:$8 sps:$4 sm:$0xff]  }
  0x62   : > { %960 = vmatpush1.bf16.msra.mxu1 %v1413_v8  ;;  %v1431_v20 = vld [vmem:[%s1762_s9 + $0x40] ss:$8 sps:$4 sm:$0xff]   ;;  %v1433_v22 = vld [vmem:[%s1762_s9 + $0x54] ss:$8 sps:$4 sm:$0xff]   ;;  %v1437_v24 = vld [vmem:[%s1762_s9 + $0x50] ss:$8 sps:$4 sm:$0xff]   ;;  %v587_v8 = vlaneseq }
  0x63   : > { %1013 = vmatpush1.bf16.msra.mxu0 %v1414_v9  ;;  %961 = vmatprep.subr.bf16.mxu1 %v1415_v10  ;;  %v1432_v21 = vld [vmem:[%s1762_s9 + $0x140] ss:$8 sps:$4 sm:$0xff]   ;;  %v1435_v23 = vld [vmem:[%s1762_s9 + $0x154] ss:$8 sps:$4 sm:$0xff]   ;;  %v1438_v25 = vld [vmem:[%s1762_s9 + $0x150] ss:$8 sps:$4 sm:$0xff]  }
  0x64   : > { %1014 = vmatprep.subr.bf16.mxu0 %v1417_v11  ;;  %v1439_v26 = vld [vmem:[%s1762_s9 + $0x64] ss:$8 sps:$4 sm:$0xff]   ;;  %v1443_v28 = vld [vmem:[%s1762_s9 + $0x60] ss:$8 sps:$4 sm:$0xff]   ;;  %v1445_v30 = vld [vmem:[%s1762_s9 + $0x74] ss:$8 sps:$4 sm:$0xff]  }
  0x65   : > { %v1441_v27 = vld [vmem:[%s1762_s9 + $0x164] ss:$8 sps:$4 sm:$0xff]   ;;  %v1444_v29 = vld [vmem:[%s1762_s9 + $0x160] ss:$8 sps:$4 sm:$0xff]   ;;  %v1447_v31 = vld [vmem:[%s1762_s9 + $0x174] ss:$8 sps:$4 sm:$0xff]  }
  0x66   : > { %962 = vmatpush1.bf16.msra.mxu1 %v1419_v12  ;;  %v1449_v32 = vld [vmem:[%s1762_s9 + $0x70] ss:$8 sps:$4 sm:$0xff]   ;;  %v1451_v34 = vld [vmem:[%s1762_s9 + $0x84] ss:$8 sps:$4 sm:$0xff]   ;;  %v1455_v36 = vld [vmem:[%s1762_s9 + $0x80] ss:$8 sps:$4 sm:$0xff]  }
  0x67   : > { %1015 = vmatpush1.bf16.msra.mxu0 %v1420_v13  ;;  %963 = vmatprep.subr.bf16.mxu1 %v1421_v14  ;;  %v1450_v33 = vld [vmem:[%s1762_s9 + $0x170] ss:$8 sps:$4 sm:$0xff]   ;;  %v1453_v35 = vld [vmem:[%s1762_s9 + $0x184] ss:$8 sps:$4 sm:$0xff]   ;;  %v1456_v37 = vld [vmem:[%s1762_s9 + $0x180] ss:$8 sps:$4 sm:$0xff]  }
  0x68   : > { %1016 = vmatprep.subr.bf16.mxu0 %v1423_v15  ;;  %v1457_v38 = vld [vmem:[%s1762_s9 + $0x94] ss:$8 sps:$4 sm:$0xff]   ;;  %v1461_v40 = vld [vmem:[%s1762_s9 + $0x90] ss:$8 sps:$4 sm:$0xff]   ;;  %v1463_v42 = vld [vmem:[%s1762_s9 + $0xa4] ss:$8 sps:$4 sm:$0xff]  }
  0x69   : > { %v1459_v39 = vld [vmem:[%s1762_s9 + $0x194] ss:$8 sps:$4 sm:$0xff]   ;;  %v1462_v41 = vld [vmem:[%s1762_s9 + $0x190] ss:$8 sps:$4 sm:$0xff]   ;;  %v1465_v43 = vld [vmem:[%s1762_s9 + $0x1a4] ss:$8 sps:$4 sm:$0xff]  }
  0x6a   : > { %964 = vmatpush1.bf16.msra.mxu1 %v1425_v16  ;;  %v1467_v44 = vld [vmem:[%s1762_s9 + $0xa0] ss:$8 sps:$4 sm:$0xff]   ;;  %v1469_v46 = vld [vmem:[%s1762_s9 + $0xb4] ss:$8 sps:$4 sm:$0xff]   ;;  %v1473_v48 = vld [vmem:[%s1762_s9 + $0xb0] ss:$8 sps:$4 sm:$0xff]  }
  0x6b   : > { %1017 = vmatpush1.bf16.msra.mxu0 %v1426_v17  ;;  %965 = vmatprep.subr.bf16.mxu1 %v1427_v18  ;;  %v1468_v45 = vld [vmem:[%s1762_s9 + $0x1a0] ss:$8 sps:$4 sm:$0xff]   ;;  %v1471_v47 = vld [vmem:[%s1762_s9 + $0x1b4] ss:$8 sps:$4 sm:$0xff]   ;;  %v1474_v49 = vld [vmem:[%s1762_s9 + $0x1b0] ss:$8 sps:$4 sm:$0xff]  }
  0x6c   : > { %1018 = vmatprep.subr.bf16.mxu0 %v1429_v19  ;;  %v1475_v50 = vld [vmem:[%s1762_s9 + $0xc4] ss:$8 sps:$4 sm:$0xff]   ;;  %v1479_v52 = vld [vmem:[%s1762_s9 + $0xc0] ss:$8 sps:$4 sm:$0xff]   ;;  %v1481_v54 = vld [vmem:[%s1762_s9 + $0xd4] ss:$8 sps:$4 sm:$0xff]  }
  0x6d   : > { %v1477_v51 = vld [vmem:[%s1762_s9 + $0x1c4] ss:$8 sps:$4 sm:$0xff]   ;;  %v1480_v53 = vld [vmem:[%s1762_s9 + $0x1c0] ss:$8 sps:$4 sm:$0xff]   ;;  %v1483_v55 = vld [vmem:[%s1762_s9 + $0x1d4] ss:$8 sps:$4 sm:$0xff]  }
  0x6e   : > { %966 = vmatpush1.bf16.msra.mxu1 %v1431_v20  ;;  %v1485_v56 = vld [vmem:[%s1762_s9 + $0xd0] ss:$8 sps:$4 sm:$0xff]   ;;  %v1487_v58 = vld [vmem:[%s1762_s9 + $0xe4] ss:$8 sps:$4 sm:$0xff]   ;;  %v1491_v60 = vld [vmem:[%s1762_s9 + $0xe0] ss:$8 sps:$4 sm:$0xff]  }
  0x6f   : > { %1019 = vmatpush1.bf16.msra.mxu0 %v1432_v21  ;;  %967 = vmatprep.subr.bf16.mxu1 %v1433_v22  ;;  %v1486_v57 = vld [vmem:[%s1762_s9 + $0x1d0] ss:$8 sps:$4 sm:$0xff]   ;;  %v1489_v59 = vld [vmem:[%s1762_s9 + $0x1e4] ss:$8 sps:$4 sm:$0xff]   ;;  %v1492_v61 = vld [vmem:[%s1762_s9 + $0x1e0] ss:$8 sps:$4 sm:$0xff]  }
  0x70   : > { %1020 = vmatprep.subr.bf16.mxu0 %v1435_v23  ;;  %v1493_v62 = vld [vmem:[%s1762_s9 + $0xf4] ss:$8 sps:$4 sm:$0xff]   ;;  %v1497_v0 = vld [vmem:[%s1762_s9 + $0xf0] ss:$8 sps:$4 sm:$0xff]   ;;  %p507_p11 = scmp.lt.s32.totalorder %s1259_s4, 7  ;;  %v588_v9 = vshrl.u32 %v587_v8, 7 }
  0x71   : > { %v1495_v63 = vld [vmem:[%s1762_s9 + $0x1f4] ss:$8 sps:$4 sm:$0xff]   ;;  %v1498_v1 = vld [vmem:[%s1762_s9 + $0x1f0] ss:$8 sps:$4 sm:$0xff]   ;;  %s1258_s8 = sshll.u32 %s466_s30, 5  ;;  %s1346_s12 = sshll.u32 (%p1606_p6), %s1541_s14, 3 }
  0x72   : > { %968 = vmatpush1.bf16.msra.mxu1 %v1437_v24  ;;  %v1499_v2 = vld [vmem:[%s1883_s0] ss:$16 sps:$4 sm:$0xff]   ;;  %v1502_v3 = vld [vmem:[%s1883_s0 + $0x8] ss:$16 sps:$4 sm:$0xff]   ;;  %v1505_v4 = vld [vmem:[%s1883_s0 + $0x24] ss:$16 sps:$4 sm:$0xff]   ;;  %s1111_s11 = scalar_lea.vmem (%p1606_p6), %s1886_s3, %s1346_s12 }
  0x73   : > { %1021 = vmatpush1.bf16.msra.mxu0 %v1438_v25  ;;  %969 = vmatprep.subr.bf16.mxu1 %v1439_v26  ;;  %v1507_v5 = vld [vmem:[%s1883_s0 + $0x2c] ss:$16 sps:$4 sm:$0xff]   ;;  %v1509_v6 = vld [vmem:[%s1883_s0 + $0x20] ss:$16 sps:$4 sm:$0xff]   ;;  %v1510_v7 = vld [vmem:[%s1883_s0 + $0x28] ss:$16 sps:$4 sm:$0xff]  }
  0x74   : > { %1022 = vmatprep.subr.bf16.mxu0 %v1441_v27  ;;  %s1895_s4 = smov (!%p507_p11, %s1259_s4), 7  ;;  %v589_v10 = vsub.s32 0, %v588_v9  ;;  %v593_v12 = vsub.s32 1, %v588_v9  ;;  %s1852_s9 = scalar_lea.vmem [#allocation3], %s1258_s8 }
  0x75   : > { %s509_s7 = scalar_lea.vmem %s1885_s2, %s1895_s4 }
  0x76   : > { %970 = vmatpush1.bf16.msra.mxu1 %v1443_v28  ;;  %v585_v11 = vld [vmem:[%s509_s7] sm:$0x3] }
  0x77   : > { %1023 = vmatpush1.bf16.msra.mxu0 %v1444_v29  ;;  %971 = vmatprep.subr.bf16.mxu1 %v1445_v30  ;;  %v590_v13 = vrot.slane %v585_v11, %v589_v10  ;;  %v594_v14 = vrot.slane %v585_v11, %v593_v12 }
  0x78   : > { %1024 = vmatprep.subr.bf16.mxu0 %v1447_v31 }
  0x7a   : > { %972 = vmatpush1.bf16.msra.mxu1 %v1449_v32 }
  0x7b   : > { %1025 = vmatpush1.bf16.msra.mxu0 %v1450_v33  ;;  %973 = vmatprep.subr.bf16.mxu1 %v1451_v34 }
  0x7c   : > { %1026 = vmatprep.subr.bf16.mxu0 %v1453_v35 }
  0x7e   : > { %974 = vmatpush1.bf16.msra.mxu1 %v1455_v36 }
  0x7f   : > { %1027 = vmatpush1.bf16.msra.mxu0 %v1456_v37  ;;  %975 = vmatprep.subr.bf16.mxu1 %v1457_v38 }
  0x80   : > { %1028 = vmatprep.subr.bf16.mxu0 %v1459_v39 }
  0x82   : > { %976 = vmatpush1.bf16.msra.mxu1 %v1461_v40 }
  0x83   : > { %1029 = vmatpush1.bf16.msra.mxu0 %v1462_v41  ;;  %977 = vmatprep.subr.bf16.mxu1 %v1463_v42 }
  0x84   : > { %1030 = vmatprep.subr.bf16.mxu0 %v1465_v43 }
  0x86   : > { %978 = vmatpush1.bf16.msra.mxu1 %v1467_v44 }
  0x87   : > { %1031 = vmatpush1.bf16.msra.mxu0 %v1468_v45  ;;  %979 = vmatprep.subr.bf16.mxu1 %v1469_v46 }
  0x88   : > { %1032 = vmatprep.subr.bf16.mxu0 %v1471_v47 }
  0x8a   : > { %980 = vmatpush1.bf16.msra.mxu1 %v1473_v48 }
  0x8b   : > { %1033 = vmatpush1.bf16.msra.mxu0 %v1474_v49  ;;  %981 = vmatprep.subr.bf16.mxu1 %v1475_v50 }
  0x8c   : > { %1034 = vmatprep.subr.bf16.mxu0 %v1477_v51 }
  0x8e   : > { %982 = vmatpush1.bf16.msra.mxu1 %v1479_v52 }
  0x8f   : > { %1035 = vmatpush1.bf16.msra.mxu0 %v1480_v53  ;;  %983 = vmatprep.subr.bf16.mxu1 %v1481_v54 }
  0x90   : > { %1036 = vmatprep.subr.bf16.mxu0 %v1483_v55 }
  0x92   : > { %984 = vmatpush1.bf16.msra.mxu1 %v1485_v56 }
  0x93   : > { %1037 = vmatpush1.bf16.msra.mxu0 %v1486_v57  ;;  %985 = vmatprep.subr.bf16.mxu1 %v1487_v58 }
  0x94   : > { %1038 = vmatprep.subr.bf16.mxu0 %v1489_v59 }
  0x96   : > { %986 = vmatpush1.bf16.msra.mxu1 %v1491_v60 }
  0x97   : > { %1039 = vmatpush1.bf16.msra.mxu0 %v1492_v61  ;;  %987 = vmatprep.subr.bf16.mxu1 %v1493_v62 }
  0x98   : > { %1040 = vmatprep.subr.bf16.mxu0 %v1495_v63 }
  0x9a   : > { %988 = vmatpush1.bf16.msra.mxu1 %v1497_v0 }
  0x9b   : > { %1041 = vmatpush1.bf16.msra.mxu0 %v1498_v1 }
  0x9d   : > { %990 = vmatmul.mubr.bf16.vlgmr.msra.gmra.mrb[0].mxu1 %v1499_v2 }
  0x9e   : > { %1043 = vmatmul.mubr.bf16.vlgmr.msra.gmra.mrb[0].mxu0 %v1502_v3  ;;  %999 = vmatprep.mubr.bf16.mxu1 %v1505_v4 }
  0x9f   : > { %1052 = vmatprep.mubr.bf16.mxu0 %v1507_v5 }
  0xa5   : > { %1000 = vmatmul.mubr.bf16.gmra.mrb[4].mxu1 %v1509_v6 }
  0xa6   : > { %1053 = vmatmul.mubr.bf16.gmra.mrb[4].mxu0 %v1510_v7 }
 0x170   : > { %v991_v15 = vpop.f32.mrb[0].mxu1 }
 0x171   : > { %v1044_v16 = vpop.f32.mrb[0].mxu0  ;;  %v992_v17 = vadd.f32 %v991_v15, %v590_v13  ;;  %v993_v18 = vpop.f32.mrb[1].mxu1 }
 0x172   : > { %v1046_v19 = vpop.f32.mrb[1].mxu0  ;;  %v994_v20 = vadd.f32 %v993_v18, %v594_v14  ;;  %v995_v21 = vpop.f32.mrb[2].mxu1 }
 0x173   : > { %v1048_v22 = vpop.f32.mrb[2].mxu0  ;;  %v1045_v23 = vadd.f32 %v1044_v16, %v992_v17  ;;  %v996_v24 = vadd.f32 %v995_v21, %v590_v13  ;;  %v997_v25 = vpop.f32.mrb[3].mxu1 }
 0x174   : > { %v1050_v26 = vpop.f32.mrb[3].mxu0  ;;  %v1047_v27 = vadd.f32 %v1046_v19, %v994_v20  ;;  %v998_v28 = vadd.f32 %v997_v25, %v594_v14 }
 0x175   : > { %v1063_v29 = vmax.f32 %v1045_v23, 0.0  ;;  %v1049_v30 = vadd.f32 %v1048_v22, %v996_v24 }
 0x176   : > { %v1064_v31 = vmax.f32 %v1047_v27, 0.0  ;;  %v1051_v32 = vadd.f32 %v1050_v26, %v998_v28 }
 0x177   : > { %v1065_v33 = vmax.f32 %v1049_v30, 0.0 }
 0x178   : > { %v1342_v34 = vpack.c.bf16 %v1064_v31, %v1063_v29  ;;  %v1066_v35 = vmax.f32 %v1051_v32, 0.0  ;;  %v1001_v36 = vpop.f32.mrb[4].mxu1 }
 0x179   : > { %v1054_v37 = vpop.f32.mrb[4].mxu0  ;;  %v1002_v38 = vadd.f32 %v1001_v36, %v590_v13  ;;  %v1003_v39 = vpop.f32.mrb[5].mxu1 }
 0x17a   : > { %v1056_v40 = vpop.f32.mrb[5].mxu0  ;;  %1095 = vst [vmem:[%s1852_s9] sm:$0xff] %v1342_v34  ;;  %v1343_v41 = vpack.c.bf16 %v1066_v35, %v1065_v33  ;;  %v1004_v42 = vadd.f32 %v1003_v39, %v594_v14  ;;  %v1005_v43 = vpop.f32.mrb[6].mxu1 }
 0x17b   : > { %v1058_v44 = vpop.f32.mrb[6].mxu0  ;;  %v1055_v45 = vadd.f32 %v1054_v37, %v1002_v38  ;;  %v1006_v46 = vadd.f32 %v1005_v43, %v590_v13  ;;  %v1007_v47 = vpop.f32.mrb[7].mxu1 }
 0x17c   : > { %v1060_v48 = vpop.f32.mrb[7].mxu0  ;;  %1096 = vst [vmem:[%s1852_s9 + $0x8] sm:$0xff] %v1343_v41  ;;  %v1057_v49 = vadd.f32 %v1056_v40, %v1004_v42  ;;  %v1008_v50 = vadd.f32 %v1007_v47, %v594_v14 }
 0x17d   : > { %v1067_v51 = vmax.f32 %v1055_v45, 0.0  ;;  %v1059_v52 = vadd.f32 %v1058_v44, %v1006_v46 }
 0x17e   : > { %v1068_v53 = vmax.f32 %v1057_v49, 0.0  ;;  %v1061_v54 = vadd.f32 %v1060_v48, %v1008_v50  ;;  %1105 = sbr.rel (!%p1606_p6) target bundleno = 397 (0x18d), region = 74 }
 0x17f   : > { %v1069_v55 = vmax.f32 %v1059_v52, 0.0 }
 0x180   : > { %v1344_v56 = vpack.c.bf16 %v1068_v53, %v1067_v51  ;;  %v1070_v57 = vmax.f32 %v1061_v54, 0.0 }
 0x181   : > { %v1145_v59 = vld [vmem:[%s1852_s9] sm:$0xff] (%p1606_p6) }
 0x182   : > { %1097 = vst [vmem:[%s1852_s9 + $0x10] sm:$0xff] %v1344_v56  ;;  %v1345_v58 = vpack.c.bf16 %v1070_v57, %v1069_v55  ;;  %1146 = vst [vmem:[%s1111_s11] sm:$0xff] (%p1606_p6), %v1145_v59 }
 0x183   : > { %v1147_v60 = vld [vmem:[%s1852_s9 + $0x8] sm:$0xff] (%p1606_p6) }
 0x184   : > { %1098 = vst [vmem:[%s1852_s9 + $0x18] sm:$0xff] %v1345_v58  ;;  %1148 = vst [vmem:[%s1111_s11 + $0x20] sm:$0xff] (%p1606_p6), %v1147_v60 }
 0x189   : > { %v1149_v61 = vld [vmem:[%s1852_s9 + $0x10] sm:$0xff] }
 0x18a   : > { %1150 = vst [vmem:[%s1111_s11 + $0x40] sm:$0xff] %v1149_v61 }
 0x18b   : > { %v1151_v62 = vld [vmem:[%s1852_s9 + $0x18] sm:$0xff] }
 0x18c   : > { %1152 = vst [vmem:[%s1111_s11 + $0x60] sm:$0xff] %v1151_v62 }
 0x18d PF: > { %s13_s16 = sadd.s32 1, %s1549_s16   ;;  %s1888_s12 = smov %s1537_s13 }
 0x18e   : > { %p10_p12 = scmp.ge.s32.totalorder %s13_s16, 6   ;;  %s1889_s13 = smov %s1611_s22 }
 0x18f   : > { %s1890_s14 = smov %s1545_s15  ;;  %s1891_s15 = smov %s1893_s17 }
 0x190   :  { %12 = sbr.rel (!%p10_p12) target bundleno = 3 (0x3), region = 149 }

// kernel: resnet50_forward.12
= control target key start
LH: loop header
LB: loop body
LE: loop exit
PB: predicated region body
PF: predicated region fallthrough
CT: control target
= control target key end

     0   :  { %s2341_s12 = smov 0   ;;  %s2343_s13 = smov 0   ;;  %s2835_s0 = inlined_call_operand.vmem [shape: bf16[8,1024], index: 0, kind: input, shape index: {}]   ;;  %s2836_s1 = inlined_call_operand.vmem [shape: bf16[1024,2048], index: 1, kind: input, shape index: {}]   ;;  %s2837_s2 = inlined_call_operand.vmem [shape: f32[1,2048], index: 2, kind: input, shape index: {}]   ;;  %s2838_s3 = inlined_call_operand.vmem [shape: bf16[8,2048], index: 3, kind: output, shape index: {}]  }
   0x1   :  { %s2345_s14 = smov 0   ;;  %s2347_s15 = smov 0  }
   0x2   :  { %s2349_s16 = smov 0  }
   0x3 LB: > { %s22_s17 = sadd.s32 1, %s2315_s15  ;;  %p65_p1 = scmp.ne.s32.totalorder %s2307_s13, %s2303_s12  ;;  %s2319_s16 = sphi %s2349_s16, %s13_s16   ;;  %s2315_s15 = sphi %s2347_s15, %s2842_s15   ;;  %s2311_s14 = sphi %s2345_s14, %s2841_s14   ;;  %s2307_s13 = sphi %s2343_s13, %s2840_s13   ;;  %s2303_s12 = sphi %s2341_s12, %s2839_s12  }
   0x4   : > { %p23_p0 = scmp.ge.s32.totalorder %s22_s17, 8  ;;  %p66_p2 = scmp.eq.s32.totalorder %s2319_s16, 0 }
   0x5   : > { %s58_s19 = sadd.s32 1, %s2307_s13  ;;  %p1879_p5 = scmp.ge.s32.totalorder %s2319_s16, 8 }
   0x6   : > { %s2844_s17 = smov (%p23_p0, %s22_s17), 0  ;;  %p67_p3 = por %p66_p2, %p65_p1 }
   0x7   : > { %s55_s18 = ssub.s32 %s2315_s15, %s2844_s17  ;;  %153 = sbr.rel (%p1879_p5) target bundleno = 146 (0x92), region = 20 }
   0x8   : > { %p56_p4 = scmp.eq.s32.totalorder %s55_s18, 0 }
   0xa   : > { %s2376_s20 = scalar_select %p56_p4, %s2307_s13, %s58_s19  }
   0xe   : > { %156 = sbr.rel (!%p67_p3) target bundleno = 146 (0x92), region = 24  ;;  %s158_s21 = sand.u32 (%p67_p3), 1, %s2307_s13  }
   0xf   : > { %s2027_s22 = sshll.u32 (%p67_p3), %s2315_s15, 3  ;;  %s1880_s23 = sshll.u32 (%p67_p3), %s158_s21, 10 }
  0x10   : > { %s2384_s26 = scalar_lea.vmem (%p67_p3), %s2836_s1, %s2027_s22  ;;  %s2389_s27 = scalar_lea.vmem (%p67_p3), [#allocation2], %s1880_s23 }
  0x11   : > { %v445_v0 = vld [vmem:[%s2384_s26] sm:$0xff] (%p67_p3) }
  0x12   : > { %v447_v1 = vld [vmem:[%s2384_s26 + $0x40] sm:$0xff] (%p67_p3)  ;;  %446 = vst [vmem:[%s2389_s27] sm:$0xff] (%p67_p3), %v445_v0 }
  0x13   : > { %v449_v2 = vld [vmem:[%s2384_s26 + $0x80] sm:$0xff] (%p67_p3)  ;;  %448 = vst [vmem:[%s2389_s27 + $0x8] sm:$0xff] (%p67_p3), %v447_v1 }
  0x14   : > { %450 = vst [vmem:[%s2389_s27 + $0x10] sm:$0xff] (%p67_p3), %v449_v2  ;;  %v451_v3 = vld [vmem:[%s2384_s26 + $0xc0] sm:$0xff] (%p67_p3) }
  0x15   : > { %v453_v4 = vld [vmem:[%s2384_s26 + $0x100] sm:$0xff]  ;;  %452 = vst [vmem:[%s2389_s27 + $0x18] sm:$0xff] %v451_v3 }
  0x16   : > { %v455_v5 = vld [vmem:[%s2384_s26 + $0x140] sm:$0xff]  ;;  %454 = vst [vmem:[%s2389_s27 + $0x20] sm:$0xff] %v453_v4 }
  0x17   : > { %456 = vst [vmem:[%s2389_s27 + $0x28] sm:$0xff] %v455_v5  ;;  %v457_v6 = vld [vmem:[%s2384_s26 + $0x180] sm:$0xff] }
  0x18   : > { %v459_v7 = vld [vmem:[%s2384_s26 + $0x1c0] sm:$0xff]  ;;  %458 = vst [vmem:[%s2389_s27 + $0x30] sm:$0xff] %v457_v6 }
  0x19   : > { %v461_v8 = vld [vmem:[%s2384_s26 + $0x200] sm:$0xff]  ;;  %460 = vst [vmem:[%s2389_s27 + $0x38] sm:$0xff] %v459_v7 }
  0x1a   : > { %462 = vst [vmem:[%s2389_s27 + $0x40] sm:$0xff] %v461_v8  ;;  %v463_v9 = vld [vmem:[%s2384_s26 + $0x240] sm:$0xff] }
  0x1b   : > { %v465_v10 = vld [vmem:[%s2384_s26 + $0x280] sm:$0xff]  ;;  %464 = vst [vmem:[%s2389_s27 + $0x48] sm:$0xff] %v463_v9 }
  0x1c   : > { %v467_v11 = vld [vmem:[%s2384_s26 + $0x2c0] sm:$0xff]  ;;  %466 = vst [vmem:[%s2389_s27 + $0x50] sm:$0xff] %v465_v10 }
  0x1d   : > { %468 = vst [vmem:[%s2389_s27 + $0x58] sm:$0xff] %v467_v11  ;;  %v469_v12 = vld [vmem:[%s2384_s26 + $0x300] sm:$0xff] }
  0x1e   : > { %v471_v13 = vld [vmem:[%s2384_s26 + $0x340] sm:$0xff]  ;;  %470 = vst [vmem:[%s2389_s27 + $0x60] sm:$0xff] %v469_v12 }
  0x1f   : > { %v473_v14 = vld [vmem:[%s2384_s26 + $0x380] sm:$0xff]  ;;  %472 = vst [vmem:[%s2389_s27 + $0x68] sm:$0xff] %v471_v13 }
  0x20   : > { %474 = vst [vmem:[%s2389_s27 + $0x70] sm:$0xff] %v473_v14  ;;  %v475_v15 = vld [vmem:[%s2384_s26 + $0x3c0] sm:$0xff] }
  0x21   : > { %v477_v16 = vld [vmem:[%s2384_s26 + $0x400] sm:$0xff]  ;;  %476 = vst [vmem:[%s2389_s27 + $0x78] sm:$0xff] %v475_v15 }
  0x22   : > { %v479_v17 = vld [vmem:[%s2384_s26 + $0x440] sm:$0xff]  ;;  %478 = vst [vmem:[%s2389_s27 + $0x80] sm:$0xff] %v477_v16 }
  0x23   : > { %480 = vst [vmem:[%s2389_s27 + $0x88] sm:$0xff] %v479_v17  ;;  %v481_v18 = vld [vmem:[%s2384_s26 + $0x480] sm:$0xff] }
  0x24   : > { %v483_v19 = vld [vmem:[%s2384_s26 + $0x4c0] sm:$0xff]  ;;  %482 = vst [vmem:[%s2389_s27 + $0x90] sm:$0xff] %v481_v18 }
  0x25   : > { %v485_v20 = vld [vmem:[%s2384_s26 + $0x500] sm:$0xff]  ;;  %484 = vst [vmem:[%s2389_s27 + $0x98] sm:$0xff] %v483_v19 }
  0x26   : > { %486 = vst [vmem:[%s2389_s27 + $0xa0] sm:$0xff] %v485_v20  ;;  %v487_v21 = vld [vmem:[%s2384_s26 + $0x540] sm:$0xff] }
  0x27   : > { %v489_v22 = vld [vmem:[%s2384_s26 + $0x580] sm:$0xff]  ;;  %488 = vst [vmem:[%s2389_s27 + $0xa8] sm:$0xff] %v487_v21 }
  0x28   : > { %v491_v23 = vld [vmem:[%s2384_s26 + $0x5c0] sm:$0xff]  ;;  %490 = vst [vmem:[%s2389_s27 + $0xb0] sm:$0xff] %v489_v22 }
  0x29   : > { %492 = vst [vmem:[%s2389_s27 + $0xb8] sm:$0xff] %v491_v23  ;;  %v493_v24 = vld [vmem:[%s2384_s26 + $0x600] sm:$0xff] }
  0x2a   : > { %v495_v25 = vld [vmem:[%s2384_s26 + $0x640] sm:$0xff]  ;;  %494 = vst [vmem:[%s2389_s27 + $0xc0] sm:$0xff] %v493_v24 }
  0x2b   : > { %v497_v26 = vld [vmem:[%s2384_s26 + $0x680] sm:$0xff]  ;;  %496 = vst [vmem:[%s2389_s27 + $0xc8] sm:$0xff] %v495_v25 }
  0x2c   : > { %498 = vst [vmem:[%s2389_s27 + $0xd0] sm:$0xff] %v497_v26  ;;  %v499_v27 = vld [vmem:[%s2384_s26 + $0x6c0] sm:$0xff] }
  0x2d   : > { %v501_v28 = vld [vmem:[%s2384_s26 + $0x700] sm:$0xff]  ;;  %500 = vst [vmem:[%s2389_s27 + $0xd8] sm:$0xff] %v499_v27 }
  0x2e   : > { %v503_v29 = vld [vmem:[%s2384_s26 + $0x740] sm:$0xff]  ;;  %502 = vst [vmem:[%s2389_s27 + $0xe0] sm:$0xff] %v501_v28 }
  0x2f   : > { %504 = vst [vmem:[%s2389_s27 + $0xe8] sm:$0xff] %v503_v29  ;;  %v505_v30 = vld [vmem:[%s2384_s26 + $0x780] sm:$0xff] }
  0x30   : > { %v507_v31 = vld [vmem:[%s2384_s26 + $0x7c0] sm:$0xff]  ;;  %506 = vst [vmem:[%s2389_s27 + $0xf0] sm:$0xff] %v505_v30 }
  0x31   : > { %v509_v32 = vld [vmem:[%s2384_s26 + $0x800] sm:$0xff]  ;;  %508 = vst [vmem:[%s2389_s27 + $0xf8] sm:$0xff] %v507_v31 }
  0x32   : > { %510 = vst [vmem:[%s2389_s27 + $0x100] sm:$0xff] %v509_v32  ;;  %v511_v33 = vld [vmem:[%s2384_s26 + $0x840] sm:$0xff] }
  0x33   : > { %v513_v34 = vld [vmem:[%s2384_s26 + $0x880] sm:$0xff]  ;;  %512 = vst [vmem:[%s2389_s27 + $0x108] sm:$0xff] %v511_v33 }
  0x34   : > { %v515_v35 = vld [vmem:[%s2384_s26 + $0x8c0] sm:$0xff]  ;;  %514 = vst [vmem:[%s2389_s27 + $0x110] sm:$0xff] %v513_v34 }
  0x35   : > { %516 = vst [vmem:[%s2389_s27 + $0x118] sm:$0xff] %v515_v35  ;;  %v517_v36 = vld [vmem:[%s2384_s26 + $0x900] sm:$0xff] }
  0x36   : > { %v519_v37 = vld [vmem:[%s2384_s26 + $0x940] sm:$0xff]  ;;  %518 = vst [vmem:[%s2389_s27 + $0x120] sm:$0xff] %v517_v36 }
  0x37   : > { %v521_v38 = vld [vmem:[%s2384_s26 + $0x980] sm:$0xff]  ;;  %520 = vst [vmem:[%s2389_s27 + $0x128] sm:$0xff] %v519_v37 }
  0x38   : > { %522 = vst [vmem:[%s2389_s27 + $0x130] sm:$0xff] %v521_v38  ;;  %v523_v39 = vld [vmem:[%s2384_s26 + $0x9c0] sm:$0xff] }
  0x39   : > { %v525_v40 = vld [vmem:[%s2384_s26 + $0xa00] sm:$0xff]  ;;  %524 = vst [vmem:[%s2389_s27 + $0x138] sm:$0xff] %v523_v39 }
  0x3a   : > { %v527_v41 = vld [vmem:[%s2384_s26 + $0xa40] sm:$0xff]  ;;  %526 = vst [vmem:[%s2389_s27 + $0x140] sm:$0xff] %v525_v40 }
  0x3b   : > { %528 = vst [vmem:[%s2389_s27 + $0x148] sm:$0xff] %v527_v41  ;;  %v529_v42 = vld [vmem:[%s2384_s26 + $0xa80] sm:$0xff] }
  0x3c   : > { %v531_v43 = vld [vmem:[%s2384_s26 + $0xac0] sm:$0xff]  ;;  %530 = vst [vmem:[%s2389_s27 + $0x150] sm:$0xff] %v529_v42 }
  0x3d   : > { %v533_v44 = vld [vmem:[%s2384_s26 + $0xb00] sm:$0xff]  ;;  %532 = vst [vmem:[%s2389_s27 + $0x158] sm:$0xff] %v531_v43 }
  0x3e   : > { %534 = vst [vmem:[%s2389_s27 + $0x160] sm:$0xff] %v533_v44  ;;  %v535_v45 = vld [vmem:[%s2384_s26 + $0xb40] sm:$0xff] }
  0x3f   : > { %v537_v46 = vld [vmem:[%s2384_s26 + $0xb80] sm:$0xff]  ;;  %536 = vst [vmem:[%s2389_s27 + $0x168] sm:$0xff] %v535_v45 }
  0x40   : > { %v539_v47 = vld [vmem:[%s2384_s26 + $0xbc0] sm:$0xff]  ;;  %538 = vst [vmem:[%s2389_s27 + $0x170] sm:$0xff] %v537_v46 }
  0x41   : > { %540 = vst [vmem:[%s2389_s27 + $0x178] sm:$0xff] %v539_v47  ;;  %v541_v48 = vld [vmem:[%s2384_s26 + $0xc00] sm:$0xff] }
  0x42   : > { %v543_v49 = vld [vmem:[%s2384_s26 + $0xc40] sm:$0xff]  ;;  %542 = vst [vmem:[%s2389_s27 + $0x180] sm:$0xff] %v541_v48 }
  0x43   : > { %v545_v50 = vld [vmem:[%s2384_s26 + $0xc80] sm:$0xff]  ;;  %544 = vst [vmem:[%s2389_s27 + $0x188] sm:$0xff] %v543_v49 }
  0x44   : > { %546 = vst [vmem:[%s2389_s27 + $0x190] sm:$0xff] %v545_v50  ;;  %v547_v51 = vld [vmem:[%s2384_s26 + $0xcc0] sm:$0xff] }
  0x45   : > { %v549_v52 = vld [vmem:[%s2384_s26 + $0xd00] sm:$0xff]  ;;  %548 = vst [vmem:[%s2389_s27 + $0x198] sm:$0xff] %v547_v51 }
  0x46   : > { %v551_v53 = vld [vmem:[%s2384_s26 + $0xd40] sm:$0xff]  ;;  %550 = vst [vmem:[%s2389_s27 + $0x1a0] sm:$0xff] %v549_v52 }
  0x47   : > { %552 = vst [vmem:[%s2389_s27 + $0x1a8] sm:$0xff] %v551_v53  ;;  %v553_v54 = vld [vmem:[%s2384_s26 + $0xd80] sm:$0xff] }
  0x48   : > { %v555_v55 = vld [vmem:[%s2384_s26 + $0xdc0] sm:$0xff]  ;;  %554 = vst [vmem:[%s2389_s27 + $0x1b0] sm:$0xff] %v553_v54 }
  0x49   : > { %v557_v56 = vld [vmem:[%s2384_s26 + $0xe00] sm:$0xff]  ;;  %556 = vst [vmem:[%s2389_s27 + $0x1b8] sm:$0xff] %v555_v55 }
  0x4a   : > { %558 = vst [vmem:[%s2389_s27 + $0x1c0] sm:$0xff] %v557_v56  ;;  %v559_v57 = vld [vmem:[%s2384_s26 + $0xe40] sm:$0xff] }
  0x4b   : > { %v561_v58 = vld [vmem:[%s2384_s26 + $0xe80] sm:$0xff]  ;;  %560 = vst [vmem:[%s2389_s27 + $0x1c8] sm:$0xff] %v559_v57 }
  0x4c   : > { %v563_v59 = vld [vmem:[%s2384_s26 + $0xec0] sm:$0xff]  ;;  %562 = vst [vmem:[%s2389_s27 + $0x1d0] sm:$0xff] %v561_v58 }
  0x4d   : > { %564 = vst [vmem:[%s2389_s27 + $0x1d8] sm:$0xff] %v563_v59  ;;  %v565_v60 = vld [vmem:[%s2384_s26 + $0xf00] sm:$0xff] }
  0x4e   : > { %v567_v61 = vld [vmem:[%s2384_s26 + $0xf40] sm:$0xff]  ;;  %566 = vst [vmem:[%s2389_s27 + $0x1e0] sm:$0xff] %v565_v60 }
  0x4f   : > { %v569_v62 = vld [vmem:[%s2384_s26 + $0xf80] sm:$0xff]  ;;  %568 = vst [vmem:[%s2389_s27 + $0x1e8] sm:$0xff] %v567_v61 }
  0x50   : > { %570 = vst [vmem:[%s2389_s27 + $0x1f0] sm:$0xff] %v569_v62  ;;  %v571_v63 = vld [vmem:[%s2384_s26 + $0xfc0] sm:$0xff] }
  0x51   : > { %v573_v0 = vld [vmem:[%s2384_s26 + $0x1000] sm:$0xff]  ;;  %572 = vst [vmem:[%s2389_s27 + $0x1f8] sm:$0xff] %v571_v63 }
  0x52   : > { %v575_v1 = vld [vmem:[%s2384_s26 + $0x1040] sm:$0xff]  ;;  %574 = vst [vmem:[%s2389_s27 + $0x200] sm:$0xff] %v573_v0 }
  0x53   : > { %576 = vst [vmem:[%s2389_s27 + $0x208] sm:$0xff] %v575_v1  ;;  %v577_v2 = vld [vmem:[%s2384_s26 + $0x1080] sm:$0xff] }
  0x54   : > { %v579_v3 = vld [vmem:[%s2384_s26 + $0x10c0] sm:$0xff]  ;;  %578 = vst [vmem:[%s2389_s27 + $0x210] sm:$0xff] %v577_v2 }
  0x55   : > { %v581_v4 = vld [vmem:[%s2384_s26 + $0x1100] sm:$0xff]  ;;  %580 = vst [vmem:[%s2389_s27 + $0x218] sm:$0xff] %v579_v3 }
  0x56   : > { %582 = vst [vmem:[%s2389_s27 + $0x220] sm:$0xff] %v581_v4  ;;  %v583_v5 = vld [vmem:[%s2384_s26 + $0x1140] sm:$0xff] }
  0x57   : > { %v585_v6 = vld [vmem:[%s2384_s26 + $0x1180] sm:$0xff]  ;;  %584 = vst [vmem:[%s2389_s27 + $0x228] sm:$0xff] %v583_v5 }
  0x58   : > { %v587_v7 = vld [vmem:[%s2384_s26 + $0x11c0] sm:$0xff]  ;;  %586 = vst [vmem:[%s2389_s27 + $0x230] sm:$0xff] %v585_v6 }
  0x59   : > { %588 = vst [vmem:[%s2389_s27 + $0x238] sm:$0xff] %v587_v7  ;;  %v589_v8 = vld [vmem:[%s2384_s26 + $0x1200] sm:$0xff] }
  0x5a   : > { %v591_v9 = vld [vmem:[%s2384_s26 + $0x1240] sm:$0xff]  ;;  %590 = vst [vmem:[%s2389_s27 + $0x240] sm:$0xff] %v589_v8 }
  0x5b   : > { %v593_v10 = vld [vmem:[%s2384_s26 + $0x1280] sm:$0xff]  ;;  %592 = vst [vmem:[%s2389_s27 + $0x248] sm:$0xff] %v591_v9 }
  0x5c   : > { %594 = vst [vmem:[%s2389_s27 + $0x250] sm:$0xff] %v593_v10  ;;  %v595_v11 = vld [vmem:[%s2384_s26 + $0x12c0] sm:$0xff] }
  0x5d   : > { %v597_v12 = vld [vmem:[%s2384_s26 + $0x1300] sm:$0xff]  ;;  %596 = vst [vmem:[%s2389_s27 + $0x258] sm:$0xff] %v595_v11 }
  0x5e   : > { %v599_v13 = vld [vmem:[%s2384_s26 + $0x1340] sm:$0xff]  ;;  %598 = vst [vmem:[%s2389_s27 + $0x260] sm:$0xff] %v597_v12 }
  0x5f   : > { %600 = vst [vmem:[%s2389_s27 + $0x268] sm:$0xff] %v599_v13  ;;  %v601_v14 = vld [vmem:[%s2384_s26 + $0x1380] sm:$0xff] }
  0x60   : > { %v603_v15 = vld [vmem:[%s2384_s26 + $0x13c0] sm:$0xff]  ;;  %602 = vst [vmem:[%s2389_s27 + $0x270] sm:$0xff] %v601_v14 }
  0x61   : > { %v605_v16 = vld [vmem:[%s2384_s26 + $0x1400] sm:$0xff]  ;;  %604 = vst [vmem:[%s2389_s27 + $0x278] sm:$0xff] %v603_v15 }
  0x62   : > { %606 = vst [vmem:[%s2389_s27 + $0x280] sm:$0xff] %v605_v16  ;;  %v607_v17 = vld [vmem:[%s2384_s26 + $0x1440] sm:$0xff] }
  0x63   : > { %v609_v18 = vld [vmem:[%s2384_s26 + $0x1480] sm:$0xff]  ;;  %608 = vst [vmem:[%s2389_s27 + $0x288] sm:$0xff] %v607_v17 }
  0x64   : > { %v611_v19 = vld [vmem:[%s2384_s26 + $0x14c0] sm:$0xff]  ;;  %610 = vst [vmem:[%s2389_s27 + $0x290] sm:$0xff] %v609_v18 }
  0x65   : > { %612 = vst [vmem:[%s2389_s27 + $0x298] sm:$0xff] %v611_v19  ;;  %v613_v20 = vld [vmem:[%s2384_s26 + $0x1500] sm:$0xff] }
  0x66   : > { %v615_v21 = vld [vmem:[%s2384_s26 + $0x1540] sm:$0xff]  ;;  %614 = vst [vmem:[%s2389_s27 + $0x2a0] sm:$0xff] %v613_v20 }
  0x67   : > { %v617_v22 = vld [vmem:[%s2384_s26 + $0x1580] sm:$0xff]  ;;  %616 = vst [vmem:[%s2389_s27 + $0x2a8] sm:$0xff] %v615_v21 }
  0x68   : > { %618 = vst [vmem:[%s2389_s27 + $0x2b0] sm:$0xff] %v617_v22  ;;  %v619_v23 = vld [vmem:[%s2384_s26 + $0x15c0] sm:$0xff] }
  0x69   : > { %v621_v24 = vld [vmem:[%s2384_s26 + $0x1600] sm:$0xff]  ;;  %620 = vst [vmem:[%s2389_s27 + $0x2b8] sm:$0xff] %v619_v23 }
  0x6a   : > { %v623_v25 = vld [vmem:[%s2384_s26 + $0x1640] sm:$0xff]  ;;  %622 = vst [vmem:[%s2389_s27 + $0x2c0] sm:$0xff] %v621_v24 }
  0x6b   : > { %624 = vst [vmem:[%s2389_s27 + $0x2c8] sm:$0xff] %v623_v25  ;;  %v625_v26 = vld [vmem:[%s2384_s26 + $0x1680] sm:$0xff] }
  0x6c   : > { %v627_v27 = vld [vmem:[%s2384_s26 + $0x16c0] sm:$0xff]  ;;  %626 = vst [vmem:[%s2389_s27 + $0x2d0] sm:$0xff] %v625_v26 }
  0x6d   : > { %v629_v28 = vld [vmem:[%s2384_s26 + $0x1700] sm:$0xff]  ;;  %628 = vst [vmem:[%s2389_s27 + $0x2d8] sm:$0xff] %v627_v27 }
  0x6e   : > { %630 = vst [vmem:[%s2389_s27 + $0x2e0] sm:$0xff] %v629_v28  ;;  %v631_v29 = vld [vmem:[%s2384_s26 + $0x1740] sm:$0xff] }
  0x6f   : > { %v633_v30 = vld [vmem:[%s2384_s26 + $0x1780] sm:$0xff]  ;;  %632 = vst [vmem:[%s2389_s27 + $0x2e8] sm:$0xff] %v631_v29 }
  0x70   : > { %v635_v31 = vld [vmem:[%s2384_s26 + $0x17c0] sm:$0xff]  ;;  %634 = vst [vmem:[%s2389_s27 + $0x2f0] sm:$0xff] %v633_v30 }
  0x71   : > { %636 = vst [vmem:[%s2389_s27 + $0x2f8] sm:$0xff] %v635_v31  ;;  %v637_v32 = vld [vmem:[%s2384_s26 + $0x1800] sm:$0xff] }
  0x72   : > { %v639_v33 = vld [vmem:[%s2384_s26 + $0x1840] sm:$0xff]  ;;  %638 = vst [vmem:[%s2389_s27 + $0x300] sm:$0xff] %v637_v32 }
  0x73   : > { %v641_v34 = vld [vmem:[%s2384_s26 + $0x1880] sm:$0xff]  ;;  %640 = vst [vmem:[%s2389_s27 + $0x308] sm:$0xff] %v639_v33 }
  0x74   : > { %642 = vst [vmem:[%s2389_s27 + $0x310] sm:$0xff] %v641_v34  ;;  %v643_v35 = vld [vmem:[%s2384_s26 + $0x18c0] sm:$0xff] }
  0x75   : > { %v645_v36 = vld [vmem:[%s2384_s26 + $0x1900] sm:$0xff]  ;;  %644 = vst [vmem:[%s2389_s27 + $0x318] sm:$0xff] %v643_v35 }
  0x76   : > { %v647_v37 = vld [vmem:[%s2384_s26 + $0x1940] sm:$0xff]  ;;  %646 = vst [vmem:[%s2389_s27 + $0x320] sm:$0xff] %v645_v36 }
  0x77   : > { %648 = vst [vmem:[%s2389_s27 + $0x328] sm:$0xff] %v647_v37  ;;  %v649_v38 = vld [vmem:[%s2384_s26 + $0x1980] sm:$0xff] }
  0x78   : > { %v651_v39 = vld [vmem:[%s2384_s26 + $0x19c0] sm:$0xff]  ;;  %650 = vst [vmem:[%s2389_s27 + $0x330] sm:$0xff] %v649_v38 }
  0x79   : > { %v653_v40 = vld [vmem:[%s2384_s26 + $0x1a00] sm:$0xff]  ;;  %652 = vst [vmem:[%s2389_s27 + $0x338] sm:$0xff] %v651_v39 }
  0x7a   : > { %654 = vst [vmem:[%s2389_s27 + $0x340] sm:$0xff] %v653_v40  ;;  %v655_v41 = vld [vmem:[%s2384_s26 + $0x1a40] sm:$0xff] }
  0x7b   : > { %v657_v42 = vld [vmem:[%s2384_s26 + $0x1a80] sm:$0xff]  ;;  %656 = vst [vmem:[%s2389_s27 + $0x348] sm:$0xff] %v655_v41 }
  0x7c   : > { %v659_v43 = vld [vmem:[%s2384_s26 + $0x1ac0] sm:$0xff]  ;;  %658 = vst [vmem:[%s2389_s27 + $0x350] sm:$0xff] %v657_v42 }
  0x7d   : > { %660 = vst [vmem:[%s2389_s27 + $0x358] sm:$0xff] %v659_v43  ;;  %v661_v44 = vld [vmem:[%s2384_s26 + $0x1b00] sm:$0xff] }
  0x7e   : > { %v663_v45 = vld [vmem:[%s2384_s26 + $0x1b40] sm:$0xff]  ;;  %662 = vst [vmem:[%s2389_s27 + $0x360] sm:$0xff] %v661_v44 }
  0x7f   : > { %v665_v46 = vld [vmem:[%s2384_s26 + $0x1b80] sm:$0xff]  ;;  %664 = vst [vmem:[%s2389_s27 + $0x368] sm:$0xff] %v663_v45 }
  0x80   : > { %666 = vst [vmem:[%s2389_s27 + $0x370] sm:$0xff] %v665_v46  ;;  %v667_v47 = vld [vmem:[%s2384_s26 + $0x1bc0] sm:$0xff] }
  0x81   : > { %v669_v48 = vld [vmem:[%s2384_s26 + $0x1c00] sm:$0xff]  ;;  %668 = vst [vmem:[%s2389_s27 + $0x378] sm:$0xff] %v667_v47 }
  0x82   : > { %v671_v49 = vld [vmem:[%s2384_s26 + $0x1c40] sm:$0xff]  ;;  %670 = vst [vmem:[%s2389_s27 + $0x380] sm:$0xff] %v669_v48 }
  0x83   : > { %672 = vst [vmem:[%s2389_s27 + $0x388] sm:$0xff] %v671_v49  ;;  %v673_v50 = vld [vmem:[%s2384_s26 + $0x1c80] sm:$0xff] }
  0x84   : > { %v675_v51 = vld [vmem:[%s2384_s26 + $0x1cc0] sm:$0xff]  ;;  %674 = vst [vmem:[%s2389_s27 + $0x390] sm:$0xff] %v673_v50 }
  0x85   : > { %v677_v52 = vld [vmem:[%s2384_s26 + $0x1d00] sm:$0xff]  ;;  %676 = vst [vmem:[%s2389_s27 + $0x398] sm:$0xff] %v675_v51 }
  0x86   : > { %678 = vst [vmem:[%s2389_s27 + $0x3a0] sm:$0xff] %v677_v52  ;;  %v679_v53 = vld [vmem:[%s2384_s26 + $0x1d40] sm:$0xff] }
  0x87   : > { %v681_v54 = vld [vmem:[%s2384_s26 + $0x1d80] sm:$0xff]  ;;  %680 = vst [vmem:[%s2389_s27 + $0x3a8] sm:$0xff] %v679_v53 }
  0x88   : > { %v683_v55 = vld [vmem:[%s2384_s26 + $0x1dc0] sm:$0xff]  ;;  %682 = vst [vmem:[%s2389_s27 + $0x3b0] sm:$0xff] %v681_v54 }
  0x89   : > { %684 = vst [vmem:[%s2389_s27 + $0x3b8] sm:$0xff] %v683_v55  ;;  %v685_v56 = vld [vmem:[%s2384_s26 + $0x1e00] sm:$0xff] }
  0x8a   : > { %v687_v57 = vld [vmem:[%s2384_s26 + $0x1e40] sm:$0xff]  ;;  %686 = vst [vmem:[%s2389_s27 + $0x3c0] sm:$0xff] %v685_v56 }
  0x8b   : > { %v689_v58 = vld [vmem:[%s2384_s26 + $0x1e80] sm:$0xff]  ;;  %688 = vst [vmem:[%s2389_s27 + $0x3c8] sm:$0xff] %v687_v57 }
  0x8c   : > { %690 = vst [vmem:[%s2389_s27 + $0x3d0] sm:$0xff] %v689_v58  ;;  %v691_v59 = vld [vmem:[%s2384_s26 + $0x1ec0] sm:$0xff] }
  0x8d   : > { %v693_v60 = vld [vmem:[%s2384_s26 + $0x1f00] sm:$0xff]  ;;  %692 = vst [vmem:[%s2389_s27 + $0x3d8] sm:$0xff] %v691_v59 }
  0x8e   : > { %v695_v61 = vld [vmem:[%s2384_s26 + $0x1f40] sm:$0xff]  ;;  %694 = vst [vmem:[%s2389_s27 + $0x3e0] sm:$0xff] %v693_v60 }
  0x8f   : > { %696 = vst [vmem:[%s2389_s27 + $0x3e8] sm:$0xff] %v695_v61  ;;  %v697_v62 = vld [vmem:[%s2384_s26 + $0x1f80] sm:$0xff] }
  0x90   : > { %v699_v63 = vld [vmem:[%s2384_s26 + $0x1fc0] sm:$0xff]  ;;  %698 = vst [vmem:[%s2389_s27 + $0x3f0] sm:$0xff] %v697_v62 }
  0x91   : > { %700 = vst [vmem:[%s2389_s27 + $0x3f8] sm:$0xff] %v699_v63 }
  0x92 PF: > { %p1883_p6 = scmp.ge.s32.totalorder %s2319_s16, 1  ;;  %p713_p7 = scmp.lt.s32.totalorder %s2319_s16, 9 }
  0x94   : > { %p714_p8 = pnand %p1883_p6, %p713_p7 }
  0x95   : > { %s720_s28 = sand.u32 (!%p714_p8), 1, %s2303_s12   ;;  %v2650_v0 = vld [vmem:[%s2835_s0] sm:$0xff] (!%p714_p8)  ;;  %v2655_v1 = vld [vmem:[%s2835_s0 + $0x10] sm:$0xff] (!%p714_p8)  ;;  %s1885_s12 = sshll.u32 (!%p714_p8), %s2311_s14, 1 }
  0x96   : > { %717 = sbr.rel (%p714_p8) target bundleno = 503 (0x1f7), region = 66  ;;  %s1884_s6 = sshll.u32 (!%p714_p8), %s720_s28, 10  ;;  %v1889_v2 = vcombine.high (!%p714_p8), %v2650_v0, %v2650_v0  ;;  %v1893_v3 = vcombine.high (!%p714_p8), %v2655_v1, %v2655_v1 }
  0x97   : > { %s2661_s7 = scalar_lea.vmem (!%p714_p8), [#allocation2], %s1884_s6  ;;  %p763_p9 = scmp.lt.s32.totalorder (!%p714_p8), %s1885_s12, 15 }
  0x98   : > { %v2081_v4 = vld [vmem:[%s2661_s7 + $0x4] ss:$8 sps:$4 sm:$0xff] (!%p714_p8)   ;;  %1621 = vmatprep.mubr.bf16.mxu1 (!%p714_p8), %v1889_v2  ;;  %1703 = vmatprep.mubr.bf16.mxu0 (!%p714_p8), %v1893_v3  ;;  %v2085_v6 = vld [vmem:[%s2661_s7] ss:$8 sps:$4 sm:$0xff] (!%p714_p8)   ;;  %v2087_v8 = vld [vmem:[%s2661_s7 + $0x14] ss:$8 sps:$4 sm:$0xff] (!%p714_p8)  }
  0x99   : > { %v2083_v5 = vld [vmem:[%s2661_s7 + $0x204] ss:$8 sps:$4 sm:$0xff] (!%p714_p8)   ;;  %1589 = vmatprep.subr.bf16.mxu1 (!%p714_p8), %v2081_v4  ;;  %v2086_v7 = vld [vmem:[%s2661_s7 + $0x200] ss:$8 sps:$4 sm:$0xff] (!%p714_p8)   ;;  %v2089_v9 = vld [vmem:[%s2661_s7 + $0x214] ss:$8 sps:$4 sm:$0xff] (!%p714_p8)  }
  0x9a   : > { %1671 = vmatprep.subr.bf16.mxu0 (!%p714_p8), %v2083_v5  ;;  %1590 = vmatpush1.bf16.msra.mxu1 (!%p714_p8), %v2085_v6  ;;  %v2091_v10 = vld [vmem:[%s2661_s7 + $0x10] ss:$8 sps:$4 sm:$0xff] (!%p714_p8)   ;;  %v2093_v12 = vld [vmem:[%s2661_s7 + $0x24] ss:$8 sps:$4 sm:$0xff] (!%p714_p8)   ;;  %v2097_v14 = vld [vmem:[%s2661_s7 + $0x20] ss:$8 sps:$4 sm:$0xff] (!%p714_p8)  }
  0x9b   : > { %1672 = vmatpush1.bf16.msra.mxu0 (!%p714_p8), %v2086_v7  ;;  %1591 = vmatprep.subr.bf16.mxu1 (!%p714_p8), %v2087_v8  ;;  %v2092_v11 = vld [vmem:[%s2661_s7 + $0x210] ss:$8 sps:$4 sm:$0xff] (!%p714_p8)   ;;  %v2095_v13 = vld [vmem:[%s2661_s7 + $0x224] ss:$8 sps:$4 sm:$0xff] (!%p714_p8)   ;;  %v2098_v15 = vld [vmem:[%s2661_s7 + $0x220] ss:$8 sps:$4 sm:$0xff] (!%p714_p8)  }
  0x9c   : > { %1673 = vmatprep.subr.bf16.mxu0 (!%p714_p8), %v2089_v9  ;;  %v2099_v16 = vld [vmem:[%s2661_s7 + $0x34] ss:$8 sps:$4 sm:$0xff] (!%p714_p8)   ;;  %v2103_v18 = vld [vmem:[%s2661_s7 + $0x30] ss:$8 sps:$4 sm:$0xff] (!%p714_p8)   ;;  %v2105_v20 = vld [vmem:[%s2661_s7 + $0x44] ss:$8 sps:$4 sm:$0xff] (!%p714_p8)  }
  0x9d   : > { %v2101_v17 = vld [vmem:[%s2661_s7 + $0x234] ss:$8 sps:$4 sm:$0xff]   ;;  %v2104_v19 = vld [vmem:[%s2661_s7 + $0x230] ss:$8 sps:$4 sm:$0xff]   ;;  %v2107_v21 = vld [vmem:[%s2661_s7 + $0x244] ss:$8 sps:$4 sm:$0xff]  }
  0x9e   : > { %1592 = vmatpush1.bf16.msra.mxu1 %v2091_v10  ;;  %v2109_v22 = vld [vmem:[%s2661_s7 + $0x40] ss:$8 sps:$4 sm:$0xff]   ;;  %v2111_v24 = vld [vmem:[%s2661_s7 + $0x54] ss:$8 sps:$4 sm:$0xff]   ;;  %v2115_v26 = vld [vmem:[%s2661_s7 + $0x50] ss:$8 sps:$4 sm:$0xff]   ;;  %v1888_v10 = vcombine.low %v2650_v0, %v2650_v0 }
  0x9f   : > { %1674 = vmatpush1.bf16.msra.mxu0 %v2092_v11  ;;  %1593 = vmatprep.subr.bf16.mxu1 %v2093_v12  ;;  %v2110_v23 = vld [vmem:[%s2661_s7 + $0x240] ss:$8 sps:$4 sm:$0xff]   ;;  %v2113_v25 = vld [vmem:[%s2661_s7 + $0x254] ss:$8 sps:$4 sm:$0xff]   ;;  %v2116_v27 = vld [vmem:[%s2661_s7 + $0x250] ss:$8 sps:$4 sm:$0xff]   ;;  %v1892_v12 = vcombine.low %v2655_v1, %v2655_v1 }
  0xa0   : > { %1675 = vmatprep.subr.bf16.mxu0 %v2095_v13  ;;  %v2117_v28 = vld [vmem:[%s2661_s7 + $0x64] ss:$8 sps:$4 sm:$0xff]   ;;  %v2121_v30 = vld [vmem:[%s2661_s7 + $0x60] ss:$8 sps:$4 sm:$0xff]   ;;  %v2123_v32 = vld [vmem:[%s2661_s7 + $0x74] ss:$8 sps:$4 sm:$0xff]  }
  0xa1   : > { %v2119_v29 = vld [vmem:[%s2661_s7 + $0x264] ss:$8 sps:$4 sm:$0xff]   ;;  %v2122_v31 = vld [vmem:[%s2661_s7 + $0x260] ss:$8 sps:$4 sm:$0xff]   ;;  %v2125_v33 = vld [vmem:[%s2661_s7 + $0x274] ss:$8 sps:$4 sm:$0xff]  }
  0xa2   : > { %1594 = vmatpush1.bf16.msra.mxu1 %v2097_v14  ;;  %v2127_v34 = vld [vmem:[%s2661_s7 + $0x70] ss:$8 sps:$4 sm:$0xff]   ;;  %v2129_v36 = vld [vmem:[%s2661_s7 + $0x84] ss:$8 sps:$4 sm:$0xff]   ;;  %v2133_v38 = vld [vmem:[%s2661_s7 + $0x80] ss:$8 sps:$4 sm:$0xff]  }
  0xa3   : > { %1676 = vmatpush1.bf16.msra.mxu0 %v2098_v15  ;;  %1595 = vmatprep.subr.bf16.mxu1 %v2099_v16  ;;  %v2128_v35 = vld [vmem:[%s2661_s7 + $0x270] ss:$8 sps:$4 sm:$0xff]   ;;  %v2131_v37 = vld [vmem:[%s2661_s7 + $0x284] ss:$8 sps:$4 sm:$0xff]   ;;  %v2134_v39 = vld [vmem:[%s2661_s7 + $0x280] ss:$8 sps:$4 sm:$0xff]  }
  0xa4   : > { %1677 = vmatprep.subr.bf16.mxu0 %v2101_v17  ;;  %v2135_v40 = vld [vmem:[%s2661_s7 + $0x94] ss:$8 sps:$4 sm:$0xff]   ;;  %v2139_v42 = vld [vmem:[%s2661_s7 + $0x90] ss:$8 sps:$4 sm:$0xff]   ;;  %v2141_v44 = vld [vmem:[%s2661_s7 + $0xa4] ss:$8 sps:$4 sm:$0xff]  }
  0xa5   : > { %v2137_v41 = vld [vmem:[%s2661_s7 + $0x294] ss:$8 sps:$4 sm:$0xff]   ;;  %v2140_v43 = vld [vmem:[%s2661_s7 + $0x290] ss:$8 sps:$4 sm:$0xff]   ;;  %v2143_v45 = vld [vmem:[%s2661_s7 + $0x2a4] ss:$8 sps:$4 sm:$0xff]  }
  0xa6   : > { %1596 = vmatpush1.bf16.msra.mxu1 %v2103_v18  ;;  %v2145_v46 = vld [vmem:[%s2661_s7 + $0xa0] ss:$8 sps:$4 sm:$0xff]   ;;  %v2147_v48 = vld [vmem:[%s2661_s7 + $0xb4] ss:$8 sps:$4 sm:$0xff]   ;;  %v2151_v50 = vld [vmem:[%s2661_s7 + $0xb0] ss:$8 sps:$4 sm:$0xff]  }
  0xa7   : > { %1678 = vmatpush1.bf16.msra.mxu0 %v2104_v19  ;;  %1597 = vmatprep.subr.bf16.mxu1 %v2105_v20  ;;  %v2146_v47 = vld [vmem:[%s2661_s7 + $0x2a0] ss:$8 sps:$4 sm:$0xff]   ;;  %v2149_v49 = vld [vmem:[%s2661_s7 + $0x2b4] ss:$8 sps:$4 sm:$0xff]   ;;  %v2152_v51 = vld [vmem:[%s2661_s7 + $0x2b0] ss:$8 sps:$4 sm:$0xff]  }
  0xa8   : > { %1679 = vmatprep.subr.bf16.mxu0 %v2107_v21  ;;  %v2153_v52 = vld [vmem:[%s2661_s7 + $0xc4] ss:$8 sps:$4 sm:$0xff]   ;;  %v2157_v54 = vld [vmem:[%s2661_s7 + $0xc0] ss:$8 sps:$4 sm:$0xff]   ;;  %v2159_v56 = vld [vmem:[%s2661_s7 + $0xd4] ss:$8 sps:$4 sm:$0xff]  }
  0xa9   : > { %v2155_v53 = vld [vmem:[%s2661_s7 + $0x2c4] ss:$8 sps:$4 sm:$0xff]   ;;  %v2158_v55 = vld [vmem:[%s2661_s7 + $0x2c0] ss:$8 sps:$4 sm:$0xff]   ;;  %v2161_v57 = vld [vmem:[%s2661_s7 + $0x2d4] ss:$8 sps:$4 sm:$0xff]  }
  0xaa   : > { %1598 = vmatpush1.bf16.msra.mxu1 %v2109_v22  ;;  %v2163_v58 = vld [vmem:[%s2661_s7 + $0xd0] ss:$8 sps:$4 sm:$0xff]   ;;  %v2165_v60 = vld [vmem:[%s2661_s7 + $0xe4] ss:$8 sps:$4 sm:$0xff]   ;;  %v2169_v62 = vld [vmem:[%s2661_s7 + $0xe0] ss:$8 sps:$4 sm:$0xff]  }
  0xab   : > { %1680 = vmatpush1.bf16.msra.mxu0 %v2110_v23  ;;  %1599 = vmatprep.subr.bf16.mxu1 %v2111_v24  ;;  %v2164_v59 = vld [vmem:[%s2661_s7 + $0x2d0] ss:$8 sps:$4 sm:$0xff]   ;;  %v2167_v61 = vld [vmem:[%s2661_s7 + $0x2e4] ss:$8 sps:$4 sm:$0xff]   ;;  %v2170_v63 = vld [vmem:[%s2661_s7 + $0x2e0] ss:$8 sps:$4 sm:$0xff]  }
  0xac   : > { %1681 = vmatprep.subr.bf16.mxu0 %v2113_v25  ;;  %v2171_v2 = vld [vmem:[%s2661_s7 + $0xf4] ss:$8 sps:$4 sm:$0xff]   ;;  %v2175_v4 = vld [vmem:[%s2661_s7 + $0xf0] ss:$8 sps:$4 sm:$0xff]   ;;  %v2181_v6 = vld [vmem:[%s2661_s7 + $0x104] ss:$8 sps:$4 sm:$0xff]  }
  0xad   : > { %v2173_v3 = vld [vmem:[%s2661_s7 + $0x2f4] ss:$8 sps:$4 sm:$0xff]   ;;  %v2176_v5 = vld [vmem:[%s2661_s7 + $0x2f0] ss:$8 sps:$4 sm:$0xff]   ;;  %v2186_v7 = vld [vmem:[%s2661_s7 + $0x304] ss:$8 sps:$4 sm:$0xff]  }
  0xae   : > { %1600 = vmatpush1.bf16.msra.mxu1 %v2115_v26  ;;  %v2732_v8 = vld [vmem:[%s2835_s0 + $0x8] sm:$0xff]  ;;  %v2737_v9 = vld [vmem:[%s2835_s0 + $0x18] sm:$0xff]  ;;  %s2846_s12 = smov (!%p763_p9, %s1885_s12), 15 }
  0xaf   : > { %1682 = vmatpush1.bf16.msra.mxu0 %v2116_v27  ;;  %1601 = vmatprep.subr.bf16.mxu1 %v2117_v28  ;;  %v2179_v11 = vld [vmem:[%s2661_s7 + $0x100] ss:$8 sps:$4 sm:$0xff]   ;;  %v2189_v14 = vld [vmem:[%s2661_s7 + $0x114] ss:$8 sps:$4 sm:$0xff]   ;;  %v1891_v16 = vcombine.high %v2732_v8, %v2732_v8  ;;  %v1895_v0 = vcombine.high %v2737_v9, %v2737_v9  ;;  %v2187_v1 = vld [vmem:[%s2661_s7 + $0x110] ss:$8 sps:$4 sm:$0xff]   ;;  %s765_s21 = scalar_lea.vmem %s2837_s2, %s2846_s12 }
  0xb0   : > { %1683 = vmatprep.subr.bf16.mxu0 %v2119_v29  ;;  %v2184_v13 = vld [vmem:[%s2661_s7 + $0x300] ss:$8 sps:$4 sm:$0xff]   ;;  %v2192_v15 = vld [vmem:[%s2661_s7 + $0x314] ss:$8 sps:$4 sm:$0xff]   ;;  %v2190_v17 = vld [vmem:[%s2661_s7 + $0x310] ss:$8 sps:$4 sm:$0xff]  }
  0xb1   : > { %v2195_v18 = vld [vmem:[%s2661_s7 + $0x124] ss:$8 sps:$4 sm:$0xff]   ;;  %v2193_v20 = vld [vmem:[%s2661_s7 + $0x120] ss:$8 sps:$4 sm:$0xff]   ;;  %v2201_v22 = vld [vmem:[%s2661_s7 + $0x134] ss:$8 sps:$4 sm:$0xff]  }
  0xb2   : > { %1602 = vmatpush1.bf16.msra.mxu1 %v2121_v30  ;;  %v2198_v19 = vld [vmem:[%s2661_s7 + $0x324] ss:$8 sps:$4 sm:$0xff]   ;;  %v2196_v21 = vld [vmem:[%s2661_s7 + $0x320] ss:$8 sps:$4 sm:$0xff]   ;;  %v2204_v23 = vld [vmem:[%s2661_s7 + $0x334] ss:$8 sps:$4 sm:$0xff]  }
  0xb3   : > { %1684 = vmatpush1.bf16.msra.mxu0 %v2122_v31  ;;  %1603 = vmatprep.subr.bf16.mxu1 %v2123_v32  ;;  %v2199_v24 = vld [vmem:[%s2661_s7 + $0x130] ss:$8 sps:$4 sm:$0xff]   ;;  %v2207_v26 = vld [vmem:[%s2661_s7 + $0x144] ss:$8 sps:$4 sm:$0xff]   ;;  %v2205_v28 = vld [vmem:[%s2661_s7 + $0x140] ss:$8 sps:$4 sm:$0xff]  }
  0xb4   : > { %1685 = vmatprep.subr.bf16.mxu0 %v2125_v33  ;;  %v2202_v25 = vld [vmem:[%s2661_s7 + $0x330] ss:$8 sps:$4 sm:$0xff]   ;;  %v2210_v27 = vld [vmem:[%s2661_s7 + $0x344] ss:$8 sps:$4 sm:$0xff]   ;;  %v2208_v29 = vld [vmem:[%s2661_s7 + $0x340] ss:$8 sps:$4 sm:$0xff]  }
  0xb5   : > { %v2213_v30 = vld [vmem:[%s2661_s7 + $0x154] ss:$8 sps:$4 sm:$0xff]   ;;  %v2211_v32 = vld [vmem:[%s2661_s7 + $0x150] ss:$8 sps:$4 sm:$0xff]   ;;  %s1887_s14 = sshll.u32 %s2846_s12, 2 }
  0xb6   : > { %1604 = vmatpush1.bf16.msra.mxu1 %v2127_v34  ;;  %v2216_v31 = vld [vmem:[%s2661_s7 + $0x354] ss:$8 sps:$4 sm:$0xff]   ;;  %v2214_v33 = vld [vmem:[%s2661_s7 + $0x350] ss:$8 sps:$4 sm:$0xff]   ;;  %v2219_v34 = vld [vmem:[%s2661_s7 + $0x164] ss:$8 sps:$4 sm:$0xff]   ;;  %s775_s24 = scalar_lea.vmem %s2838_s3, %s1887_s14 }
  0xb7   : > { %1686 = vmatpush1.bf16.msra.mxu0 %v2128_v35  ;;  %1605 = vmatprep.subr.bf16.mxu1 %v2129_v36  ;;  %v2222_v35 = vld [vmem:[%s2661_s7 + $0x364] ss:$8 sps:$4 sm:$0xff]   ;;  %v2217_v36 = vld [vmem:[%s2661_s7 + $0x160] ss:$8 sps:$4 sm:$0xff]  }
  0xb8   : > { %1687 = vmatprep.subr.bf16.mxu0 %v2131_v37  ;;  %v2220_v37 = vld [vmem:[%s2661_s7 + $0x360] ss:$8 sps:$4 sm:$0xff]  }
  0xba   : > { %1606 = vmatpush1.bf16.msra.mxu1 %v2133_v38  ;;  %v2225_v38 = vld [vmem:[%s2661_s7 + $0x174] ss:$8 sps:$4 sm:$0xff]  }
  0xbb   : > { %1688 = vmatpush1.bf16.msra.mxu0 %v2134_v39  ;;  %1607 = vmatprep.subr.bf16.mxu1 %v2135_v40  ;;  %v2228_v39 = vld [vmem:[%s2661_s7 + $0x374] ss:$8 sps:$4 sm:$0xff]   ;;  %v2223_v40 = vld [vmem:[%s2661_s7 + $0x170] ss:$8 sps:$4 sm:$0xff]  }
  0xbc   : > { %1689 = vmatprep.subr.bf16.mxu0 %v2137_v41  ;;  %v2226_v41 = vld [vmem:[%s2661_s7 + $0x370] ss:$8 sps:$4 sm:$0xff]  }
  0xbe   : > { %1608 = vmatpush1.bf16.msra.mxu1 %v2139_v42  ;;  %v2231_v42 = vld [vmem:[%s2661_s7 + $0x184] ss:$8 sps:$4 sm:$0xff]  }
  0xbf   : > { %1690 = vmatpush1.bf16.msra.mxu0 %v2140_v43  ;;  %1609 = vmatprep.subr.bf16.mxu1 %v2141_v44  ;;  %v2234_v43 = vld [vmem:[%s2661_s7 + $0x384] ss:$8 sps:$4 sm:$0xff]   ;;  %v2229_v44 = vld [vmem:[%s2661_s7 + $0x180] ss:$8 sps:$4 sm:$0xff]  }
  0xc0   : > { %1691 = vmatprep.subr.bf16.mxu0 %v2143_v45  ;;  %v2232_v45 = vld [vmem:[%s2661_s7 + $0x380] ss:$8 sps:$4 sm:$0xff]  }
  0xc2   : > { %1610 = vmatpush1.bf16.msra.mxu1 %v2145_v46  ;;  %v2237_v46 = vld [vmem:[%s2661_s7 + $0x194] ss:$8 sps:$4 sm:$0xff]  }
  0xc3   : > { %1692 = vmatpush1.bf16.msra.mxu0 %v2146_v47  ;;  %1611 = vmatprep.subr.bf16.mxu1 %v2147_v48  ;;  %v2240_v47 = vld [vmem:[%s2661_s7 + $0x394] ss:$8 sps:$4 sm:$0xff]   ;;  %v2235_v48 = vld [vmem:[%s2661_s7 + $0x190] ss:$8 sps:$4 sm:$0xff]  }
  0xc4   : > { %1693 = vmatprep.subr.bf16.mxu0 %v2149_v49  ;;  %v2238_v49 = vld [vmem:[%s2661_s7 + $0x390] ss:$8 sps:$4 sm:$0xff]  }
  0xc6   : > { %1612 = vmatpush1.bf16.msra.mxu1 %v2151_v50  ;;  %v2243_v50 = vld [vmem:[%s2661_s7 + $0x1a4] ss:$8 sps:$4 sm:$0xff]  }
  0xc7   : > { %1694 = vmatpush1.bf16.msra.mxu0 %v2152_v51  ;;  %1613 = vmatprep.subr.bf16.mxu1 %v2153_v52  ;;  %v2246_v51 = vld [vmem:[%s2661_s7 + $0x3a4] ss:$8 sps:$4 sm:$0xff]   ;;  %v2241_v52 = vld [vmem:[%s2661_s7 + $0x1a0] ss:$8 sps:$4 sm:$0xff]  }
  0xc8   : > { %1695 = vmatprep.subr.bf16.mxu0 %v2155_v53  ;;  %v2244_v53 = vld [vmem:[%s2661_s7 + $0x3a0] ss:$8 sps:$4 sm:$0xff]  }
  0xca   : > { %1614 = vmatpush1.bf16.msra.mxu1 %v2157_v54  ;;  %v2249_v54 = vld [vmem:[%s2661_s7 + $0x1b4] ss:$8 sps:$4 sm:$0xff]  }
  0xcb   : > { %1696 = vmatpush1.bf16.msra.mxu0 %v2158_v55  ;;  %1615 = vmatprep.subr.bf16.mxu1 %v2159_v56  ;;  %v2252_v55 = vld [vmem:[%s2661_s7 + $0x3b4] ss:$8 sps:$4 sm:$0xff]   ;;  %v2247_v56 = vld [vmem:[%s2661_s7 + $0x1b0] ss:$8 sps:$4 sm:$0xff]  }
  0xcc   : > { %1697 = vmatprep.subr.bf16.mxu0 %v2161_v57  ;;  %v2250_v57 = vld [vmem:[%s2661_s7 + $0x3b0] ss:$8 sps:$4 sm:$0xff]  }
  0xce   : > { %1616 = vmatpush1.bf16.msra.mxu1 %v2163_v58  ;;  %v2255_v58 = vld [vmem:[%s2661_s7 + $0x1c4] ss:$8 sps:$4 sm:$0xff]  }
  0xcf   : > { %1698 = vmatpush1.bf16.msra.mxu0 %v2164_v59  ;;  %1617 = vmatprep.subr.bf16.mxu1 %v2165_v60  ;;  %v2258_v59 = vld [vmem:[%s2661_s7 + $0x3c4] ss:$8 sps:$4 sm:$0xff]   ;;  %v2253_v60 = vld [vmem:[%s2661_s7 + $0x1c0] ss:$8 sps:$4 sm:$0xff]  }
  0xd0   : > { %1699 = vmatprep.subr.bf16.mxu0 %v2167_v61  ;;  %v2256_v61 = vld [vmem:[%s2661_s7 + $0x3c0] ss:$8 sps:$4 sm:$0xff]  }
  0xd2   : > { %1618 = vmatpush1.bf16.msra.mxu1 %v2169_v62  ;;  %v2261_v62 = vld [vmem:[%s2661_s7 + $0x1d4] ss:$8 sps:$4 sm:$0xff]  }
  0xd3   : > { %1700 = vmatpush1.bf16.msra.mxu0 %v2170_v63  ;;  %1619 = vmatprep.subr.bf16.mxu1 %v2171_v2  ;;  %v2264_v63 = vld [vmem:[%s2661_s7 + $0x3d4] ss:$8 sps:$4 sm:$0xff]   ;;  %v2259_v2 = vld [vmem:[%s2661_s7 + $0x1d0] ss:$8 sps:$4 sm:$0xff]  }
  0xd4   : > { %1701 = vmatprep.subr.bf16.mxu0 %v2173_v3  ;;  %v2262_v3 = vld [vmem:[%s2661_s7 + $0x3d0] ss:$8 sps:$4 sm:$0xff]  }
  0xd6   : > { %1620 = vmatpush1.bf16.msra.mxu1 %v2175_v4  ;;  %v2267_v4 = vld [vmem:[%s2661_s7 + $0x1e4] ss:$8 sps:$4 sm:$0xff]  }
  0xd7   : > { %1702 = vmatpush1.bf16.msra.mxu0 %v2176_v5  ;;  %1630 = vmatprep.subr.bf16.mxu1 %v2181_v6  ;;  %v2270_v5 = vld [vmem:[%s2661_s7 + $0x3e4] ss:$8 sps:$4 sm:$0xff]   ;;  %v2265_v6 = vld [vmem:[%s2661_s7 + $0x1e0] ss:$8 sps:$4 sm:$0xff]  }
  0xd8   : > { %1712 = vmatprep.subr.bf16.mxu0 %v2186_v7  ;;  %v2268_v7 = vld [vmem:[%s2661_s7 + $0x3e0] ss:$8 sps:$4 sm:$0xff]  }
  0xd9   : > { %1622 = vmatmul.mubr.bf16.vlgmr.msra.gmra.mrb[0].mxu1 %v1888_v10  ;;  %v2273_v10 = vld [vmem:[%s2661_s7 + $0x1f4] ss:$8 sps:$4 sm:$0xff]  }
  0xda   : > { %1704 = vmatmul.mubr.bf16.vlgmr.msra.gmra.mrb[0].mxu0 %v1892_v12  ;;  %1631 = vmatpush1.bf16.msra.mxu1 %v2179_v11  ;;  %v2276_v11 = vld [vmem:[%s2661_s7 + $0x3f4] ss:$8 sps:$4 sm:$0xff]   ;;  %v2271_v12 = vld [vmem:[%s2661_s7 + $0x1f0] ss:$8 sps:$4 sm:$0xff]  }
  0xdb   : > { %1713 = vmatpush1.bf16.msra.mxu0 %v2184_v13  ;;  %1632 = vmatprep.subr.bf16.mxu1 %v2189_v14  ;;  %v2274_v13 = vld [vmem:[%s2661_s7 + $0x3f0] ss:$8 sps:$4 sm:$0xff]   ;;  %v1890_v14 = vcombine.low %v2732_v8, %v2732_v8 }
  0xdc   : > { %1714 = vmatprep.subr.bf16.mxu0 %v2192_v15  ;;  %1662 = vmatprep.mubr.bf16.mxu1 %v1891_v16  ;;  %v1894_v15 = vcombine.low %v2737_v9, %v2737_v9  ;;  %v911_v16 = vlaneseq }
  0xdd   : > { %1744 = vmatprep.mubr.bf16.mxu0 %v1895_v0 }
  0xde   : > { %1633 = vmatpush1.bf16.msra.mxu1 %v2187_v1  ;;  %v912_v0 = vshrl.u32 %v911_v16, 7 }
  0xdf   : > { %1715 = vmatpush1.bf16.msra.mxu0 %v2190_v17  ;;  %1634 = vmatprep.subr.bf16.mxu1 %v2195_v18  ;;  %v909_v17 = vld [vmem:[%s765_s21] sm:$0x3] }
  0xe0   : > { %1716 = vmatprep.subr.bf16.mxu0 %v2198_v19  ;;  %v913_v1 = vsub.s32 0, %v912_v0  ;;  %v917_v18 = vsub.s32 1, %v912_v0 }
  0xe2   : > { %1635 = vmatpush1.bf16.msra.mxu1 %v2193_v20  ;;  %v914_v8 = vrot.slane %v909_v17, %v913_v1  ;;  %v918_v19 = vrot.slane %v909_v17, %v917_v18 }
  0xe3   : > { %1717 = vmatpush1.bf16.msra.mxu0 %v2196_v21  ;;  %1636 = vmatprep.subr.bf16.mxu1 %v2201_v22 }
  0xe4   : > { %1718 = vmatprep.subr.bf16.mxu0 %v2204_v23 }
  0xe6   : > { %1637 = vmatpush1.bf16.msra.mxu1 %v2199_v24 }
  0xe7   : > { %1719 = vmatpush1.bf16.msra.mxu0 %v2202_v25  ;;  %1638 = vmatprep.subr.bf16.mxu1 %v2207_v26 }
  0xe8   : > { %1720 = vmatprep.subr.bf16.mxu0 %v2210_v27 }
  0xea   : > { %1639 = vmatpush1.bf16.msra.mxu1 %v2205_v28 }
  0xeb   : > { %1721 = vmatpush1.bf16.msra.mxu0 %v2208_v29  ;;  %1640 = vmatprep.subr.bf16.mxu1 %v2213_v30 }
  0xec   : > { %1722 = vmatprep.subr.bf16.mxu0 %v2216_v31 }
  0xee   : > { %1641 = vmatpush1.bf16.msra.mxu1 %v2211_v32 }
  0xef   : > { %1723 = vmatpush1.bf16.msra.mxu0 %v2214_v33  ;;  %1642 = vmatprep.subr.bf16.mxu1 %v2219_v34 }
  0xf0   : > { %1724 = vmatprep.subr.bf16.mxu0 %v2222_v35 }
  0xf2   : > { %1643 = vmatpush1.bf16.msra.mxu1 %v2217_v36 }
  0xf3   : > { %1725 = vmatpush1.bf16.msra.mxu0 %v2220_v37  ;;  %1644 = vmatprep.subr.bf16.mxu1 %v2225_v38 }
  0xf4   : > { %1726 = vmatprep.subr.bf16.mxu0 %v2228_v39 }
  0xf6   : > { %1645 = vmatpush1.bf16.msra.mxu1 %v2223_v40 }
  0xf7   : > { %1727 = vmatpush1.bf16.msra.mxu0 %v2226_v41  ;;  %1646 = vmatprep.subr.bf16.mxu1 %v2231_v42 }
  0xf8   : > { %1728 = vmatprep.subr.bf16.mxu0 %v2234_v43 }
  0xfa   : > { %1647 = vmatpush1.bf16.msra.mxu1 %v2229_v44 }
  0xfb   : > { %1729 = vmatpush1.bf16.msra.mxu0 %v2232_v45  ;;  %1648 = vmatprep.subr.bf16.mxu1 %v2237_v46 }
  0xfc   : > { %1730 = vmatprep.subr.bf16.mxu0 %v2240_v47 }
  0xfe   : > { %1649 = vmatpush1.bf16.msra.mxu1 %v2235_v48 }
  0xff   : > { %1731 = vmatpush1.bf16.msra.mxu0 %v2238_v49  ;;  %1650 = vmatprep.subr.bf16.mxu1 %v2243_v50 }
 0x100   : > { %1732 = vmatprep.subr.bf16.mxu0 %v2246_v51 }
 0x102   : > { %1651 = vmatpush1.bf16.msra.mxu1 %v2241_v52 }
 0x103   : > { %1733 = vmatpush1.bf16.msra.mxu0 %v2244_v53  ;;  %1652 = vmatprep.subr.bf16.mxu1 %v2249_v54 }
 0x104   : > { %1734 = vmatprep.subr.bf16.mxu0 %v2252_v55 }
 0x106   : > { %1653 = vmatpush1.bf16.msra.mxu1 %v2247_v56 }
 0x107   : > { %1735 = vmatpush1.bf16.msra.mxu0 %v2250_v57  ;;  %1654 = vmatprep.subr.bf16.mxu1 %v2255_v58 }
 0x108   : > { %1736 = vmatprep.subr.bf16.mxu0 %v2258_v59 }
 0x10a   : > { %1655 = vmatpush1.bf16.msra.mxu1 %v2253_v60 }
 0x10b   : > { %1737 = vmatpush1.bf16.msra.mxu0 %v2256_v61  ;;  %1656 = vmatprep.subr.bf16.mxu1 %v2261_v62 }
 0x10c   : > { %1738 = vmatprep.subr.bf16.mxu0 %v2264_v63 }
 0x10e   : > { %1657 = vmatpush1.bf16.msra.mxu1 %v2259_v2 }
 0x10f   : > { %1739 = vmatpush1.bf16.msra.mxu0 %v2262_v3  ;;  %1658 = vmatprep.subr.bf16.mxu1 %v2267_v4 }
 0x110   : > { %1740 = vmatprep.subr.bf16.mxu0 %v2270_v5 }
 0x112   : > { %1659 = vmatpush1.bf16.msra.mxu1 %v2265_v6 }
 0x113   : > { %1741 = vmatpush1.bf16.msra.mxu0 %v2268_v7  ;;  %1660 = vmatprep.subr.bf16.mxu1 %v2273_v10 }
 0x114   : > { %1742 = vmatprep.subr.bf16.mxu0 %v2276_v11 }
 0x116   : > { %1661 = vmatpush1.bf16.msra.mxu1 %v2271_v12 }
 0x117   : > { %1743 = vmatpush1.bf16.msra.mxu0 %v2274_v13 }
 0x119   : > { %1663 = vmatmul.mubr.bf16.vlgmr.msra.gmra.mrb[0].mxu1 %v1890_v14 }
 0x11a   : > { %1745 = vmatmul.mubr.bf16.vlgmr.msra.gmra.mrb[0].mxu0 %v1894_v15 }
 0x1ec   : > { %v1664_v20 = vpop.f32.mrb[0].mxu1 }
 0x1ed   : > { %v1746_v9 = vpop.f32.mrb[0].mxu0  ;;  %v2029_v21 = vadd.f32 %v1664_v20, %v914_v8  ;;  %v1666_v22 = vpop.f32.mrb[1].mxu1 }
 0x1ee   : > { %v1748_v23 = vpop.f32.mrb[1].mxu0  ;;  %v2031_v24 = vadd.f32 %v1666_v22, %v918_v19  ;;  %v1668_v25 = vpop.f32.mrb[2].mxu1 }
 0x1ef   : > { %v1750_v26 = vpop.f32.mrb[2].mxu0  ;;  %v2030_v27 = vadd.f32 %v2029_v21, %v1746_v9  ;;  %v1669_v28 = vpop.f32.mrb[3].mxu1 }
 0x1f0   : > { %v1751_v29 = vpop.f32.mrb[3].mxu0  ;;  %v2032_v30 = vadd.f32 %v2031_v24, %v1748_v23 }
 0x1f1   : > { %v1753_v31 = vmax.f32 %v2030_v27, 0.0 }
 0x1f2   : > { %v1754_v32 = vmax.f32 %v2032_v30, 0.0 }
 0x1f4   : > { %v2028_v33 = vpack.c.bf16 %v1754_v32, %v1753_v31 }
 0x1f6   : > { %1763 = vst [vmem:[%s775_s24] sm:$0xff] %v2028_v33 }
 0x1f7 PF: > { %s13_s16 = sadd.s32 1, %s2319_s16   ;;  %s2839_s12 = smov %s2307_s13 }
 0x1f8   : > { %p10_p10 = scmp.ge.s32.totalorder %s13_s16, 10   ;;  %s2840_s13 = smov %s2376_s20 }
 0x1f9   : > { %s2841_s14 = smov %s2315_s15  ;;  %s2842_s15 = smov %s2844_s17 }
 0x1fa   :  { %12 = sbr.rel (!%p10_p10) target bundleno = 3 (0x3), region = 111 }

// kernel: resnet50_forward.13
= control target key start
LH: loop header
LB: loop body
LE: loop exit
PB: predicated region body
PF: predicated region fallthrough
CT: control target
= control target key end

     0   :  { %vm87_vm0 = vcmask 1043456   ;;  %vm640_vm1 = vcmask 1041409   ;;  %s3050_s0 = inlined_call_operand.vmem [shape: bf16[2,4,2048], index: 0, kind: input, shape index: {}]   ;;  %s3051_s1 = inlined_call_operand.vmem [shape: f32[2048,128], index: 1, kind: input, shape index: {}]   ;;  %s3052_s2 = inlined_call_operand.vmem [shape: f32[1,128], index: 2, kind: input, shape index: {}]   ;;  %s3053_s3 = inlined_call_operand.hbm [shape: f32[2,128], index: 3, kind: output, shape index: {}]  }
   0x1   :  { %v361_v0 = vld [vmem:[%s3051_s1 + $0x80] sm:$0xff]  ;;  %v362_v1 = vld [vmem:[%s3051_s1 + $0x88] sm:$0xff]  ;;  %v363_v11 = vld [vmem:[%s3051_s1 + $0x90] sm:$0xff] }
   0x2   :  { %v345_v2 = vld [vmem:[%s3051_s1] sm:$0xff]  ;;  %v1542_v3 = vpack.c.bf16 %v362_v1, %v361_v0  ;;  %v346_v4 = vld [vmem:[%s3051_s1 + $0x8] sm:$0xff]  ;;  %v364_v13 = vld [vmem:[%s3051_s1 + $0x98] sm:$0xff] }
   0x3   :  { %v393_v5 = vld [vmem:[%s3051_s1 + $0x180] sm:$0xff]  ;;  %v394_v6 = vld [vmem:[%s3051_s1 + $0x188] sm:$0xff]  ;;  %v1544_v7 = vpack.c.bf16 %v346_v4, %v345_v2  ;;  %v347_v14 = vld [vmem:[%s3051_s1 + $0x10] sm:$0xff]  ;;  %v1546_v16 = vpack.c.bf16 %v364_v13, %v363_v11 }
   0x4   :  { %v1574_v8 = vpack.c.bf16 %v394_v6, %v393_v5  ;;  %v377_v9 = vld [vmem:[%s3051_s1 + $0x100] sm:$0xff]  ;;  %v378_v10 = vld [vmem:[%s3051_s1 + $0x108] sm:$0xff]  ;;  %1543 = vmatprep.subr.bf16.mxu0 %v1542_v3  ;;  %v348_v15 = vld [vmem:[%s3051_s1 + $0x18] sm:$0xff] }
   0x5   :  { %v1576_v12 = vpack.c.bf16 %v378_v10, %v377_v9  ;;  %1545 = vmatpush3.bf16.msra.mxu0 %v1544_v7  ;;  %v1548_v17 = vpack.c.bf16 %v348_v15, %v347_v14  ;;  %v395_v18 = vld [vmem:[%s3051_s1 + $0x190] sm:$0xff]  ;;  %v396_v19 = vld [vmem:[%s3051_s1 + $0x198] sm:$0xff]  ;;  %v365_v23 = vld [vmem:[%s3051_s1 + $0xa0] sm:$0xff] }
   0x6   :  { %1575 = vmatprep.subr.bf16.mxu1 %v1574_v8  ;;  %v379_v20 = vld [vmem:[%s3051_s1 + $0x110] sm:$0xff]  ;;  %v1578_v21 = vpack.c.bf16 %v396_v19, %v395_v18  ;;  %v380_v22 = vld [vmem:[%s3051_s1 + $0x118] sm:$0xff]  ;;  %v366_v24 = vld [vmem:[%s3051_s1 + $0xa8] sm:$0xff]  ;;  %1547 = vmatprep.subr.bf16.mxu0 %v1546_v16 }
   0x7   :  { %1577 = vmatpush3.bf16.msra.mxu1 %v1576_v12  ;;  %v1580_v25 = vpack.c.bf16 %v380_v22, %v379_v20  ;;  %v1550_v26 = vpack.c.bf16 %v366_v24, %v365_v23  ;;  %v349_v27 = vld [vmem:[%s3051_s1 + $0x20] sm:$0xff]  ;;  %v350_v28 = vld [vmem:[%s3051_s1 + $0x28] sm:$0xff]  ;;  %v367_v35 = vld [vmem:[%s3051_s1 + $0xb0] sm:$0xff] }
   0x8   :  { %v397_v29 = vld [vmem:[%s3051_s1 + $0x1a0] sm:$0xff]  ;;  %1579 = vmatprep.subr.bf16.mxu1 %v1578_v21  ;;  %v398_v30 = vld [vmem:[%s3051_s1 + $0x1a8] sm:$0xff]  ;;  %v1552_v33 = vpack.c.bf16 %v350_v28, %v349_v27  ;;  %v368_v36 = vld [vmem:[%s3051_s1 + $0xb8] sm:$0xff] }
   0x9   :  { %v381_v31 = vld [vmem:[%s3051_s1 + $0x120] sm:$0xff]  ;;  %v382_v32 = vld [vmem:[%s3051_s1 + $0x128] sm:$0xff]  ;;  %1549 = vmatpush3.bf16.msra.mxu0 %v1548_v17  ;;  %v1582_v34 = vpack.c.bf16 %v398_v30, %v397_v29  ;;  %v351_v37 = vld [vmem:[%s3051_s1 + $0x30] sm:$0xff]  ;;  %v1554_v39 = vpack.c.bf16 %v368_v36, %v367_v35 }
   0xa   :  { %1551 = vmatprep.subr.bf16.mxu0 %v1550_v26  ;;  %v1584_v38 = vpack.c.bf16 %v382_v32, %v381_v31  ;;  %v352_v40 = vld [vmem:[%s3051_s1 + $0x38] sm:$0xff]  ;;  %v399_v41 = vld [vmem:[%s3051_s1 + $0x1b0] sm:$0xff]  ;;  %v369_v46 = vld [vmem:[%s3051_s1 + $0xc0] sm:$0xff] }
   0xb   :  { %1581 = vmatpush3.bf16.msra.mxu1 %v1580_v25  ;;  %v400_v42 = vld [vmem:[%s3051_s1 + $0x1b8] sm:$0xff]  ;;  %v383_v44 = vld [vmem:[%s3051_s1 + $0x130] sm:$0xff]  ;;  %v370_v47 = vld [vmem:[%s3051_s1 + $0xc8] sm:$0xff]  ;;  %v1556_v48 = vpack.c.bf16 %v352_v40, %v351_v37 }
   0xc   :  { %1583 = vmatprep.subr.bf16.mxu1 %v1582_v34  ;;  %v1586_v43 = vpack.c.bf16 %v400_v42, %v399_v41  ;;  %v384_v45 = vld [vmem:[%s3051_s1 + $0x138] sm:$0xff]  ;;  %v353_v49 = vld [vmem:[%s3051_s1 + $0x40] sm:$0xff]  ;;  %v402_v51 = vld [vmem:[%s3051_s1 + $0x1c8] sm:$0xff]  ;;  %v1558_v53 = vpack.c.bf16 %v370_v47, %v369_v46 }
   0xd   :  { %1553 = vmatpush3.bf16.msra.mxu0 %v1552_v33  ;;  %v401_v50 = vld [vmem:[%s3051_s1 + $0x1c0] sm:$0xff]  ;;  %v1588_v52 = vpack.c.bf16 %v384_v45, %v383_v44  ;;  %v354_v54 = vld [vmem:[%s3051_s1 + $0x48] sm:$0xff]  ;;  %v371_v58 = vld [vmem:[%s3051_s1 + $0xd0] sm:$0xff] }
   0xe   :  { %1555 = vmatprep.subr.bf16.mxu0 %v1554_v39  ;;  %v385_v55 = vld [vmem:[%s3051_s1 + $0x140] sm:$0xff]  ;;  %v386_v56 = vld [vmem:[%s3051_s1 + $0x148] sm:$0xff]  ;;  %v1590_v57 = vpack.c.bf16 %v402_v51, %v401_v50  ;;  %v372_v59 = vld [vmem:[%s3051_s1 + $0xd8] sm:$0xff]  ;;  %v1560_v2 = vpack.c.bf16 %v354_v54, %v353_v49 }
   0xf   :  { %1585 = vmatpush3.bf16.msra.mxu1 %v1584_v38  ;;  %v403_v60 = vld [vmem:[%s3051_s1 + $0x1d0] sm:$0xff]  ;;  %v356_v62 = vld [vmem:[%s3051_s1 + $0x58] sm:$0xff]  ;;  %v373_v3 = vld [vmem:[%s3051_s1 + $0xe0] sm:$0xff]  ;;  %v1592_v6 = vpack.c.bf16 %v386_v56, %v385_v55  ;;  %v1562_v7 = vpack.c.bf16 %v372_v59, %v371_v58 }
  0x10   :  { %1587 = vmatprep.subr.bf16.mxu1 %v1586_v43  ;;  %v355_v61 = vld [vmem:[%s3051_s1 + $0x50] sm:$0xff]  ;;  %v404_v63 = vld [vmem:[%s3051_s1 + $0x1d8] sm:$0xff]  ;;  %v374_v4 = vld [vmem:[%s3051_s1 + $0xe8] sm:$0xff] }
  0x11   :  { %v387_v0 = vld [vmem:[%s3051_s1 + $0x150] sm:$0xff]  ;;  %v388_v1 = vld [vmem:[%s3051_s1 + $0x158] sm:$0xff]  ;;  %1557 = vmatpush3.bf16.msra.mxu0 %v1556_v48  ;;  %v2001_v5 = vld [vmem:[%s3051_s1 + $0x60] sm:$0xff]  ;;  %v1594_v11 = vpack.c.bf16 %v404_v63, %v403_v60  ;;  %v1564_v18 = vpack.c.bf16 %v356_v62, %v355_v61  ;;  %v1566_v20 = vpack.c.bf16 %v374_v4, %v373_v3 }
  0x12   :  { %1559 = vmatprep.subr.bf16.mxu0 %v1558_v53  ;;  %v358_v8 = vld [vmem:[%s3051_s1 + $0x68] sm:$0xff]  ;;  %v405_v9 = vld [vmem:[%s3051_s1 + $0x1e0] sm:$0xff]  ;;  %v375_v14 = vld [vmem:[%s3051_s1 + $0xf0] sm:$0xff]  ;;  %v1596_v19 = vpack.c.bf16 %v388_v1, %v387_v0 }
  0x13   :  { %1589 = vmatpush3.bf16.msra.mxu1 %v1588_v52  ;;  %v406_v10 = vld [vmem:[%s3051_s1 + $0x1e8] sm:$0xff]  ;;  %v389_v12 = vld [vmem:[%s3051_s1 + $0x160] sm:$0xff]  ;;  %v376_v15 = vld [vmem:[%s3051_s1 + $0xf8] sm:$0xff]  ;;  %v1568_v24 = vpack.c.bf16 %v358_v8, %v2001_v5 }
  0x14   :  { %1591 = vmatprep.subr.bf16.mxu1 %v1590_v57  ;;  %v390_v13 = vld [vmem:[%s3051_s1 + $0x168] sm:$0xff]  ;;  %v2027_v16 = vld [vmem:[%s3051_s1 + $0x70] sm:$0xff]  ;;  %v2032_v17 = vld [vmem:[%s3051_s1 + $0x78] sm:$0xff]  ;;  %v1598_v25 = vpack.c.bf16 %v406_v10, %v405_v9  ;;  %v1570_v30 = vpack.c.bf16 %v376_v15, %v375_v14 }
  0x15   :  { %1561 = vmatpush3.bf16.msra.mxu0 %v1560_v2  ;;  %v407_v21 = vld [vmem:[%s3051_s1 + $0x1f0] sm:$0xff]  ;;  %v408_v22 = vld [vmem:[%s3051_s1 + $0x1f8] sm:$0xff]  ;;  %v1600_v26 = vpack.c.bf16 %v390_v13, %v389_v12  ;;  %v15_v28 = vld [vmem:[%s3050_s0] sm:$0xff]  ;;  %v1572_v35 = vpack.c.bf16 %v2032_v17, %v2027_v16 }
  0x16   :  { %v2043_v23 = vld [vmem:[%s3051_s1 + $0x170] sm:$0xff]  ;;  %1563 = vmatprep.subr.bf16.mxu0 %v1562_v7  ;;  %v2049_v27 = vld [vmem:[%s3051_s1 + $0x178] sm:$0xff]  ;;  %v19_v29 = vld [vmem:[%s3050_s0 + $0x20] sm:$0xff]  ;;  %v23_v31 = vunpack.c.l.bf16 %v15_v28  ;;  %v24_v34 = vunpack.c.h.bf16 %v15_v28  ;;  %v1602_v36 = vpack.c.bf16 %v408_v22, %v407_v21 }
  0x17   :  { %1593 = vmatpush3.bf16.msra.mxu1 %v1592_v6  ;;  %v31_v32 = vunpack.c.l.bf16 %v19_v29  ;;  %v425_v33 = vld [vmem:[%s3051_s1 + $0x280] sm:$0xff]  ;;  %v1604_v37 = vpack.c.bf16 %v2049_v27, %v2043_v23  ;;  %v426_v38 = vld [vmem:[%s3051_s1 + $0x288] sm:$0xff]  ;;  %v32_v39 = vunpack.c.h.bf16 %v19_v29 }
  0x18   :  { %1595 = vmatprep.subr.bf16.mxu1 %v1594_v11  ;;  %v457_v40 = vld [vmem:[%s3051_s1 + $0x380] sm:$0xff]  ;;  %v458_v41 = vld [vmem:[%s3051_s1 + $0x388] sm:$0xff]  ;;  %v55_v42 = vcombine.high %v23_v31, %v23_v31  ;;  %v88_v44 = vsel %vm87_vm0, %v23_v31, 0.0  ;;  %v56_v48 = vcombine.high %v24_v34, %v24_v34  ;;  %v1606_v52 = vpack.c.bf16 %v426_v38, %v425_v33 }
  0x19   :  { %1565 = vmatpush3.bf16.msra.mxu0 %v1564_v18  ;;  %v63_v43 = vcombine.high %v31_v32, %v31_v32  ;;  %v200_v45 = vsel %vm87_vm0, %v31_v32, 0.0  ;;  %v89_v46 = vrot.slane %v88_v44, 4  ;;  %v64_v49 = vcombine.high %v32_v39, %v32_v39  ;;  %v409_v28 = vld [vmem:[%s3051_s1 + $0x200] sm:$0xff]  ;;  %v410_v29 = vld [vmem:[%s3051_s1 + $0x208] sm:$0xff] }
  0x1a   :  { %1567 = vmatprep.subr.bf16.mxu0 %v1566_v20  ;;  %v201_v47 = vrot.slane %v200_v45, 4  ;;  %v95_v50 = vsel %vm87_vm0, %v55_v42, 0.0  ;;  %v1638_v53 = vpack.c.bf16 %v458_v41, %v457_v40  ;;  %v109_v58 = vsel %vm87_vm0, %v56_v48, 0.0  ;;  %v2090_v40 = vld [vmem:[%s3051_s1 + $0x300] sm:$0xff]  ;;  %v2095_v41 = vld [vmem:[%s3051_s1 + $0x308] sm:$0xff]  ;;  %v427_v42 = vld [vmem:[%s3051_s1 + $0x290] sm:$0xff] }
  0x1b   :  { %1597 = vmatpush3.bf16.msra.mxu1 %v1596_v19  ;;  %v207_v51 = vsel %vm87_vm0, %v63_v43, 0.0  ;;  %v96_v54 = vrot.slane %v95_v50, 4  ;;  %v90_v56 = vadd.f32 %v89_v46, %v88_v44  ;;  %v221_v59 = vsel %vm87_vm0, %v64_v49, 0.0  ;;  %v428_v43 = vld [vmem:[%s3051_s1 + $0x298] sm:$0xff]  ;;  %v2107_v48 = vld [vmem:[%s3051_s1 + $0x210] sm:$0xff] }
  0x1c   :  { %1599 = vmatprep.subr.bf16.mxu1 %v1598_v25  ;;  %v208_v55 = vrot.slane %v207_v51, 4  ;;  %v202_v57 = vadd.f32 %v201_v47, %v200_v45  ;;  %v102_v60 = vsel %vm87_vm0, %v24_v34, 0.0  ;;  %v214_v61 = vsel %vm87_vm0, %v32_v39, 0.0  ;;  %v2112_v49 = vld [vmem:[%s3051_s1 + $0x218] sm:$0xff] }
  0x1d   :  { %1569 = vmatpush3.bf16.msra.mxu0 %v1568_v24  ;;  %v97_v62 = vadd.f32 %v96_v54, %v95_v50  ;;  %v91_v0 = vrot.slane %v90_v56, 2  ;;  %v110_v2 = vrot.slane %v109_v58, 4  ;;  %v222_v3 = vrot.slane %v221_v59, 4  ;;  %v2117_v50 = vld [vmem:[%s3051_s1 + $0x390] sm:$0xff] }
  0x1e   :  { %1571 = vmatprep.subr.bf16.mxu0 %v1570_v30  ;;  %v209_v63 = vadd.f32 %v208_v55, %v207_v51  ;;  %v203_v1 = vrot.slane %v202_v57, 2  ;;  %v103_v4 = vrot.slane %v102_v60, 4  ;;  %v215_v5 = vrot.slane %v214_v61, 4  ;;  %v460_v55 = vld [vmem:[%s3051_s1 + $0x398] sm:$0xff] }
  0x1f   :  { %1601 = vmatpush3.bf16.msra.mxu1 %v1600_v26  ;;  %v98_v6 = vrot.slane %v97_v62, 2  ;;  %v92_v8 = vadd.f32 %v91_v0, %v90_v56  ;;  %v111_v10 = vadd.f32 %v110_v2, %v109_v58  ;;  %v223_v11 = vadd.f32 %v222_v3, %v221_v59  ;;  %v2125_v56 = vld [vmem:[%s3051_s1 + $0x2a0] sm:$0xff] }
  0x20   :  { %1603 = vmatprep.subr.bf16.mxu1 %v1602_v36  ;;  %v210_v7 = vrot.slane %v209_v63, 2  ;;  %v204_v9 = vadd.f32 %v203_v1, %v202_v57  ;;  %v104_v12 = vadd.f32 %v103_v4, %v102_v60  ;;  %v216_v13 = vadd.f32 %v215_v5, %v214_v61  ;;  %v2130_v57 = vld [vmem:[%s3051_s1 + $0x2a8] sm:$0xff]  ;;  %v2136_v60 = vld [vmem:[%s3051_s1 + $0x310] sm:$0xff]  ;;  %v2141_v61 = vld [vmem:[%s3051_s1 + $0x318] sm:$0xff] }
  0x21   :  { %1573 = vmatpush3.bf16.msra.mxu0 %v1572_v35  ;;  %v99_v14 = vadd.f32 %v98_v6, %v97_v62  ;;  %v93_v16 = vrot.slane %v92_v8, 1  ;;  %v112_v18 = vrot.slane %v111_v10, 2  ;;  %v224_v19 = vrot.slane %v223_v11, 2  ;;  %v2146_v62 = vld [vmem:[%s3051_s1 + $0x220] sm:$0xff]  ;;  %v2161_v1 = vld [vmem:[%s3051_s1 + $0x3a8] sm:$0xff] }
  0x22   :  { %v211_v15 = vadd.f32 %v210_v7, %v209_v63  ;;  %v205_v17 = vrot.slane %v204_v9, 1  ;;  %1607 = vmatprep.subr.bf16.mxu0 %v1606_v52  ;;  %v105_v20 = vrot.slane %v104_v12, 2  ;;  %v217_v21 = vrot.slane %v216_v13, 2  ;;  %v2151_v63 = vld [vmem:[%s3051_s1 + $0x228] sm:$0xff]  ;;  %v2156_v0 = vld [vmem:[%s3051_s1 + $0x3a0] sm:$0xff] }
  0x23   :  { %1605 = vmatpush3.bf16.msra.mxu1 %v1604_v37  ;;  %v100_v22 = vrot.slane %v99_v14, 1  ;;  %v94_v24 = vadd.f32 %v93_v16, %v92_v8  ;;  %v113_v26 = vadd.f32 %v112_v18, %v111_v10  ;;  %v225_v27 = vadd.f32 %v224_v19, %v223_v11  ;;  %v2166_v6 = vld [vmem:[%s3051_s1 + $0x320] sm:$0xff]  ;;  %v2171_v7 = vld [vmem:[%s3051_s1 + $0x328] sm:$0xff]  ;;  %v2176_v8 = vld [vmem:[%s3051_s1 + $0x2b0] sm:$0xff] }
  0x24   :  { %1639 = vmatprep.subr.bf16.mxu1 %v1638_v53  ;;  %v212_v23 = vrot.slane %v211_v15, 1  ;;  %v206_v25 = vadd.f32 %v205_v17, %v204_v9  ;;  %v106_v30 = vadd.f32 %v105_v20, %v104_v12  ;;  %v218_v31 = vadd.f32 %v217_v21, %v216_v13  ;;  %v2181_v9 = vld [vmem:[%s3051_s1 + $0x2b8] sm:$0xff]  ;;  %v2186_v10 = vld [vmem:[%s3051_s1 + $0x230] sm:$0xff]  ;;  %v2218_v17 = vld [vmem:[%s3051_s1 + $0x2c0] sm:$0xff] }
  0x25   :  { %v101_v32 = vadd.f32 %v100_v22, %v99_v14  ;;  %v313_v34 = vmul.f32 0.25, %v94_v24  ;;  %v114_v36 = vrot.slane %v113_v26, 1  ;;  %v226_v37 = vrot.slane %v225_v27, 1  ;;  %v2191_v11 = vld [vmem:[%s3051_s1 + $0x238] sm:$0xff]  ;;  %v2196_v12 = vld [vmem:[%s3051_s1 + $0x3b0] sm:$0xff]  ;;  %v2223_v18 = vld [vmem:[%s3051_s1 + $0x2c8] sm:$0xff] }
  0x26   :  { %v213_v33 = vadd.f32 %v212_v23, %v211_v15  ;;  %v329_v35 = vmul.f32 0.25, %v206_v25  ;;  %v107_v38 = vrot.slane %v106_v30, 1  ;;  %v219_v39 = vrot.slane %v218_v31, 1  ;;  %v2201_v13 = vld [vmem:[%s3051_s1 + $0x3b8] sm:$0xff]  ;;  %v2208_v15 = vld [vmem:[%s3051_s1 + $0x330] sm:$0xff]  ;;  %v2228_v19 = vld [vmem:[%s3051_s1 + $0x240] sm:$0xff] }
  0x27   :  { %v314_v44 = vmul.f32 0.25, %v101_v32  ;;  %v1608_v47 = vpack.c.bf16 %v410_v29, %v409_v28  ;;  %v115_v51 = vadd.f32 %v114_v36, %v113_v26  ;;  %v227_v52 = vadd.f32 %v226_v37, %v225_v27  ;;  %v2213_v16 = vld [vmem:[%s3051_s1 + $0x338] sm:$0xff]  ;;  %v2233_v20 = vld [vmem:[%s3051_s1 + $0x248] sm:$0xff]  ;;  %v2243_v25 = vld [vmem:[%s3051_s1 + $0x3c0] sm:$0xff] }
  0x28   :  { %v330_v45 = vmul.f32 0.25, %v213_v33  ;;  %v641_v46 = vsel %vm640_vm1, %v329_v35, %v313_v34  ;;  %v108_v53 = vadd.f32 %v107_v38, %v106_v30  ;;  %v220_v54 = vadd.f32 %v219_v39, %v218_v31  ;;  %v2248_v26 = vld [vmem:[%s3051_s1 + $0x3c8] sm:$0xff]  ;;  %v2253_v27 = vld [vmem:[%s3051_s1 + $0x340] sm:$0xff]  ;;  %v2265_v30 = vld [vmem:[%s3051_s1 + $0x2d0] sm:$0xff] }
  0x29   :  { %v1610_v59 = vpack.c.bf16 %v428_v43, %v427_v42  ;;  %v316_v2 = vmul.f32 0.25, %v115_v51  ;;  %v332_v3 = vmul.f32 0.25, %v227_v52  ;;  %v1640_v14 = vpack.c.bf16 %v2095_v41, %v2090_v40  ;;  %v2260_v29 = vld [vmem:[%s3051_s1 + $0x348] sm:$0xff]  ;;  %v2279_v35 = vld [vmem:[%s3051_s1 + $0x2d8] sm:$0xff]  ;;  %v2284_v36 = vld [vmem:[%s3051_s1 + $0x250] sm:$0xff] }
  0x2a   :  { %v642_v58 = vsel %vm640_vm1, %v330_v45, %v314_v44  ;;  %v315_v4 = vmul.f32 0.25, %v108_v53  ;;  %v331_v5 = vmul.f32 0.25, %v220_v54  ;;  %v1612_v23 = vpack.c.bf16 %v2112_v49, %v2107_v48  ;;  %v16_v31 = vld [vmem:[%s3050_s0 + $0x8] sm:$0xff]  ;;  %v2289_v37 = vld [vmem:[%s3051_s1 + $0x258] sm:$0xff]  ;;  %v2302_v42 = vld [vmem:[%s3051_s1 + $0x3d0] sm:$0xff] }
  0x2b   :  { %737 = vmatprep.mubr.f32.mxu0 %v642_v58  ;;  %v644_v21 = vsel %vm640_vm1, %v332_v3, %v316_v2  ;;  %v1642_v24 = vpack.c.bf16 %v460_v55, %v2117_v50  ;;  %v1614_v28 = vpack.c.bf16 %v2130_v57, %v2125_v56  ;;  %v1644_v32 = vpack.c.bf16 %v2141_v61, %v2136_v60  ;;  %v2307_v43 = vld [vmem:[%s3051_s1 + $0x3d8] sm:$0xff]  ;;  %v20_v44 = vld [vmem:[%s3050_s0 + $0x28] sm:$0xff]  ;;  %v2321_v48 = vld [vmem:[%s3051_s1 + $0x350] sm:$0xff] }
  0x2c   :  { %738 = vmatmul.mubr.f32.vlgmr.msra.gmra.mrb[0].mxu0 %v641_v46  ;;  %v643_v22 = vsel %vm640_vm1, %v331_v5, %v315_v4  ;;  %807 = vmatprep.mubr.f32.mxu1 %v644_v21  ;;  %v1616_v33 = vpack.c.bf16 %v2151_v63, %v2146_v62  ;;  %v1646_v34 = vpack.c.bf16 %v2161_v1, %v2156_v0  ;;  %v2326_v49 = vld [vmem:[%s3051_s1 + $0x358] sm:$0xff]  ;;  %v25_v50 = vunpack.c.l.bf16 %v16_v31  ;;  %v2339_v55 = vld [vmem:[%s3051_s1 + $0x2e0] sm:$0xff]  ;;  %v2344_v56 = vld [vmem:[%s3051_s1 + $0x2e8] sm:$0xff] }
  0x2d   :  { %1609 = vmatpush3.bf16.msra.mxu0 %v1608_v47  ;;  %808 = vmatmul.mubr.f32.vlgmr.msra.gmra.mrb[0].mxu1 %v643_v22  ;;  %v1648_v38 = vpack.c.bf16 %v2171_v7, %v2166_v6  ;;  %v1618_v39 = vpack.c.bf16 %v2181_v9, %v2176_v8  ;;  %v1620_v40 = vpack.c.bf16 %v2191_v11, %v2186_v10  ;;  %v33_v58 = vunpack.c.l.bf16 %v20_v44  ;;  %v2354_v62 = vld [vmem:[%s3051_s1 + $0x260] sm:$0xff]  ;;  %v2359_v63 = vld [vmem:[%s3051_s1 + $0x268] sm:$0xff] }
  0x2e   :  { %1611 = vmatprep.subr.bf16.mxu0 %v1610_v59  ;;  %1641 = vmatpush3.bf16.msra.mxu1 %v1640_v14  ;;  %v1650_v41 = vpack.c.bf16 %v2201_v13, %v2196_v12  ;;  %v1652_v45 = vpack.c.bf16 %v2213_v16, %v2208_v15  ;;  %v1622_v46 = vpack.c.bf16 %v2223_v18, %v2218_v17  ;;  %v116_v60 = vsel %vm87_vm0, %v25_v50, 0.0 }
  0x2f   :  { %1643 = vmatprep.subr.bf16.mxu1 %v1642_v24  ;;  %v1624_v47 = vpack.c.bf16 %v2233_v20, %v2228_v19  ;;  %v1654_v51 = vpack.c.bf16 %v2248_v26, %v2243_v25  ;;  %v1656_v52 = vpack.c.bf16 %v2260_v29, %v2253_v27  ;;  %v1626_v53 = vpack.c.bf16 %v2279_v35, %v2265_v30  ;;  %v439_v30 = vld [vmem:[%s3051_s1 + $0x2f0] sm:$0xff]  ;;  %v440_v35 = vld [vmem:[%s3051_s1 + $0x2f8] sm:$0xff] }
  0x30   :  { %v1628_v54 = vpack.c.bf16 %v2289_v37, %v2284_v36  ;;  %v1658_v57 = vpack.c.bf16 %v2307_v43, %v2302_v42  ;;  %v57_v59 = vcombine.high %v25_v50, %v25_v50  ;;  %v1660_v61 = vpack.c.bf16 %v2326_v49, %v2321_v48  ;;  %v471_v27 = vld [vmem:[%s3051_s1 + $0x3f0] sm:$0xff]  ;;  %v472_v29 = vld [vmem:[%s3051_s1 + $0x3f8] sm:$0xff] }
  0x31   :  { %1613 = vmatpush3.bf16.msra.mxu0 %v1612_v23  ;;  %v117_v0 = vrot.slane %v116_v60, 4  ;;  %v26_v1 = vunpack.c.h.bf16 %v16_v31  ;;  %v34_v2 = vunpack.c.h.bf16 %v20_v44  ;;  %v1630_v3 = vpack.c.bf16 %v2344_v56, %v2339_v55 }
  0x32   :  { %1615 = vmatprep.subr.bf16.mxu0 %v1614_v28  ;;  %1645 = vmatpush3.bf16.msra.mxu1 %v1644_v32  ;;  %v65_v4 = vcombine.high %v33_v58, %v33_v58  ;;  %v123_v5 = vsel %vm87_vm0, %v57_v59, 0.0  ;;  %v228_v6 = vsel %vm87_vm0, %v33_v58, 0.0  ;;  %v1632_v11 = vpack.c.bf16 %v2359_v63, %v2354_v62  ;;  %v2375_v32 = vld [vmem:[%s3051_s1 + $0x3e0] sm:$0xff] }
  0x33   :  { %1647 = vmatprep.subr.bf16.mxu1 %v1646_v34  ;;  %v124_v7 = vrot.slane %v123_v5, 4  ;;  %v118_v8 = vadd.f32 %v117_v0, %v116_v60  ;;  %v229_v9 = vrot.slane %v228_v6, 4  ;;  %v58_v10 = vcombine.high %v26_v1, %v26_v1 }
  0x34   :  { %v235_v12 = vsel %vm87_vm0, %v65_v4, 0.0  ;;  %v66_v13 = vcombine.high %v34_v2, %v34_v2  ;;  %v130_v14 = vsel %vm87_vm0, %v26_v1, 0.0  ;;  %v242_v24 = vsel %vm87_vm0, %v34_v2, 0.0  ;;  %v2393_v1 = vld [vmem:[%s3051_s1 + $0x360] sm:$0xff] }
  0x35   :  { %1617 = vmatpush3.bf16.msra.mxu0 %v1616_v33  ;;  %v125_v15 = vadd.f32 %v124_v7, %v123_v5  ;;  %v236_v16 = vrot.slane %v235_v12, 4  ;;  %v119_v17 = vrot.slane %v118_v8, 2  ;;  %v230_v18 = vadd.f32 %v229_v9, %v228_v6  ;;  %v2380_v33 = vld [vmem:[%s3051_s1 + $0x3e8] sm:$0xff]  ;;  %v2412_v6 = vld [vmem:[%s3051_s1 + $0x270] sm:$0xff]  ;;  %v2417_v7 = vld [vmem:[%s3051_s1 + $0x278] sm:$0xff] }
  0x36   :  { %1619 = vmatprep.subr.bf16.mxu0 %v1618_v39  ;;  %1649 = vmatpush3.bf16.msra.mxu1 %v1648_v38  ;;  %v137_v21 = vsel %vm87_vm0, %v58_v10, 0.0  ;;  %v249_v22 = vsel %vm87_vm0, %v66_v13, 0.0  ;;  %v131_v23 = vrot.slane %v130_v14, 4  ;;  %v1634_v37 = vpack.c.bf16 %v440_v35, %v439_v30 }
  0x37   :  { %1651 = vmatprep.subr.bf16.mxu1 %v1650_v41  ;;  %v126_v25 = vrot.slane %v125_v15, 2  ;;  %v237_v26 = vadd.f32 %v236_v16, %v235_v12  ;;  %v120_v28 = vadd.f32 %v119_v17, %v118_v8  ;;  %v231_v31 = vrot.slane %v230_v18, 2  ;;  %v490_v16 = vld [vmem:[%s3051_s1 + $0x488] sm:$0xff] }
  0x38   :  { %v138_v34 = vrot.slane %v137_v21, 4  ;;  %v250_v38 = vrot.slane %v249_v22, 4  ;;  %v132_v39 = vadd.f32 %v131_v23, %v130_v14 }
  0x39   :  { %1621 = vmatpush3.bf16.msra.mxu0 %v1620_v40  ;;  %v243_v40 = vrot.slane %v242_v24, 4  ;;  %v127_v41 = vadd.f32 %v126_v25, %v125_v15  ;;  %v238_v44 = vrot.slane %v237_v26, 2  ;;  %v232_v50 = vadd.f32 %v231_v31, %v230_v18  ;;  %v455_v18 = vld [vmem:[%s3051_s1 + $0x370] sm:$0xff] }
  0x3a   :  { %1623 = vmatprep.subr.bf16.mxu0 %v1622_v46  ;;  %1653 = vmatpush3.bf16.msra.mxu1 %v1652_v45  ;;  %v121_v46 = vrot.slane %v120_v28, 1  ;;  %v139_v58 = vadd.f32 %v138_v34, %v137_v21  ;;  %v251_v59 = vadd.f32 %v250_v38, %v249_v22  ;;  %v133_v60 = vrot.slane %v132_v39, 2  ;;  %v456_v21 = vld [vmem:[%s3051_s1 + $0x378] sm:$0xff] }
  0x3b   :  { %1655 = vmatprep.subr.bf16.mxu1 %v1654_v51  ;;  %v244_v0 = vadd.f32 %v243_v40, %v242_v24  ;;  %v1662_v45 = vpack.c.bf16 %v2380_v33, %v2375_v32  ;;  %v128_v2 = vrot.slane %v127_v41, 1  ;;  %v239_v19 = vadd.f32 %v238_v44, %v237_v26  ;;  %v474_v26 = vld [vmem:[%s3051_s1 + $0x408] sm:$0xff]  ;;  %v491_v32 = vld [vmem:[%s3051_s1 + $0x490] sm:$0xff]  ;;  %v492_v33 = vld [vmem:[%s3051_s1 + $0x498] sm:$0xff] }
  0x3c   :  { %v233_v20 = vrot.slane %v232_v50, 1  ;;  %v140_v51 = vrot.slane %v139_v58, 2  ;;  %v134_v4 = vadd.f32 %v133_v60, %v132_v39  ;;  %v122_v10 = vadd.f32 %v121_v46, %v120_v28  ;;  %v521_v28 = vld [vmem:[%s3051_s1 + $0x580] sm:$0xff]  ;;  %v2483_v40 = vld [vmem:[%s3051_s1 + $0x508] sm:$0xff]  ;;  %v2493_v44 = vld [vmem:[%s3051_s1 + $0x418] sm:$0xff] }
  0x3d   :  { %1625 = vmatpush3.bf16.msra.mxu0 %v1624_v47  ;;  %v2398_v47 = vld [vmem:[%s3051_s1 + $0x368] sm:$0xff]  ;;  %v245_v5 = vrot.slane %v244_v0, 2  ;;  %v129_v8 = vadd.f32 %v128_v2, %v127_v41  ;;  %v240_v9 = vrot.slane %v239_v19, 1  ;;  %v2478_v39 = vld [vmem:[%s3051_s1 + $0x500] sm:$0xff]  ;;  %v2488_v41 = vld [vmem:[%s3051_s1 + $0x410] sm:$0xff] }
  0x3e   :  { %1627 = vmatprep.subr.bf16.mxu0 %v1626_v53  ;;  %v252_v53 = vrot.slane %v251_v59, 2  ;;  %1657 = vmatpush3.bf16.msra.mxu1 %v1656_v52  ;;  %v234_v12 = vadd.f32 %v233_v20, %v232_v50  ;;  %v141_v52 = vadd.f32 %v140_v51, %v139_v58  ;;  %v135_v14 = vrot.slane %v134_v4, 1  ;;  %v2498_v46 = vld [vmem:[%s3050_s0 + $0x10] sm:$0xff]  ;;  %v2516_v2 = vld [vmem:[%s3051_s1 + $0x518] sm:$0xff]  ;;  %v494_v51 = vld [vmem:[%s3051_s1 + $0x4a8] sm:$0xff] }
  0x3f   :  { %1659 = vmatprep.subr.bf16.mxu1 %v1658_v57  ;;  %v246_v15 = vadd.f32 %v245_v5, %v244_v0  ;;  %v1664_v36 = vpack.c.bf16 %v2398_v47, %v2393_v1  ;;  %v241_v42 = vadd.f32 %v240_v9, %v239_v19  ;;  %v318_v43 = vmul.f32 0.25, %v129_v8  ;;  %v489_v57 = vld [vmem:[%s3051_s1 + $0x480] sm:$0xff]  ;;  %v2503_v0 = vld [vmem:[%s3051_s1 + $0x590] sm:$0xff] }
  0x40   :  { %v253_v13 = vadd.f32 %v252_v53, %v251_v59  ;;  %v142_v17 = vrot.slane %v141_v52, 1  ;;  %v317_v23 = vmul.f32 0.25, %v122_v10  ;;  %v136_v24 = vadd.f32 %v135_v14, %v134_v4  ;;  %v2511_v1 = vld [vmem:[%s3051_s1 + $0x510] sm:$0xff]  ;;  %v2521_v19 = vld [vmem:[%s3051_s1 + $0x4a0] sm:$0xff]  ;;  %v2539_v4 = vld [vmem:[%s3051_s1 + $0x428] sm:$0xff] }
  0x41   :  { %1629 = vmatpush3.bf16.msra.mxu0 %v1628_v54  ;;  %v1636_v54 = vpack.c.bf16 %v2417_v7, %v2412_v6  ;;  %v247_v56 = vrot.slane %v246_v15, 1  ;;  %v334_v22 = vmul.f32 0.25, %v241_v42  ;;  %v333_v25 = vmul.f32 0.25, %v234_v12  ;;  %v21_v20 = vld [vmem:[%s3050_s0 + $0x30] sm:$0xff]  ;;  %v2534_v53 = vld [vmem:[%s3051_s1 + $0x420] sm:$0xff]  ;;  %v2549_v7 = vld [vmem:[%s3051_s1 + $0x5a8] sm:$0xff] }
  0x42   :  { %1631 = vmatprep.subr.bf16.mxu0 %v1630_v3  ;;  %v254_v55 = vrot.slane %v253_v13, 1  ;;  %1661 = vmatpush3.bf16.msra.mxu1 %v1660_v61  ;;  %v1666_v3 = vpack.c.bf16 %v472_v29, %v471_v27  ;;  %v143_v48 = vadd.f32 %v142_v17, %v141_v52  ;;  %v473_v61 = vld [vmem:[%s3051_s1 + $0x400] sm:$0xff]  ;;  %v1670_v63 = vpack.c.bf16 %v490_v16, %v489_v57  ;;  %v2560_v10 = vld [vmem:[%s3051_s1 + $0x528] sm:$0xff]  ;;  %v2565_v12 = vld [vmem:[%s3051_s1 + $0x4b0] sm:$0xff] }
  0x43   :  { %1663 = vmatprep.subr.bf16.mxu1 %v1662_v45  ;;  %v248_v31 = vadd.f32 %v247_v56, %v246_v15  ;;  %v646_v62 = vsel %vm640_vm1, %v334_v22, %v318_v43  ;;  %v1668_v50 = vpack.c.bf16 %v456_v21, %v455_v18  ;;  %v1672_v58 = vpack.c.bf16 %v474_v26, %v473_v61  ;;  %v524_v45 = vld [vmem:[%s3051_s1 + $0x598] sm:$0xff]  ;;  %v2544_v6 = vld [vmem:[%s3051_s1 + $0x5a0] sm:$0xff]  ;;  %v2580_v15 = vld [vmem:[%s3051_s1 + $0x430] sm:$0xff] }
  0x44   :  { %v255_v49 = vadd.f32 %v254_v55, %v253_v13  ;;  %877 = vmatprep.mubr.f32.mxu0 %v646_v62  ;;  %v320_v34 = vmul.f32 0.25, %v143_v48  ;;  %v319_v59 = vmul.f32 0.25, %v136_v24  ;;  %v645_v47 = vsel %vm640_vm1, %v333_v25, %v317_v23  ;;  %v2554_v8 = vld [vmem:[%s3051_s1 + $0x520] sm:$0xff]  ;;  %v2570_v27 = vld [vmem:[%s3051_s1 + $0x4b8] sm:$0xff]  ;;  %v2595_v57 = vld [vmem:[%s3051_s1 + $0x5b0] sm:$0xff] }
  0x45   :  { %1633 = vmatpush3.bf16.msra.mxu0 %v1632_v11  ;;  %v522_v11 = vld [vmem:[%s3051_s1 + $0x588] sm:$0xff]  ;;  %v335_v60 = vmul.f32 0.25, %v248_v31  ;;  %v1674_v5 = vpack.c.bf16 %v492_v33, %v491_v32  ;;  %v27_v9 = vunpack.c.l.bf16 %v2498_v46  ;;  %v35_v29 = vunpack.c.l.bf16 %v21_v20  ;;  %v2608_v18 = vld [vmem:[%s3051_s1 + $0x5b8] sm:$0xff]  ;;  %v2613_v21 = vld [vmem:[%s3051_s1 + $0x530] sm:$0xff] }
  0x46   :  { %1635 = vmatprep.subr.bf16.mxu0 %v1634_v37  ;;  %v336_v38 = vmul.f32 0.25, %v255_v49  ;;  %1665 = vmatpush3.bf16.msra.mxu1 %v1664_v36  ;;  %v1702_v35 = vpack.c.bf16 %v522_v11, %v521_v28  ;;  %v1704_v13 = vpack.c.bf16 %v2483_v40, %v2478_v39  ;;  %v1676_v14 = vpack.c.bf16 %v2493_v44, %v2488_v41  ;;  %v2585_v36 = vld [vmem:[%s3051_s1 + $0x438] sm:$0xff]  ;;  %v2625_v24 = vld [vmem:[%s3051_s1 + $0x4c0] sm:$0xff]  ;;  %v2631_v61 = vld [vmem:[%s3051_s1 + $0x4c8] sm:$0xff] }
  0x47   :  { %1667 = vmatprep.subr.bf16.mxu1 %v1666_v3  ;;  %v647_v52 = vsel %vm640_vm1, %v335_v60, %v319_v59  ;;  %v144_v37 = vsel %vm87_vm0, %v27_v9, 0.0  ;;  %v1706_v42 = vpack.c.bf16 %v524_v45, %v2503_v0  ;;  %v1708_v43 = vpack.c.bf16 %v2516_v2, %v2511_v1  ;;  %v2618_v22 = vld [vmem:[%s3051_s1 + $0x538] sm:$0xff]  ;;  %v2636_v26 = vld [vmem:[%s3051_s1 + $0x440] sm:$0xff]  ;;  %v2641_v28 = vld [vmem:[%s3051_s1 + $0x448] sm:$0xff] }
  0x48   :  { %v648_v30 = vsel %vm640_vm1, %v336_v38, %v320_v34  ;;  %v145_v16 = vrot.slane %v144_v37, 4  ;;  %v1680_v17 = vpack.c.bf16 %v2539_v4, %v2534_v53  ;;  %v1710_v55 = vpack.c.bf16 %v2549_v7, %v2544_v6  ;;  %v2662_v59 = vld [vmem:[%s3051_s1 + $0x5c8] sm:$0xff]  ;;  %v2668_v45 = vld [vmem:[%s3051_s1 + $0x540] sm:$0xff] }
  0x49   :  { %1637 = vmatpush3.bf16.msra.mxu0 %v1636_v54  ;;  %947 = vmatprep.mubr.f32.mxu1 %v648_v30  ;;  %v1678_v54 = vpack.c.bf16 %v494_v51, %v2521_v19  ;;  %v1712_v56 = vpack.c.bf16 %v2560_v10, %v2554_v8  ;;  %v1682_v3 = vpack.c.bf16 %v2570_v27, %v2565_v12  ;;  %v256_v49 = vsel %vm87_vm0, %v35_v29, 0.0  ;;  %v2673_v1 = vld [vmem:[%s3051_s1 + $0x548] sm:$0xff]  ;;  %v500_v10 = vld [vmem:[%s3051_s1 + $0x4d8] sm:$0xff] }
  0x4a   :  { %1671 = vmatprep.subr.bf16.mxu0 %v1670_v63  ;;  %1669 = vmatpush3.bf16.msra.mxu1 %v1668_v50  ;;  %v1684_v23 = vpack.c.bf16 %v2585_v36, %v2580_v15  ;;  %v59_v25 = vcombine.high %v27_v9, %v27_v9  ;;  %v67_v48 = vcombine.high %v35_v29, %v35_v29  ;;  %v257_v62 = vrot.slane %v256_v49, 4  ;;  %v499_v9 = vld [vmem:[%s3051_s1 + $0x4d0] sm:$0xff] }
  0x4b   :  { %1703 = vmatprep.subr.bf16.mxu1 %v1702_v35  ;;  %v146_v31 = vadd.f32 %v145_v16, %v144_v37  ;;  %v28_v63 = vunpack.c.h.bf16 %v2498_v46  ;;  %v36_v11 = vunpack.c.h.bf16 %v21_v20  ;;  %v1714_v32 = vpack.c.bf16 %v2608_v18, %v2595_v57 }
  0x4c   :  { %878 = vmatmul.mubr.f32.vlgmr.msra.gmra.mrb[2].mxu0 %v645_v47  ;;  %v1716_v33 = vpack.c.bf16 %v2618_v22, %v2613_v21  ;;  %v151_v34 = vsel %vm87_vm0, %v59_v25, 0.0  ;;  %v263_v38 = vsel %vm87_vm0, %v67_v48, 0.0  ;;  %v258_v41 = vadd.f32 %v257_v62, %v256_v49  ;;  %v501_v25 = vld [vmem:[%s3051_s1 + $0x4e0] sm:$0xff]  ;;  %v502_v48 = vld [vmem:[%s3051_s1 + $0x4e8] sm:$0xff] }
  0x4d   :  { %1673 = vmatpush3.bf16.msra.mxu0 %v1672_v58  ;;  %948 = vmatmul.mubr.f32.vlgmr.msra.gmra.mrb[2].mxu1 %v647_v52  ;;  %v152_v39 = vrot.slane %v151_v34, 4  ;;  %v264_v40 = vrot.slane %v263_v38, 4  ;;  %v60_v44 = vcombine.high %v28_v63, %v28_v63  ;;  %v1686_v46 = vpack.c.bf16 %v2631_v61, %v2625_v24  ;;  %v2657_v58 = vld [vmem:[%s3051_s1 + $0x5c0] sm:$0xff]  ;;  %v483_v52 = vld [vmem:[%s3051_s1 + $0x450] sm:$0xff] }
  0x4e   :  { %1675 = vmatprep.subr.bf16.mxu0 %v1674_v5  ;;  %1705 = vmatpush3.bf16.msra.mxu1 %v1704_v13  ;;  %v1688_v50 = vpack.c.bf16 %v2641_v28, %v2636_v26  ;;  %v68_v60 = vcombine.high %v36_v11, %v36_v11  ;;  %v158_v0 = vsel %vm87_vm0, %v28_v63, 0.0  ;;  %v147_v20 = vrot.slane %v146_v31, 2  ;;  %v484_v13 = vld [vmem:[%s3051_s1 + $0x458] sm:$0xff] }
  0x4f   :  { %1707 = vmatprep.subr.bf16.mxu1 %v1706_v42  ;;  %v153_v2 = vadd.f32 %v152_v39, %v151_v34  ;;  %v265_v19 = vadd.f32 %v264_v40, %v263_v38  ;;  %v165_v47 = vsel %vm87_vm0, %v60_v44, 0.0  ;;  %v259_v30 = vrot.slane %v258_v41, 2  ;;  %v531_v42 = vld [vmem:[%s3051_s1 + $0x5d0] sm:$0xff] }
  0x50   :  { %v166_v35 = vrot.slane %v165_v47, 4  ;;  %v277_v51 = vsel %vm87_vm0, %v68_v60, 0.0  ;;  %v159_v53 = vrot.slane %v158_v0, 4  ;;  %v1718_v4 = vpack.c.bf16 %v2662_v59, %v2657_v58 }
  0x51   :  { %1677 = vmatpush3.bf16.msra.mxu0 %v1676_v14  ;;  %v154_v5 = vrot.slane %v153_v2, 2  ;;  %v266_v6 = vrot.slane %v265_v19, 2  ;;  %v278_v7 = vrot.slane %v277_v51, 4  ;;  %v1720_v8 = vpack.c.bf16 %v2673_v1, %v2668_v45 }
  0x52   :  { %1679 = vmatprep.subr.bf16.mxu0 %v1678_v54  ;;  %1709 = vmatpush3.bf16.msra.mxu1 %v1708_v43  ;;  %v167_v12 = vadd.f32 %v166_v35, %v165_v47  ;;  %v160_v27 = vadd.f32 %v159_v53, %v158_v0  ;;  %v270_v29 = vsel %vm87_vm0, %v36_v11, 0.0  ;;  %v2694_v36 = vadd.f32 %v147_v20, %v146_v31  ;;  %v532_v43 = vld [vmem:[%s3051_s1 + $0x5d8] sm:$0xff] }
  0x53   :  { %1711 = vmatprep.subr.bf16.mxu1 %v1710_v55  ;;  %v155_v14 = vadd.f32 %v154_v5, %v153_v2  ;;  %v267_v15 = vadd.f32 %v266_v6, %v265_v19  ;;  %v279_v37 = vadd.f32 %v278_v7, %v277_v51  ;;  %v260_v54 = vadd.f32 %v259_v30, %v258_v41 }
  0x54   :  { %v168_v57 = vrot.slane %v167_v12, 2  ;;  %v161_v16 = vrot.slane %v160_v27, 2  ;;  %v1690_v55 = vpack.c.bf16 %v500_v10, %v499_v9  ;;  %v1692_v24 = vpack.c.bf16 %v484_v13, %v483_v52 }
  0x55   :  { %1681 = vmatpush3.bf16.msra.mxu0 %v1680_v17  ;;  %v271_v17 = vrot.slane %v270_v29, 4  ;;  %v268_v18 = vrot.slane %v267_v15, 1 }
  0x56   :  { %1683 = vmatprep.subr.bf16.mxu0 %v1682_v3  ;;  %1713 = vmatpush3.bf16.msra.mxu1 %v1712_v56  ;;  %v2705_v56 = vld [vmem:[%s3051_s1 + $0x550] sm:$0xff]  ;;  %v156_v3 = vrot.slane %v155_v14, 1  ;;  %v169_v49 = vadd.f32 %v168_v57, %v167_v12  ;;  %v162_v61 = vadd.f32 %v161_v16, %v160_v27 }
  0x57   :  { %1715 = vmatprep.subr.bf16.mxu1 %v1714_v32  ;;  %v272_v31 = vadd.f32 %v271_v17, %v270_v29 }
  0x59   :  { %1685 = vmatpush3.bf16.msra.mxu0 %v1684_v23  ;;  %v280_v23 = vrot.slane %v279_v37, 2 }
  0x5a   :  { %1687 = vmatprep.subr.bf16.mxu0 %v1686_v46 }
  0x5b   :  { %8 = vsyncpa [#allocation3], 0  ;;  %1717 = vmatpush3.bf16.msra.mxu1 %v1716_v33  ;;  %v1722_v62 = vpack.c.bf16 %v532_v43, %v531_v42  ;;  %v516_v63 = vld [vmem:[%s3051_s1 + $0x558] sm:$0xff]  ;;  %v485_v11 = vld [vmem:[%s3051_s1 + $0x460] sm:$0xff]  ;;  %v157_v34 = vadd.f32 %v156_v3, %v155_v14  ;;  %v269_v38 = vadd.f32 %v268_v18, %v267_v15  ;;  %v281_v39 = vadd.f32 %v280_v23, %v279_v37 }
  0x5c   :  { %v486_v32 = vld [vmem:[%s3051_s1 + $0x468] sm:$0xff]  ;;  %1719 = vmatprep.subr.bf16.mxu1 %v1718_v4  ;;  %v533_v21 = vld [vmem:[%s3051_s1 + $0x5e0] sm:$0xff]  ;;  %v149_v33 = vrot.slane %v2694_v36, 1  ;;  %v261_v40 = vrot.slane %v260_v54, 1  ;;  %v170_v41 = vrot.slane %v169_v49, 1  ;;  %v273_v44 = vrot.slane %v272_v31, 2 }
  0x5d   :  { %1689 = vmatpush3.bf16.msra.mxu0 %v1688_v50  ;;  %v534_v22 = vld [vmem:[%s3051_s1 + $0x5e8] sm:$0xff]  ;;  %v1694_v46 = vpack.c.bf16 %v502_v48, %v501_v25  ;;  %v322_v58 = vmul.f32 0.25, %v157_v34  ;;  %v338_v59 = vmul.f32 0.25, %v269_v38  ;;  %v282_v26 = vrot.slane %v281_v39, 1  ;;  %v503_v50 = vld [vmem:[%s3051_s1 + $0x4f0] sm:$0xff]  ;;  %v504_v60 = vld [vmem:[%s3051_s1 + $0x4f8] sm:$0xff] }
  0x5e   :  { %1691 = vmatprep.subr.bf16.mxu0 %v1690_v55  ;;  %v1724_v28 = vpack.c.bf16 %v516_v63, %v2705_v56  ;;  %v171_v0 = vadd.f32 %v170_v41, %v169_v49  ;;  %v163_v45 = vrot.slane %v162_v61, 1  ;;  %v274_v1 = vadd.f32 %v273_v44, %v272_v31  ;;  %v517_v20 = vld [vmem:[%s3051_s1 + $0x560] sm:$0xff]  ;;  %v518_v47 = vld [vmem:[%s3051_s1 + $0x568] sm:$0xff]  ;;  %v487_v30 = vld [vmem:[%s3051_s1 + $0x470] sm:$0xff] }
  0x5f   :  { %1721 = vmatpush3.bf16.msra.mxu1 %v1720_v8  ;;  %v1696_v2 = vpack.c.bf16 %v486_v32, %v485_v11  ;;  %v1726_v19 = vpack.c.bf16 %v534_v22, %v533_v21  ;;  %v650_v35 = vsel %vm640_vm1, %v338_v59, %v322_v58  ;;  %v283_v51 = vadd.f32 %v282_v26, %v281_v39  ;;  %v488_v53 = vld [vmem:[%s3051_s1 + $0x478] sm:$0xff]  ;;  %v535_v4 = vld [vmem:[%s3051_s1 + $0x5f0] sm:$0xff]  ;;  %v553_v29 = vld [vmem:[%s3051_s1 + $0x680] sm:$0xff] }
  0x60   :  { %1723 = vmatprep.subr.bf16.mxu1 %v1722_v62  ;;  %v536_v5 = vld [vmem:[%s3051_s1 + $0x5f8] sm:$0xff]  ;;  %v150_v6 = vadd.f32 %v149_v33, %v2694_v36  ;;  %v262_v7 = vadd.f32 %v261_v40, %v260_v54  ;;  %v324_v8 = vmul.f32 0.25, %v171_v0  ;;  %v275_v9 = vrot.slane %v274_v1, 1  ;;  %v2765_v12 = vld [vmem:[%s3051_s1 + $0x570] sm:$0xff]  ;;  %1017 = vmatprep.mubr.f32.mxu0 %v650_v35  ;;  %v554_v52 = vld [vmem:[%s3051_s1 + $0x688] sm:$0xff] }
  0x61   :  { %1693 = vmatpush3.bf16.msra.mxu0 %v1692_v24  ;;  %v1698_v10 = vpack.c.bf16 %v504_v60, %v503_v50  ;;  %v520_v27 = vld [vmem:[%s3051_s1 + $0x578] sm:$0xff]  ;;  %v340_v13 = vmul.f32 0.25, %v283_v51  ;;  %v2779_v14 = vld [vmem:[%s3051_s1 + $0x600] sm:$0xff]  ;;  %v2784_v15 = vld [vmem:[%s3051_s1 + $0x608] sm:$0xff]  ;;  %v164_v36 = vadd.f32 %v163_v45, %v162_v61  ;;  %v1728_v43 = vpack.c.bf16 %v518_v47, %v517_v20 }
  0x62   :  { %1695 = vmatprep.subr.bf16.mxu0 %v1694_v46  ;;  %v276_v37 = vadd.f32 %v275_v9, %v274_v1  ;;  %v18_v42 = vld [vmem:[%s3050_s0 + $0x18] sm:$0xff]  ;;  %v585_v57 = vld [vmem:[%s3051_s1 + $0x780] sm:$0xff]  ;;  %v586_v16 = vld [vmem:[%s3051_s1 + $0x788] sm:$0xff]  ;;  %v1700_v55 = vpack.c.bf16 %v488_v53, %v487_v30  ;;  %v1730_v56 = vpack.c.bf16 %v536_v5, %v535_v4  ;;  %v321_v3 = vmul.f32 0.25, %v150_v6 }
  0x63   :  { %1725 = vmatpush3.bf16.msra.mxu1 %v1724_v28  ;;  %v652_v54 = vsel %vm640_vm1, %v340_v13, %v324_v8  ;;  %v2799_v17 = vld [vmem:[%s3051_s1 + $0x700] sm:$0xff]  ;;  %v337_v18 = vmul.f32 0.25, %v262_v7  ;;  %v2804_v23 = vld [vmem:[%s3051_s1 + $0x708] sm:$0xff]  ;;  %v555_v24 = vld [vmem:[%s3051_s1 + $0x690] sm:$0xff]  ;;  %v1734_v48 = vpack.c.bf16 %v554_v52, %v553_v29  ;;  %v29_v31 = vunpack.c.l.bf16 %v18_v42 }
  0x64   :  { %1727 = vmatprep.subr.bf16.mxu1 %v1726_v19  ;;  %v556_v25 = vld [vmem:[%s3051_s1 + $0x698] sm:$0xff]  ;;  %1087 = vmatprep.mubr.f32.mxu1 %v652_v54  ;;  %v2815_v49 = vld [vmem:[%s3051_s1 + $0x610] sm:$0xff]  ;;  %v1732_v62 = vpack.c.bf16 %v520_v27, %v2765_v12  ;;  %v323_v63 = vmul.f32 0.25, %v164_v36  ;;  %v339_v11 = vmul.f32 0.25, %v276_v37  ;;  %v1736_v39 = vpack.c.bf16 %v2784_v15, %v2779_v14  ;;  %v557_v45 = vld [vmem:[%s3051_s1 + $0x6a0] sm:$0xff] }
  0x65   :  { %1697 = vmatpush3.bf16.msra.mxu0 %v1696_v2  ;;  %v22_v61 = vld [vmem:[%s3050_s0 + $0x38] sm:$0xff]  ;;  %v2829_v34 = vld [vmem:[%s3051_s1 + $0x790] sm:$0xff]  ;;  %v1766_v21 = vpack.c.bf16 %v586_v16, %v585_v57  ;;  %v1768_v22 = vpack.c.bf16 %v2804_v23, %v2799_v17  ;;  %v1738_v33 = vpack.c.bf16 %v556_v25, %v555_v24  ;;  %v649_v40 = vsel %vm640_vm1, %v337_v18, %v321_v3  ;;  %v558_v1 = vld [vmem:[%s3051_s1 + $0x6a8] sm:$0xff] }
  0x66   :  { %1699 = vmatprep.subr.bf16.mxu0 %v1698_v10  ;;  %v2824_v32 = vld [vmem:[%s3051_s1 + $0x618] sm:$0xff]  ;;  %v37_v41 = vunpack.c.l.bf16 %v22_v61  ;;  %v61_v44 = vcombine.high %v29_v31, %v29_v31  ;;  %v172_v46 = vsel %vm87_vm0, %v29_v31, 0.0  ;;  %v2849_v26 = vld [vmem:[%s3051_s1 + $0x710] sm:$0xff]  ;;  %v30_v50 = vunpack.c.h.bf16 %v18_v42  ;;  %v2866_v2 = vld [vmem:[%s3051_s1 + $0x620] sm:$0xff] }
  0x67   :  { %v2834_v38 = vld [vmem:[%s3051_s1 + $0x798] sm:$0xff]  ;;  %1729 = vmatpush3.bf16.msra.mxu1 %v1728_v43  ;;  %v1740_v58 = vpack.c.bf16 %v2824_v32, %v2815_v49  ;;  %v38_v60 = vunpack.c.h.bf16 %v22_v61  ;;  %v651_v0 = vsel %vm640_vm1, %v339_v11, %v323_v63  ;;  %v2873_v30 = vld [vmem:[%s3051_s1 + $0x628] sm:$0xff]  ;;  %v2878_v35 = vld [vmem:[%s3051_s1 + $0x7a0] sm:$0xff]  ;;  %v173_v4 = vrot.slane %v172_v46, 4 }
  0x68   :  { %1731 = vmatprep.subr.bf16.mxu1 %v1730_v56  ;;  %v1770_v59 = vpack.c.bf16 %v2834_v38, %v2829_v34  ;;  %v2854_v28 = vld [vmem:[%s3051_s1 + $0x718] sm:$0xff]  ;;  %v69_v19 = vcombine.high %v37_v41, %v37_v41  ;;  %v179_v20 = vsel %vm87_vm0, %v61_v44, 0.0  ;;  %v284_v47 = vsel %vm87_vm0, %v37_v41, 0.0  ;;  %v2883_v51 = vld [vmem:[%s3051_s1 + $0x7a8] sm:$0xff]  ;;  %v2893_v29 = vld [vmem:[%s3051_s1 + $0x720] sm:$0xff] }
  0x69   :  { %1701 = vmatpush3.bf16.msra.mxu0 %v1700_v55  ;;  %v180_v53 = vrot.slane %v179_v20, 4  ;;  %v285_v5 = vrot.slane %v284_v47, 4  ;;  %v62_v6 = vcombine.high %v30_v50, %v30_v50  ;;  %v70_v8 = vcombine.high %v38_v60, %v38_v60  ;;  %v2898_v52 = vld [vmem:[%s3051_s1 + $0x728] sm:$0xff]  ;;  %v559_v37 = vld [vmem:[%s3051_s1 + $0x6b0] sm:$0xff]  ;;  %v560_v42 = vld [vmem:[%s3051_s1 + $0x6b8] sm:$0xff] }
  0x6a   :  { %1735 = vmatprep.subr.bf16.mxu0 %v1734_v48  ;;  %v291_v7 = vsel %vm87_vm0, %v69_v19, 0.0  ;;  %v186_v9 = vsel %vm87_vm0, %v30_v50, 0.0  ;;  %v298_v10 = vsel %vm87_vm0, %v38_v60, 0.0  ;;  %v1772_v12 = vpack.c.bf16 %v2854_v28, %v2849_v26  ;;  %v2913_v43 = vld [vmem:[%s3051_s1 + $0x630] sm:$0xff]  ;;  %v544_v16 = vld [vmem:[%s3051_s1 + $0x638] sm:$0xff]  ;;  %v546_v41 = vld [vmem:[%s3051_s1 + $0x648] sm:$0xff] }
  0x6b   :  { %1733 = vmatpush3.bf16.msra.mxu1 %v1732_v62  ;;  %v1742_v27 = vpack.c.bf16 %v558_v1, %v557_v45  ;;  %v181_v13 = vadd.f32 %v180_v53, %v179_v20  ;;  %v292_v14 = vrot.slane %v291_v7, 4  ;;  %v1744_v15 = vpack.c.bf16 %v2873_v30, %v2866_v2  ;;  %v591_v17 = vld [vmem:[%s3051_s1 + $0x7b0] sm:$0xff]  ;;  %v592_v55 = vld [vmem:[%s3051_s1 + $0x7b8] sm:$0xff]  ;;  %v593_v44 = vld [vmem:[%s3051_s1 + $0x7c0] sm:$0xff] }
  0x6c   :  { %1018 = vmatmul.mubr.f32.vlgmr.msra.gmra.mrb[4].mxu0 %v649_v40  ;;  %1767 = vmatprep.subr.bf16.mxu1 %v1766_v21  ;;  %v1774_v36 = vpack.c.bf16 %v2883_v51, %v2878_v35  ;;  %v193_v54 = vsel %vm87_vm0, %v62_v6, 0.0  ;;  %v305_v57 = vsel %vm87_vm0, %v70_v8, 0.0  ;;  %v187_v18 = vrot.slane %v186_v9, 4  ;;  %v575_v62 = vld [vmem:[%s3051_s1 + $0x730] sm:$0xff]  ;;  %v576_v63 = vld [vmem:[%s3051_s1 + $0x738] sm:$0xff]  ;;  %v562_v21 = vld [vmem:[%s3051_s1 + $0x6c8] sm:$0xff] }
  0x6d   :  { %1737 = vmatpush3.bf16.msra.mxu0 %v1736_v39  ;;  %v182_v56 = vrot.slane %v181_v13, 2  ;;  %v293_v3 = vadd.f32 %v292_v14, %v291_v7  ;;  %v299_v23 = vrot.slane %v298_v10, 4  ;;  %v174_v24 = vadd.f32 %v173_v4, %v172_v46  ;;  %v561_v39 = vld [vmem:[%s3051_s1 + $0x6c0] sm:$0xff]  ;;  %v594_v46 = vld [vmem:[%s3051_s1 + $0x7c8] sm:$0xff]  ;;  %v563_v51 = vld [vmem:[%s3051_s1 + $0x6d0] sm:$0xff] }
  0x6e   :  { %1739 = vmatprep.subr.bf16.mxu0 %v1738_v33  ;;  %1088 = vmatmul.mubr.f32.vlgmr.msra.gmra.mrb[4].mxu1 %v651_v0  ;;  %v286_v25 = vadd.f32 %v285_v5, %v284_v47  ;;  %v194_v48 = vrot.slane %v193_v54, 4  ;;  %v306_v49 = vrot.slane %v305_v57, 4  ;;  %v1776_v61 = vpack.c.bf16 %v2898_v52, %v2893_v29  ;;  %v577_v35 = vld [vmem:[%s3051_s1 + $0x740] sm:$0xff]  ;;  %v564_v53 = vld [vmem:[%s3051_s1 + $0x6d8] sm:$0xff]  ;;  %v578_v6 = vld [vmem:[%s3051_s1 + $0x748] sm:$0xff] }
  0x6f   :  { %1769 = vmatpush3.bf16.msra.mxu1 %v1768_v22  ;;  %v1746_v31 = vpack.c.bf16 %v560_v42, %v559_v37  ;;  %v183_v11 = vadd.f32 %v182_v56, %v181_v13  ;;  %v294_v32 = vrot.slane %v293_v3, 2  ;;  %v1748_v34 = vpack.c.bf16 %v544_v16, %v2913_v43  ;;  %v545_v22 = vld [vmem:[%s3051_s1 + $0x640] sm:$0xff]  ;;  %v547_v7 = vld [vmem:[%s3051_s1 + $0x650] sm:$0xff]  ;;  %v548_v8 = vld [vmem:[%s3051_s1 + $0x658] sm:$0xff] }
  0x70   :  { %1771 = vmatprep.subr.bf16.mxu1 %v1770_v59  ;;  %v1778_v38 = vpack.c.bf16 %v592_v55, %v591_v17  ;;  %v195_v33 = vadd.f32 %v194_v48, %v193_v54  ;;  %v307_v40 = vadd.f32 %v306_v49, %v305_v57  ;;  %v188_v26 = vadd.f32 %v187_v18, %v186_v9  ;;  %v595_v29 = vld [vmem:[%s3051_s1 + $0x7d0] sm:$0xff]  ;;  %v596_v52 = vld [vmem:[%s3051_s1 + $0x7d8] sm:$0xff]  ;;  %v565_v57 = vld [vmem:[%s3051_s1 + $0x6e0] sm:$0xff] }
  0x71   :  { %1741 = vmatpush3.bf16.msra.mxu0 %v1740_v58  ;;  %v184_v58 = vrot.slane %v183_v11, 1  ;;  %v295_v59 = vadd.f32 %v294_v32, %v293_v3  ;;  %v300_v28 = vadd.f32 %v299_v23, %v298_v10  ;;  %v175_v50 = vrot.slane %v174_v24, 2  ;;  %v566_v16 = vld [vmem:[%s3051_s1 + $0x6e8] sm:$0xff]  ;;  %v579_v3 = vld [vmem:[%s3051_s1 + $0x750] sm:$0xff]  ;;  %v580_v18 = vld [vmem:[%s3051_s1 + $0x758] sm:$0xff] }
  0x72   :  { %1743 = vmatprep.subr.bf16.mxu0 %v1742_v27  ;;  %v287_v60 = vrot.slane %v286_v25, 2  ;;  %v196_v0 = vrot.slane %v195_v33, 2  ;;  %v308_v45 = vrot.slane %v307_v40, 2  ;;  %v1780_v1 = vpack.c.bf16 %v576_v63, %v575_v62  ;;  %v549_v48 = vld [vmem:[%s3051_s1 + $0x660] sm:$0xff]  ;;  %v550_v49 = vld [vmem:[%s3051_s1 + $0x668] sm:$0xff] }
  0x73   :  { %1773 = vmatpush3.bf16.msra.mxu1 %v1772_v12  ;;  %v1750_v2 = vpack.c.bf16 %v562_v21, %v561_v39  ;;  %v185_v19 = vadd.f32 %v184_v58, %v183_v11  ;;  %v296_v20 = vrot.slane %v295_v59, 1  ;;  %v1752_v47 = vpack.c.bf16 %v546_v41, %v545_v22  ;;  %v597_v32 = vld [vmem:[%s3051_s1 + $0x7e0] sm:$0xff]  ;;  %v568_v39 = vld [vmem:[%s3051_s1 + $0x6f8] sm:$0xff]  ;;  %v582_v58 = vld [vmem:[%s3051_s1 + $0x768] sm:$0xff] }
  0x74   :  { %1775 = vmatprep.subr.bf16.mxu1 %v1774_v36  ;;  %v1782_v30 = vpack.c.bf16 %v594_v46, %v593_v44  ;;  %v197_v4 = vadd.f32 %v196_v0, %v195_v33  ;;  %v309_v5 = vadd.f32 %v308_v45, %v307_v40  ;;  %v189_v12 = vrot.slane %v188_v26, 2  ;;  %v581_v46 = vld [vmem:[%s3051_s1 + $0x760] sm:$0xff]  ;;  %v599_v0 = vld [vmem:[%s3051_s1 + $0x7f0] sm:$0xff]  ;;  %v600_v45 = vld [vmem:[%s3051_s1 + $0x7f8] sm:$0xff] }
  0x75   :  { %1745 = vmatpush3.bf16.msra.mxu0 %v1744_v15  ;;  %v297_v9 = vadd.f32 %v296_v20, %v295_v59  ;;  %v326_v10 = vmul.f32 0.25, %v185_v19  ;;  %v301_v27 = vrot.slane %v300_v28, 2  ;;  %v176_v13 = vadd.f32 %v175_v50, %v174_v24  ;;  %v551_v59 = vld [vmem:[%s3051_s1 + $0x670] sm:$0xff] }
  0x76   :  { %1747 = vmatprep.subr.bf16.mxu0 %v1746_v31  ;;  %v288_v14 = vadd.f32 %v287_v60, %v286_v25  ;;  %v198_v15 = vrot.slane %v197_v4, 1  ;;  %v310_v36 = vrot.slane %v309_v5, 1  ;;  %v1754_v37 = vpack.c.bf16 %v564_v53, %v563_v51  ;;  %v552_v60 = vld [vmem:[%s3051_s1 + $0x678] sm:$0xff] }
  0x77   :  { %1777 = vmatpush3.bf16.msra.mxu1 %v1776_v61  ;;  %v342_v42 = vmul.f32 0.25, %v297_v9  ;;  %v1784_v43 = vpack.c.bf16 %v578_v6, %v577_v35  ;;  %v1756_v54 = vpack.c.bf16 %v548_v8, %v547_v7  ;;  %v1786_v56 = vpack.c.bf16 %v596_v52, %v595_v29  ;;  %v584_v35 = vld [vmem:[%s3051_s1 + $0x778] sm:$0xff] }
  0x78   :  { %1779 = vmatprep.subr.bf16.mxu1 %v1778_v38  ;;  %v199_v17 = vadd.f32 %v198_v15, %v197_v4  ;;  %v311_v55 = vadd.f32 %v310_v36, %v309_v5  ;;  %v190_v24 = vadd.f32 %v189_v12, %v188_v26  ;;  %v302_v25 = vadd.f32 %v301_v27, %v300_v28  ;;  %v567_v38 = vld [vmem:[%s3051_s1 + $0x6f0] sm:$0xff] }
  0x79   :  { %1749 = vmatpush3.bf16.msra.mxu0 %v1748_v34  ;;  %v654_v23 = vsel %vm640_vm1, %v342_v42, %v326_v10  ;;  %v177_v61 = vrot.slane %v176_v13, 1  ;;  %v289_v31 = vrot.slane %v288_v14, 1  ;;  %v1758_v11 = vpack.c.bf16 %v566_v16, %v565_v57  ;;  %v598_v34 = vld [vmem:[%s3051_s1 + $0x7e8] sm:$0xff]  ;;  %v1261_v10 = vld [vmem:[%s3052_s2] ss:$0 sm:$0xff] }
  0x7a   :  { %1751 = vmatprep.subr.bf16.mxu0 %v1750_v2  ;;  %v328_v62 = vmul.f32 0.25, %v199_v17  ;;  %v344_v63 = vmul.f32 0.25, %v311_v55  ;;  %1157 = vmatprep.mubr.f32.mxu0 %v654_v23  ;;  %v1788_v22 = vpack.c.bf16 %v580_v18, %v579_v3  ;;  %v1760_v33 = vpack.c.bf16 %v550_v49, %v549_v48 }
  0x7b   :  { %1781 = vmatpush3.bf16.msra.mxu1 %v1780_v1  ;;  %v191_v40 = vrot.slane %v190_v24, 1  ;;  %v303_v41 = vrot.slane %v302_v25, 1  ;;  %v1790_v44 = vpack.c.bf16 %v598_v34, %v597_v32  ;;  %v178_v26 = vadd.f32 %v177_v61, %v176_v13 }
  0x7c   :  { %1783 = vmatprep.subr.bf16.mxu1 %v1782_v30  ;;  %v656_v21 = vsel %vm640_vm1, %v344_v63, %v328_v62  ;;  %v290_v28 = vadd.f32 %v289_v31, %v288_v14  ;;  %v1762_v50 = vpack.c.bf16 %v568_v39, %v567_v38  ;;  %v1792_v1 = vpack.c.bf16 %v582_v58, %v581_v46  ;;  %v583_v30 = vld [vmem:[%s3051_s1 + $0x770] sm:$0xff]  ;;  %s1827_s1 = smov [#allocation2]  }
  0x7d   :  { %1753 = vmatpush3.bf16.msra.mxu0 %v1752_v47  ;;  %1227 = vmatprep.mubr.f32.mxu1 %v656_v21  ;;  %v192_v2 = vadd.f32 %v191_v40, %v190_v24  ;;  %v304_v19 = vadd.f32 %v303_v41, %v302_v25  ;;  %v1764_v20 = vpack.c.bf16 %v552_v60, %v551_v59  ;;  %v325_v51 = vmul.f32 0.25, %v178_v26  ;;  %s1253_s2 = sshll.u32 %s1827_s1, 4  ;;  %s1254_s2 = int_to_ptr.vmem [resolvable:$true] %s1253_s2 }
  0x7e   :  { %1755 = vmatprep.subr.bf16.mxu0 %v1754_v37  ;;  %v1794_v47 = vpack.c.bf16 %v600_v45, %v599_v0  ;;  %v341_v53 = vmul.f32 0.25, %v290_v28  ;;  %v1796_v4 = vpack.c.bf16 %v584_v35, %v583_v30  ;;  %vm1233_vm2 = vcmask 1041408   ;;  %s1803_s25 = scalar_lea.vmem %s1254_s2, 32  ;;  %p1808_p1 = scmp.lt.s32.totalorder %s1254_s2, %s1254_s2 }
  0x7f   :  { %1785 = vmatpush3.bf16.msra.mxu1 %v1784_v43  ;;  %v327_v5 = vmul.f32 0.25, %v192_v2  ;;  %v343_v6 = vmul.f32 0.25, %v304_v19  ;;  %p1804_p0 = scmp.ne.s32.totalorder %s1254_s2, %s1803_s25  ;;  %p1809_p2 = scmp.lt.s32.totalorder %s1803_s25, %s1803_s25 }
  0x80   :  { %1787 = vmatprep.subr.bf16.mxu1 %v1786_v56  ;;  %v653_v7 = vsel %vm640_vm1, %v341_v53, %v325_v51 }
  0x81   :  { %1757 = vmatpush3.bf16.msra.mxu0 %v1756_v54  ;;  %v655_v8 = vsel %vm640_vm1, %v343_v6, %v327_v5  ;;  %p1810_p3 = por %p1809_p2, %p1808_p1 }
  0x82   :  { %1759 = vmatprep.subr.bf16.mxu0 %v1758_v11 }
  0x83   :  { %1789 = vmatpush3.bf16.msra.mxu1 %v1788_v22  ;;  %p1811_p4 = pnand %p1810_p3, %p1804_p0 }
  0x84   :  { %1791 = vmatprep.subr.bf16.mxu1 %v1790_v44 }
  0x85   :  { %1761 = vmatpush3.bf16.msra.mxu0 %v1760_v33 }
  0x86   :  { %1763 = vmatprep.subr.bf16.mxu0 %v1762_v50 }
  0x87   :  { %1793 = vmatpush3.bf16.msra.mxu1 %v1792_v1 }
  0x88   :  { %1795 = vmatprep.subr.bf16.mxu1 %v1794_v47 }
  0x89   :  { %1765 = vmatpush3.bf16.msra.mxu0 %v1764_v20 }
  0x8b   :  { %1797 = vmatpush3.bf16.msra.mxu1 %v1796_v4 }
  0x8c   :  { %1158 = vmatmul.mubr.f32.vlgmr.msra.gmra.mrb[6].mxu0 %v653_v7 }
  0x8e   :  { %1228 = vmatmul.mubr.f32.vlgmr.msra.gmra.mrb[6].mxu1 %v655_v8 }
  0xff   :  { %v1294_v9 = vpop.f32.mrb[0].mxu0 }
 0x100   :  { %v1295_v12 = vpop.f32.mrb[1].mxu0  ;;  %v1329_v29 = vpop.f32.mrb[0].mxu1 }
 0x101   :  { %v1296_v27 = vadd.f32 %v1295_v12, %v1294_v9  ;;  %v1330_v13 = vpop.f32.mrb[1].mxu1 }
 0x102   :  { %v1331_v14 = vadd.f32 %v1330_v13, %v1329_v29 }
 0x103   :  { %v740_v52 = vadd.f32 %v1296_v27, %v1261_v10 }
 0x105   :  { %v810_v15 = vadd.f32 %v1331_v14, %v740_v52 }
 0x11f   :  { %v1364_v36 = vpop.f32.mrb[2].mxu0 }
 0x120   :  { %v1365_v37 = vpop.f32.mrb[3].mxu0  ;;  %v1399_v43 = vpop.f32.mrb[2].mxu1 }
 0x121   :  { %v1366_v42 = vadd.f32 %v1365_v37, %v1364_v36  ;;  %v1400_v57 = vpop.f32.mrb[3].mxu1 }
 0x122   :  { %v1401_v16 = vadd.f32 %v1400_v57, %v1399_v43 }
 0x123   :  { %v880_v54 = vadd.f32 %v1366_v42, %v810_v15 }
 0x125   :  { %v950_v17 = vadd.f32 %v1401_v16, %v880_v54 }
 0x13f   :  { %v1434_v55 = vpop.f32.mrb[4].mxu0 }
 0x140   :  { %v1435_v56 = vpop.f32.mrb[5].mxu0 }
 0x141   :  { %v1436_v3 = vadd.f32 %v1435_v56, %v1434_v55  ;;  %v1469_v18 = vpop.f32.mrb[4].mxu1 }
 0x142   :  { %v1470_v24 = vpop.f32.mrb[5].mxu1 }
 0x143   :  { %v1020_v23 = vadd.f32 %v1436_v3, %v950_v17  ;;  %v1471_v25 = vadd.f32 %v1470_v24, %v1469_v18 }
 0x145   :  { %v1090_v48 = vadd.f32 %v1471_v25, %v1020_v23 }
 0x15f   :  { %v1504_v49 = vpop.f32.mrb[6].mxu0 }
 0x160   :  { %v1505_v61 = vpop.f32.mrb[7].mxu0 }
 0x161   :  { %v1506_v31 = vadd.f32 %v1505_v61, %v1504_v49  ;;  %v1539_v62 = vpop.f32.mrb[6].mxu1 }
 0x162   :  { %v1540_v11 = vpop.f32.mrb[7].mxu1 }
 0x163   :  { %v1160_v63 = vadd.f32 %v1506_v31, %v1090_v48  ;;  %v1541_v32 = vadd.f32 %v1540_v11, %v1539_v62 }
 0x165   :  { %v1230_v34 = vadd.f32 %v1541_v32, %v1160_v63 }
 0x167   :  { %v1234_v38 = vsel %vm1233_vm2, %v1230_v34, -inf }
 0x168   :  { %1235 = vmax.xlane.f32.xlu0 %v1234_v38 }
 0x1f5   :  { %v1236_v39 = vpop.xlane.xlu0 %1235 }
 0x1f6   :  { %v1237_v21 = vsub.f32 %v1230_v34, %v1236_v39 }
 0x1f8   :  { %v1238_v22 = vmul.f32 1.442695, %v1237_v21 }
 0x1fa   :  { %1799 = vpow2.f32 %v1238_v22 }
 0x204   :  { %v1800_v33 = vpop.eup %1799 }
 0x205   :  { %v1240_v40 = vsel %vm1233_vm2, %v1800_v33, 0.0 }
 0x206   :  { %1241 = vadd.xlane.f32.xlu0 %v1240_v40 }
 0x293   :  { %v1242_v41 = vpop.xlane.xlu0 %1241 }
 0x294   :  { %1801 = vlog2.f32 %v1242_v41 }
 0x29e   :  { %v1802_v44 = vpop.eup %1801 }
 0x29f   :  { %v1244_v46 = vmul.f32 0.6931472, %v1802_v44 }
 0x2a1   :  { %v1245_v58 = vsub.f32 %v1237_v21, %v1244_v46 }
 0x2a3   :  { %1246 = vst [vmem:[#allocation2] sm:$0x3] %v1245_v58 }
 0x2a4   :  { %1814 = shalt.err (!%p1811_p4)
}
 0x2a5   :  { %s1815_s28 = scalar_lea.hbm %s3053_s3, 32 }
 0x2a6   :  { %p1816_p5 = scmp.ne.s32.totalorder %s3053_s3, %s1815_s28  ;;  %p1819_p6 = scmp.lt.u32.totalorder %s1815_s28, %s3053_s3 }
 0x2a8   :  { %p1821_p7 = pnand %p1819_p6, %p1816_p5 }
 0x2aa   :  { %1824 = shalt.err (!%p1821_p7)
}
 0x2ab   :  { %1256 = dma.vmem_to_hbm [thread:$0]  %s1254_s2, 32, %s3053_s3, [#allocation3]  }
 0x2ac   :  { %1825 = dma.done.wait [#allocation3], 32  }
 0x2ad   :  { %1826 = vsyncadd [#allocation3], 4294967264 }
 0x2ae   :  { %1260 = vsyncpa [#allocation3], 1 }

</bundles_post_ra>
